<compile_context>
chip_gen: v7x
topology: tpu7x:2x2x1
jax: 0.10.0
libtpu: 0.0.40
codegen_flags: <defaults>
</compile_context>

<pallas_src>
import functools

import jax
import jax.numpy as jnp
from jax.experimental import pallas as pl
from jax.experimental.pallas import tpu as pltpu


MATMUL_DTYPE = jnp.bfloat16   # set to jnp.float32 for reference-exact numerics


def _round_up(x, m):
    return ((x + m - 1) // m) * m


def _pack_rows(parts, dtype, align=16):
    """Concatenate [rows, C] blocks along rows, padding each to a 16-row boundary."""
    offs, row, padded = {}, 0, []
    for name, arr in parts:
        arr = jnp.asarray(arr, jnp.float32)
        offs[name] = row
        r = arr.shape[0]
        rp = _round_up(r, align)
        if rp != r:
            arr = jnp.pad(arr, ((0, rp - r), (0, 0)))
        padded.append(arr)
        row += rp
    return jnp.concatenate(padded, axis=0).astype(dtype), offs


def butd_kernel(v_ref, x_ref, gru_ref, qpk_ref, fc_ref, cls_ref, out_ref, *, dims):
    S = dims["S"]; E = dims["E"]; Q = dims["Q"]
    H = dims["H"]; D = dims["D"]; N = dims["N"]
    go = dims["gru_offs"]; qo = dims["q_offs"]
    fo = dims["fc_offs"]; co = dims["cls_offs"]
    fast = dims["fast"]
    Bt = v_ref.shape[0]                 # batch rows in this grid block

    def mxdot(a, w):
        # Cast the activation to the weight dtype (bf16 MXU path) but accumulate in f32.
        return jnp.dot(a.astype(w.dtype), w, preferred_element_type=jnp.float32)

    v = v_ref[...]                      # [Bt, N, D]   (MATMUL_DTYPE)
    x = x_ref[...]                      # [S, Bt, E]   time-major word embeddings

    # ---------------- q_emb: single-layer GRU, last hidden state ----------------
    wih = gru_ref[go["wih"]:go["wih"] + E, :]               # [E, 3Q]
    whh = gru_ref[go["whh"]:go["whh"] + Q, :]               # [Q, 3Q]
    bih = gru_ref[go["bih"]:go["bih"] + 1, :].astype(jnp.float32)
    bhh = gru_ref[go["bhh"]:go["bhh"] + 1, :].astype(jnp.float32)

    # Hoisted input projection: one big MXU push for all timesteps.
    gx_all = mxdot(x.reshape(S * Bt, E), wih) + bih         # [S*Bt, 3Q] f32

    # TODO(synk): if S grows beyond ~16, switch to lax.fori_loop(..., unroll=True) carrying h
    # (bounds vreg live ranges for gx_all) instead of this static Python unroll.
    h = jnp.zeros((Bt, Q), dtype=jnp.float32)
    for t in range(S):                  # S is small & static -> fully unrolled
        gx = gx_all[t * Bt:(t + 1) * Bt, :]                 # [Bt, 3Q]
        gh = mxdot(h, whh) + bhh                            # only matmul on the serial chain
        r = jax.nn.sigmoid(gx[:, 0:Q] + gh[:, 0:Q])
        z = jax.nn.sigmoid(gx[:, Q:2 * Q] + gh[:, Q:2 * Q])
        n = jnp.tanh(gx[:, 2 * Q:3 * Q] + r * gh[:, 2 * Q:3 * Q])
        h = (1.0 - z) * n + z * h
    q_emb = h                                               # [Bt, Q] f32

    # ---------------- fused q projection: [Q, 2H] = [att_wq | qn_w] (shared LHS) ----------------
    qw = qpk_ref[qo["w"]:qo["w"] + Q, :]                    # [Q, 2H]
    qb = qpk_ref[qo["b"]:qo["b"] + 1, :].astype(jnp.float32)
    q_all = mxdot(q_emb, qw) + qb                           # [Bt, 2H]
    q_proj = q_all[:, 0:H]                                  # attention's question branch
    q_repr = jax.nn.relu(q_all[:, H:2 * H])                 # q_net output

    # ---------------- v_att: attention over objects conditioned on the question ----------------
    wv = fc_ref[fo["wv"]:fo["wv"] + D, :]                   # [D, H]
    bv = fc_ref[fo["bv"]:fo["bv"] + 1, :].astype(jnp.float32)
    wl = fc_ref[fo["wl"]:fo["wl"] + 1, :].astype(jnp.float32)   # [1, H] (Linear(H,1) weight^T)
    bl = fc_ref[fo["bl"]:fo["bl"] + 1, 0:1].astype(jnp.float32)  # [1, 1]

    v_proj = mxdot(v.reshape(Bt * N, D), wv) + bv           # flat 2-D matmul, [Bt*N, H]
    joint = jax.nn.relu(v_proj.reshape(Bt, N, H) + q_proj[:, None, :])   # [Bt, N, H]

    # Lane-dense attention logits [Bt, N]: lane reduction against the packed [1, H] row.
    logits_att = jnp.sum(joint * wl, axis=-1) + bl          # [Bt, N]  (bias cancels in softmax)
    m = jnp.max(logits_att, axis=-1, keepdims=True)
    e = jnp.exp(logits_att - m)
    s = jnp.sum(e, axis=-1, keepdims=True)
    att = e * pl.reciprocal(s, approx=fast)                 # softmax over objects (lane axis)

    v_f32 = v.astype(jnp.float32)
    v_emb = jnp.sum(att[:, :, None] * v_f32, axis=1)        # [Bt, D]  (att * v).sum(1)
    u_emb = jnp.mean(v_f32, axis=1)                         # [Bt, D]  torch.mean(v, 1)

    # ---------------- v_net / u_net ----------------
    vn_w = fc_ref[fo["vn_w"]:fo["vn_w"] + D, :]
    vn_b = fc_ref[fo["vn_b"]:fo["vn_b"] + 1, :].astype(jnp.float32)
    un_w = fc_ref[fo["un_w"]:fo["un_w"] + D, :]
    un_b = fc_ref[fo["un_b"]:fo["un_b"] + 1, :].astype(jnp.float32)

    v_repr_td = jax.nn.relu(mxdot(v_emb, vn_w) + vn_b)
    v_repr_bu = jax.nn.relu(mxdot(u_emb, un_w) + un_b)

    joint_td = q_repr * v_repr_td
    joint_bu = q_repr * v_repr_bu

    # ---------------- classifier (single [Bt,2H]@[2H,H] layer-1, lane-dense padded layer-2) ----
    c1_w = fc_ref[fo["c1_w"]:fo["c1_w"] + 2 * H, :]         # [2H, H]
    c1_b = fc_ref[fo["c1_b"]:fo["c1_b"] + 1, :].astype(jnp.float32)
    joint_cat = jnp.concatenate([joint_td, joint_bu], axis=-1)          # [Bt, 2H]
    hidden = jax.nn.relu(mxdot(joint_cat, c1_w) + c1_b)                 # [Bt, H]

    c2_w = cls_ref[co["w"]:co["w"] + H, :]                  # [H, A_pad]
    c2_b = cls_ref[co["b"]:co["b"] + 1, :].astype(jnp.float32)
    logits = mxdot(hidden, c2_w) + c2_b                     # [Bt, A_pad]
    out_ref[...] = logits.astype(out_ref.dtype)


def base_model_forward(v, b, q, labels, params, *, matmul_dtype=MATMUL_DTYPE):
    """Mirrors BaseModel.forward(v, b, q, labels); b and labels are unused (as in the reference)."""
    del b, labels

    B, N, D = v.shape
    S = q.shape[1]
    E = params["emb_table"].shape[1]
    Q = params["gru_whh"].shape[0]
    H = params["qn_w"].shape[1]
    A = params["c2_w"].shape[1]
    A_pad = _round_up(A, 128)
    wdt = jnp.dtype(matmul_dtype)
    fast = wdt == jnp.dtype(jnp.bfloat16)

    # Glue: embedding lookup (w_emb) in plain JAX, gathered directly time-major.
    x = jnp.take(params["emb_table"], q.T, axis=0).astype(wdt)    # [S, B, E]
    v_in = v.astype(wdt)

    # ---- packed weight buffers (16-row-aligned static slices inside the kernel) ----
    gru_pack, gru_offs = _pack_rows(
        [("wih", params["gru_wih"]), ("whh", params["gru_whh"]),
         ("bih", params["gru_bih"]), ("bhh", params["gru_bhh"])], wdt)

    q_pack, q_offs = _pack_rows(
        [("w", jnp.concatenate([params["att_wq"], params["qn_w"]], axis=1)),   # [Q, 2H]
         ("b", jnp.concatenate([params["att_bq"], params["qn_b"]], axis=1))], wdt)

    fc_pack, fc_offs = _pack_rows(
        [("wv", params["att_wv"]), ("bv", params["att_bv"]),
         ("wl", params["att_wl"].T),                              # [1, H]
         ("bl", jnp.broadcast_to(params["att_bl"], (1, H))),      # scalar bias, lane-replicated
         ("vn_w", params["vn_w"]), ("vn_b", params["vn_b"]),
         ("un_w", params["un_w"]), ("un_b", params["un_b"]),
         ("c1_w", params["c1_w"]), ("c1_b", params["c1_b"])], wdt)

    cls_pack, cls_offs = _pack_rows(
        [("w", jnp.pad(params["c2_w"], ((0, 0), (0, A_pad - A)))),
         ("b", jnp.pad(params["c2_b"], ((0, 0), (0, A_pad - A))))], wdt)

    # ---- batch tiling: >=2 grid steps when possible (v7x megacore) under a VMEM budget ----
    in_bytes = wdt.itemsize
    weight_bytes = sum(int(p.size) * p.dtype.itemsize
                       for p in (gru_pack, q_pack, fc_pack, cls_pack))

    def footprint(bb):
        io = 2 * (bb * N * D * in_bytes + S * bb * E * in_bytes + bb * A_pad * 4)
        live = S * bb * 3 * Q * 4 + 2 * bb * N * max(H, D) * 4
        return io + live + 2 * weight_bytes

    VMEM_BUDGET = 24 << 20          # conservative: v7x 64 MiB phys, v5e 16 MiB default scoped
    block_b = min(128, _round_up(max(pl.cdiv(B, 2), 1), 8))
    while block_b > 8 and footprint(block_b) > VMEM_BUDGET:
        block_b -= 8
    vmem_limit = int(min(max(32 << 20, 2 * footprint(block_b)), 56 << 20))

    # Pad batch to a multiple of block_b (no masked edge block running on garbage rows).
    B_pad = _round_up(B, block_b)
    if B_pad != B:
        v_in = jnp.pad(v_in, ((0, B_pad - B), (0, 0), (0, 0)))
        x = jnp.pad(x, ((0, 0), (0, B_pad - B), (0, 0)))
    grid = (B_pad // block_b,)

    dims = dict(S=S, E=E, Q=Q, H=H, D=D, N=N, fast=fast,
                gru_offs=gru_offs, q_offs=q_offs, fc_offs=fc_offs, cls_offs=cls_offs)
    kernel = functools.partial(butd_kernel, dims=dims)
    out_shape = jax.ShapeDtypeStruct((B_pad, A_pad), jnp.float32)

    def build(single_buffer_weights):
        def wspec(shape):
            if single_buffer_weights:
                # Constant-index full blocks: no need for double buffering (saves VMEM).
                return pl.BlockSpec(shape, lambda i: (0, 0), pipeline_mode=pl.Buffered(1))
            return pl.BlockSpec(shape, lambda i: (0, 0))

        return pl.pallas_call(
            kernel,
            out_shape=out_shape,
            grid=grid,
            in_specs=[
                pl.BlockSpec((block_b, N, D), lambda i: (i, 0, 0)),   # v, tiled over batch
                pl.BlockSpec((S, block_b, E), lambda i: (0, i, 0)),   # word embeddings
                wspec(gru_pack.shape),                                # packed GRU weights
                wspec(q_pack.shape),                                  # fused [Q, 2H] q weights
                wspec(fc_pack.shape),                                 # packed att/FC/classifier-1
                wspec(cls_pack.shape),                                # padded classifier-2
            ],
            out_specs=pl.BlockSpec((block_b, A_pad), lambda i: (i, 0)),
            compiler_params=pltpu.CompilerParams(
                dimension_semantics=("parallel",),
                vmem_limit_bytes=vmem_limit),
        )

    args = (v_in, x, gru_pack, q_pack, fc_pack, cls_pack)
    try:
        out = build(True)(*args)
    except Exception:
        # pipeline_mode=pl.Buffered(1) not supported on this jax version ->
        # fall back to default double-buffered weight blocks.
        out = build(False)(*args)

    return out[:B, :A]


def _init_linear(key, in_dim, out_dim, scale=0.1):
    kw, kb = jax.random.split(key)
    w = scale * jax.random.normal(kw, (in_dim, out_dim), jnp.float32)
    bias = scale * jax.random.normal(kb, (1, out_dim), jnp.float32)
    return w, bias


if __name__ == "__main__":
    # Small, forward-consistent shapes.
    B, N, D, BDIM = 2, 8, 32, 4          # batch, num_objs, obj_dim, b_dim
    S, VOCAB, E = 8, 64, 32              # seq_len, vocab, word-emb dim
    Q, H, A = 32, 32, 16                 # q_dim (GRU hidden), num_hid, num_answers

    key = jax.random.PRNGKey(0)
    keys = jax.random.split(key, 16)

    v = jax.random.normal(keys[0], (B, N, D), jnp.float32)
    b = jax.random.normal(keys[1], (B, N, BDIM), jnp.float32)     # unused in forward (as in reference)
    q = jax.random.randint(keys[2], (B, S), 0, VOCAB, jnp.int32)
    labels = None                                                 # unused in forward

    params = {}
    params["emb_table"] = 0.1 * jax.random.normal(keys[3], (VOCAB, E), jnp.float32)
    params["gru_wih"], params["gru_bih"] = _init_linear(keys[4], E, 3 * Q)
    params["gru_whh"], params["gru_bhh"] = _init_linear(keys[5], Q, 3 * Q)
    params["att_wv"], params["att_bv"] = _init_linear(keys[6], D, H)
    params["att_wq"], params["att_bq"] = _init_linear(keys[7], Q, H)
    params["att_wl"], params["att_bl"] = _init_linear(keys[8], H, 1)
    params["qn_w"], params["qn_b"] = _init_linear(keys[9], Q, H)
    params["vn_w"], params["vn_b"] = _init_linear(keys[10], D, H)
    params["un_w"], params["un_b"] = _init_linear(keys[11], D, H)
    params["c1_w"], params["c1_b"] = _init_linear(keys[12], 2 * H, H)
    params["c2_w"], params["c2_b"] = _init_linear(keys[13], H, A)

    logits = base_model_forward(v, b, q, labels, params)
    logits = jax.block_until_ready(logits)
    assert logits.shape == (B, A) and logits.dtype == jnp.float32
    assert bool(jnp.all(jnp.isfinite(logits)))
    print("KERNEL_OK")
</pallas_src>

<mosaic_0001>
module attributes {stable_mosaic.version = 11 : i64} {
  func.func @butd_kernel(%arg0: i32, %arg1: memref<8x8x32xbf16, #tpu.memory_space<vmem>>, %arg2: memref<8x8x32xbf16, #tpu.memory_space<vmem>>, %arg3: memref<96x96xbf16, #tpu.memory_space<vmem>>, %arg4: memref<48x64xbf16, #tpu.memory_space<vmem>>, %arg5: memref<256x32xbf16, #tpu.memory_space<vmem>>, %arg6: memref<48x128xbf16, #tpu.memory_space<vmem>>, %arg7: memref<8x128xf32, #tpu.memory_space<vmem>>) attributes {dimension_semantics = [#tpu.dimension_semantics<parallel>], iteration_bounds = array<i64: 1>, scalar_prefetch = 0 : i64, scratch_operands = 0 : i64, tpu.core_type = #tpu.core_type<tc>, window_params = [{transform_indices = @transform_0, window_bounds = array<i64: 8, 8, 32>}, {transform_indices = @transform_1, window_bounds = array<i64: 8, 8, 32>}, {pipeline_mode = #tpu.pipeline_mode<synchronous>, transform_indices = @transform_2, window_bounds = array<i64: 96, 96>}, {pipeline_mode = #tpu.pipeline_mode<synchronous>, transform_indices = @transform_3, window_bounds = array<i64: 48, 64>}, {pipeline_mode = #tpu.pipeline_mode<synchronous>, transform_indices = @transform_4, window_bounds = array<i64: 256, 32>}, {pipeline_mode = #tpu.pipeline_mode<synchronous>, transform_indices = @transform_5, window_bounds = array<i64: 48, 128>}, {transform_indices = @transform_6, window_bounds = array<i64: 8, 128>}]} {
    %c0 = arith.constant 0 : index
    %c0_0 = arith.constant 0 : index
    %c0_1 = arith.constant 0 : index
    %0 = vector.load %arg1[%c0, %c0_0, %c0_1] : memref<8x8x32xbf16, #tpu.memory_space<vmem>>, vector<8x8x32xbf16>
    %c0_2 = arith.constant 0 : index
    %c0_3 = arith.constant 0 : index
    %c0_4 = arith.constant 0 : index
    %1 = vector.load %arg2[%c0_2, %c0_3, %c0_4] : memref<8x8x32xbf16, #tpu.memory_space<vmem>>, vector<8x8x32xbf16>
    %c0_5 = arith.constant 0 : index
    %c0_6 = arith.constant 0 : index
    %2 = vector.load %arg3[%c0_5, %c0_6] : memref<96x96xbf16, #tpu.memory_space<vmem>>, vector<32x96xbf16>
    %c32 = arith.constant 32 : index
    %c0_7 = arith.constant 0 : index
    %3 = vector.load %arg3[%c32, %c0_7] : memref<96x96xbf16, #tpu.memory_space<vmem>>, vector<32x96xbf16>
    %c64 = arith.constant 64 : index
    %c0_8 = arith.constant 0 : index
    %4 = vector.load %arg3[%c64, %c0_8] : memref<96x96xbf16, #tpu.memory_space<vmem>>, vector<1x96xbf16>
    %5 = arith.extf %4 : vector<1x96xbf16> to vector<1x96xf32>
    %c80 = arith.constant 80 : index
    %c0_9 = arith.constant 0 : index
    %6 = vector.load %arg3[%c80, %c0_9] : memref<96x96xbf16, #tpu.memory_space<vmem>>, vector<1x96xbf16>
    %7 = arith.extf %6 : vector<1x96xbf16> to vector<1x96xf32>
    %8 = vector.shape_cast %1 : vector<8x8x32xbf16> to vector<64x32xbf16>
    %cst = arith.constant dense<0.000000e+00> : vector<64x96xf32>
    %9 = tpu.matmul %8, %2, %cst {dimension_numbers = #tpu.dot_dimension_numbers<[1], [0], [0], [1], [0, 0, 1, 1], [], []>} : vector<64x32xbf16>, vector<32x96xbf16>, vector<64x96xf32> -> vector<64x96xf32>
    %10 = vector.broadcast %5 : vector<1x96xf32> to vector<64x96xf32>
    %11 = arith.addf %9, %10 : vector<64x96xf32>
    %cst_10 = arith.constant 0.000000e+00 : f32
    %12 = vector.broadcast %cst_10 : f32 to vector<8x32xf32>
    %13 = vector.extract_strided_slice %11 {offsets = [0, 0], sizes = [8, 96], strides = [1, 1]} : vector<64x96xf32> to vector<8x96xf32>
    %14 = arith.truncf %12 : vector<8x32xf32> to vector<8x32xbf16>
    %cst_11 = arith.constant dense<0.000000e+00> : vector<8x96xf32>
    %15 = tpu.matmul %14, %3, %cst_11 {dimension_numbers = #tpu.dot_dimension_numbers<[1], [0], [0], [1], [0, 0, 1, 1], [], []>} : vector<8x32xbf16>, vector<32x96xbf16>, vector<8x96xf32> -> vector<8x96xf32>
    %16 = vector.broadcast %7 : vector<1x96xf32> to vector<8x96xf32>
    %17 = arith.addf %15, %16 : vector<8x96xf32>
    %18 = vector.extract_strided_slice %13 {offsets = [0, 0], sizes = [8, 32], strides = [1, 1]} : vector<8x96xf32> to vector<8x32xf32>
    %19 = vector.extract_strided_slice %17 {offsets = [0, 0], sizes = [8, 32], strides = [1, 1]} : vector<8x96xf32> to vector<8x32xf32>
    %20 = arith.addf %18, %19 : vector<8x32xf32>
    %21 = arith.negf %20 : vector<8x32xf32>
    %22 = math.exp %21 : vector<8x32xf32>
    %cst_12 = arith.constant 1.000000e+00 : f32
    %23 = vector.broadcast %cst_12 : f32 to vector<8x32xf32>
    %24 = arith.addf %23, %22 : vector<8x32xf32>
    %25 = arith.divf %23, %24 : vector<8x32xf32>
    %26 = vector.extract_strided_slice %13 {offsets = [0, 32], sizes = [8, 32], strides = [1, 1]} : vector<8x96xf32> to vector<8x32xf32>
    %27 = vector.extract_strided_slice %17 {offsets = [0, 32], sizes = [8, 32], strides = [1, 1]} : vector<8x96xf32> to vector<8x32xf32>
    %28 = arith.addf %26, %27 : vector<8x32xf32>
    %29 = arith.negf %28 : vector<8x32xf32>
    %30 = math.exp %29 : vector<8x32xf32>
    %cst_13 = arith.constant 1.000000e+00 : f32
    %31 = vector.broadcast %cst_13 : f32 to vector<8x32xf32>
    %32 = arith.addf %31, %30 : vector<8x32xf32>
    %33 = arith.divf %31, %32 : vector<8x32xf32>
    %34 = vector.extract_strided_slice %13 {offsets = [0, 64], sizes = [8, 32], strides = [1, 1]} : vector<8x96xf32> to vector<8x32xf32>
    %35 = vector.extract_strided_slice %17 {offsets = [0, 64], sizes = [8, 32], strides = [1, 1]} : vector<8x96xf32> to vector<8x32xf32>
    %36 = arith.mulf %25, %35 : vector<8x32xf32>
    %37 = arith.addf %34, %36 : vector<8x32xf32>
    %38 = math.tanh %37 : vector<8x32xf32>
    %cst_14 = arith.constant 1.000000e+00 : f32
    %39 = vector.broadcast %cst_14 : f32 to vector<8x32xf32>
    %40 = arith.subf %39, %33 : vector<8x32xf32>
    %41 = arith.mulf %40, %38 : vector<8x32xf32>
    %42 = arith.mulf %33, %12 : vector<8x32xf32>
    %43 = arith.addf %41, %42 : vector<8x32xf32>
    %44 = vector.extract_strided_slice %11 {offsets = [8, 0], sizes = [8, 96], strides = [1, 1]} : vector<64x96xf32> to vector<8x96xf32>
    %45 = arith.truncf %43 : vector<8x32xf32> to vector<8x32xbf16>
    %cst_15 = arith.constant dense<0.000000e+00> : vector<8x96xf32>
    %46 = tpu.matmul %45, %3, %cst_15 {dimension_numbers = #tpu.dot_dimension_numbers<[1], [0], [0], [1], [0, 0, 1, 1], [], []>} : vector<8x32xbf16>, vector<32x96xbf16>, vector<8x96xf32> -> vector<8x96xf32>
    %47 = vector.broadcast %7 : vector<1x96xf32> to vector<8x96xf32>
    %48 = arith.addf %46, %47 : vector<8x96xf32>
    %49 = vector.extract_strided_slice %44 {offsets = [0, 0], sizes = [8, 32], strides = [1, 1]} : vector<8x96xf32> to vector<8x32xf32>
    %50 = vector.extract_strided_slice %48 {offsets = [0, 0], sizes = [8, 32], strides = [1, 1]} : vector<8x96xf32> to vector<8x32xf32>
    %51 = arith.addf %49, %50 : vector<8x32xf32>
    %52 = arith.negf %51 : vector<8x32xf32>
    %53 = math.exp %52 : vector<8x32xf32>
    %cst_16 = arith.constant 1.000000e+00 : f32
    %54 = vector.broadcast %cst_16 : f32 to vector<8x32xf32>
    %55 = arith.addf %54, %53 : vector<8x32xf32>
    %56 = arith.divf %54, %55 : vector<8x32xf32>
    %57 = vector.extract_strided_slice %44 {offsets = [0, 32], sizes = [8, 32], strides = [1, 1]} : vector<8x96xf32> to vector<8x32xf32>
    %58 = vector.extract_strided_slice %48 {offsets = [0, 32], sizes = [8, 32], strides = [1, 1]} : vector<8x96xf32> to vector<8x32xf32>
    %59 = arith.addf %57, %58 : vector<8x32xf32>
    %60 = arith.negf %59 : vector<8x32xf32>
    %61 = math.exp %60 : vector<8x32xf32>
    %cst_17 = arith.constant 1.000000e+00 : f32
    %62 = vector.broadcast %cst_17 : f32 to vector<8x32xf32>
    %63 = arith.addf %62, %61 : vector<8x32xf32>
    %64 = arith.divf %62, %63 : vector<8x32xf32>
    %65 = vector.extract_strided_slice %44 {offsets = [0, 64], sizes = [8, 32], strides = [1, 1]} : vector<8x96xf32> to vector<8x32xf32>
    %66 = vector.extract_strided_slice %48 {offsets = [0, 64], sizes = [8, 32], strides = [1, 1]} : vector<8x96xf32> to vector<8x32xf32>
    %67 = arith.mulf %56, %66 : vector<8x32xf32>
    %68 = arith.addf %65, %67 : vector<8x32xf32>
    %69 = math.tanh %68 : vector<8x32xf32>
    %cst_18 = arith.constant 1.000000e+00 : f32
    %70 = vector.broadcast %cst_18 : f32 to vector<8x32xf32>
    %71 = arith.subf %70, %64 : vector<8x32xf32>
    %72 = arith.mulf %71, %69 : vector<8x32xf32>
    %73 = arith.mulf %64, %43 : vector<8x32xf32>
    %74 = arith.addf %72, %73 : vector<8x32xf32>
    %75 = vector.extract_strided_slice %11 {offsets = [16, 0], sizes = [8, 96], strides = [1, 1]} : vector<64x96xf32> to vector<8x96xf32>
    %76 = arith.truncf %74 : vector<8x32xf32> to vector<8x32xbf16>
    %cst_19 = arith.constant dense<0.000000e+00> : vector<8x96xf32>
    %77 = tpu.matmul %76, %3, %cst_19 {dimension_numbers = #tpu.dot_dimension_numbers<[1], [0], [0], [1], [0, 0, 1, 1], [], []>} : vector<8x32xbf16>, vector<32x96xbf16>, vector<8x96xf32> -> vector<8x96xf32>
    %78 = vector.broadcast %7 : vector<1x96xf32> to vector<8x96xf32>
    %79 = arith.addf %77, %78 : vector<8x96xf32>
    %80 = vector.extract_strided_slice %75 {offsets = [0, 0], sizes = [8, 32], strides = [1, 1]} : vector<8x96xf32> to vector<8x32xf32>
    %81 = vector.extract_strided_slice %79 {offsets = [0, 0], sizes = [8, 32], strides = [1, 1]} : vector<8x96xf32> to vector<8x32xf32>
    %82 = arith.addf %80, %81 : vector<8x32xf32>
    %83 = arith.negf %82 : vector<8x32xf32>
    %84 = math.exp %83 : vector<8x32xf32>
    %cst_20 = arith.constant 1.000000e+00 : f32
    %85 = vector.broadcast %cst_20 : f32 to vector<8x32xf32>
    %86 = arith.addf %85, %84 : vector<8x32xf32>
    %87 = arith.divf %85, %86 : vector<8x32xf32>
    %88 = vector.extract_strided_slice %75 {offsets = [0, 32], sizes = [8, 32], strides = [1, 1]} : vector<8x96xf32> to vector<8x32xf32>
    %89 = vector.extract_strided_slice %79 {offsets = [0, 32], sizes = [8, 32], strides = [1, 1]} : vector<8x96xf32> to vector<8x32xf32>
    %90 = arith.addf %88, %89 : vector<8x32xf32>
    %91 = arith.negf %90 : vector<8x32xf32>
    %92 = math.exp %91 : vector<8x32xf32>
    %cst_21 = arith.constant 1.000000e+00 : f32
    %93 = vector.broadcast %cst_21 : f32 to vector<8x32xf32>
    %94 = arith.addf %93, %92 : vector<8x32xf32>
    %95 = arith.divf %93, %94 : vector<8x32xf32>
    %96 = vector.extract_strided_slice %75 {offsets = [0, 64], sizes = [8, 32], strides = [1, 1]} : vector<8x96xf32> to vector<8x32xf32>
    %97 = vector.extract_strided_slice %79 {offsets = [0, 64], sizes = [8, 32], strides = [1, 1]} : vector<8x96xf32> to vector<8x32xf32>
    %98 = arith.mulf %87, %97 : vector<8x32xf32>
    %99 = arith.addf %96, %98 : vector<8x32xf32>
    %100 = math.tanh %99 : vector<8x32xf32>
    %cst_22 = arith.constant 1.000000e+00 : f32
    %101 = vector.broadcast %cst_22 : f32 to vector<8x32xf32>
    %102 = arith.subf %101, %95 : vector<8x32xf32>
    %103 = arith.mulf %102, %100 : vector<8x32xf32>
    %104 = arith.mulf %95, %74 : vector<8x32xf32>
    %105 = arith.addf %103, %104 : vector<8x32xf32>
    %106 = vector.extract_strided_slice %11 {offsets = [24, 0], sizes = [8, 96], strides = [1, 1]} : vector<64x96xf32> to vector<8x96xf32>
    %107 = arith.truncf %105 : vector<8x32xf32> to vector<8x32xbf16>
    %cst_23 = arith.constant dense<0.000000e+00> : vector<8x96xf32>
    %108 = tpu.matmul %107, %3, %cst_23 {dimension_numbers = #tpu.dot_dimension_numbers<[1], [0], [0], [1], [0, 0, 1, 1], [], []>} : vector<8x32xbf16>, vector<32x96xbf16>, vector<8x96xf32> -> vector<8x96xf32>
    %109 = vector.broadcast %7 : vector<1x96xf32> to vector<8x96xf32>
    %110 = arith.addf %108, %109 : vector<8x96xf32>
    %111 = vector.extract_strided_slice %106 {offsets = [0, 0], sizes = [8, 32], strides = [1, 1]} : vector<8x96xf32> to vector<8x32xf32>
    %112 = vector.extract_strided_slice %110 {offsets = [0, 0], sizes = [8, 32], strides = [1, 1]} : vector<8x96xf32> to vector<8x32xf32>
    %113 = arith.addf %111, %112 : vector<8x32xf32>
    %114 = arith.negf %113 : vector<8x32xf32>
    %115 = math.exp %114 : vector<8x32xf32>
    %cst_24 = arith.constant 1.000000e+00 : f32
    %116 = vector.broadcast %cst_24 : f32 to vector<8x32xf32>
    %117 = arith.addf %116, %115 : vector<8x32xf32>
    %118 = arith.divf %116, %117 : vector<8x32xf32>
    %119 = vector.extract_strided_slice %106 {offsets = [0, 32], sizes = [8, 32], strides = [1, 1]} : vector<8x96xf32> to vector<8x32xf32>
    %120 = vector.extract_strided_slice %110 {offsets = [0, 32], sizes = [8, 32], strides = [1, 1]} : vector<8x96xf32> to vector<8x32xf32>
    %121 = arith.addf %119, %120 : vector<8x32xf32>
    %122 = arith.negf %121 : vector<8x32xf32>
    %123 = math.exp %122 : vector<8x32xf32>
    %cst_25 = arith.constant 1.000000e+00 : f32
    %124 = vector.broadcast %cst_25 : f32 to vector<8x32xf32>
    %125 = arith.addf %124, %123 : vector<8x32xf32>
    %126 = arith.divf %124, %125 : vector<8x32xf32>
    %127 = vector.extract_strided_slice %106 {offsets = [0, 64], sizes = [8, 32], strides = [1, 1]} : vector<8x96xf32> to vector<8x32xf32>
    %128 = vector.extract_strided_slice %110 {offsets = [0, 64], sizes = [8, 32], strides = [1, 1]} : vector<8x96xf32> to vector<8x32xf32>
    %129 = arith.mulf %118, %128 : vector<8x32xf32>
    %130 = arith.addf %127, %129 : vector<8x32xf32>
    %131 = math.tanh %130 : vector<8x32xf32>
    %cst_26 = arith.constant 1.000000e+00 : f32
    %132 = vector.broadcast %cst_26 : f32 to vector<8x32xf32>
    %133 = arith.subf %132, %126 : vector<8x32xf32>
    %134 = arith.mulf %133, %131 : vector<8x32xf32>
    %135 = arith.mulf %126, %105 : vector<8x32xf32>
    %136 = arith.addf %134, %135 : vector<8x32xf32>
    %137 = vector.extract_strided_slice %11 {offsets = [32, 0], sizes = [8, 96], strides = [1, 1]} : vector<64x96xf32> to vector<8x96xf32>
    %138 = arith.truncf %136 : vector<8x32xf32> to vector<8x32xbf16>
    %cst_27 = arith.constant dense<0.000000e+00> : vector<8x96xf32>
    %139 = tpu.matmul %138, %3, %cst_27 {dimension_numbers = #tpu.dot_dimension_numbers<[1], [0], [0], [1], [0, 0, 1, 1], [], []>} : vector<8x32xbf16>, vector<32x96xbf16>, vector<8x96xf32> -> vector<8x96xf32>
    %140 = vector.broadcast %7 : vector<1x96xf32> to vector<8x96xf32>
    %141 = arith.addf %139, %140 : vector<8x96xf32>
    %142 = vector.extract_strided_slice %137 {offsets = [0, 0], sizes = [8, 32], strides = [1, 1]} : vector<8x96xf32> to vector<8x32xf32>
    %143 = vector.extract_strided_slice %141 {offsets = [0, 0], sizes = [8, 32], strides = [1, 1]} : vector<8x96xf32> to vector<8x32xf32>
    %144 = arith.addf %142, %143 : vector<8x32xf32>
    %145 = arith.negf %144 : vector<8x32xf32>
    %146 = math.exp %145 : vector<8x32xf32>
    %cst_28 = arith.constant 1.000000e+00 : f32
    %147 = vector.broadcast %cst_28 : f32 to vector<8x32xf32>
    %148 = arith.addf %147, %146 : vector<8x32xf32>
    %149 = arith.divf %147, %148 : vector<8x32xf32>
    %150 = vector.extract_strided_slice %137 {offsets = [0, 32], sizes = [8, 32], strides = [1, 1]} : vector<8x96xf32> to vector<8x32xf32>
    %151 = vector.extract_strided_slice %141 {offsets = [0, 32], sizes = [8, 32], strides = [1, 1]} : vector<8x96xf32> to vector<8x32xf32>
    %152 = arith.addf %150, %151 : vector<8x32xf32>
    %153 = arith.negf %152 : vector<8x32xf32>
    %154 = math.exp %153 : vector<8x32xf32>
    %cst_29 = arith.constant 1.000000e+00 : f32
    %155 = vector.broadcast %cst_29 : f32 to vector<8x32xf32>
    %156 = arith.addf %155, %154 : vector<8x32xf32>
    %157 = arith.divf %155, %156 : vector<8x32xf32>
    %158 = vector.extract_strided_slice %137 {offsets = [0, 64], sizes = [8, 32], strides = [1, 1]} : vector<8x96xf32> to vector<8x32xf32>
    %159 = vector.extract_strided_slice %141 {offsets = [0, 64], sizes = [8, 32], strides = [1, 1]} : vector<8x96xf32> to vector<8x32xf32>
    %160 = arith.mulf %149, %159 : vector<8x32xf32>
    %161 = arith.addf %158, %160 : vector<8x32xf32>
    %162 = math.tanh %161 : vector<8x32xf32>
    %cst_30 = arith.constant 1.000000e+00 : f32
    %163 = vector.broadcast %cst_30 : f32 to vector<8x32xf32>
    %164 = arith.subf %163, %157 : vector<8x32xf32>
    %165 = arith.mulf %164, %162 : vector<8x32xf32>
    %166 = arith.mulf %157, %136 : vector<8x32xf32>
    %167 = arith.addf %165, %166 : vector<8x32xf32>
    %168 = vector.extract_strided_slice %11 {offsets = [40, 0], sizes = [8, 96], strides = [1, 1]} : vector<64x96xf32> to vector<8x96xf32>
    %169 = arith.truncf %167 : vector<8x32xf32> to vector<8x32xbf16>
    %cst_31 = arith.constant dense<0.000000e+00> : vector<8x96xf32>
    %170 = tpu.matmul %169, %3, %cst_31 {dimension_numbers = #tpu.dot_dimension_numbers<[1], [0], [0], [1], [0, 0, 1, 1], [], []>} : vector<8x32xbf16>, vector<32x96xbf16>, vector<8x96xf32> -> vector<8x96xf32>
    %171 = vector.broadcast %7 : vector<1x96xf32> to vector<8x96xf32>
    %172 = arith.addf %170, %171 : vector<8x96xf32>
    %173 = vector.extract_strided_slice %168 {offsets = [0, 0], sizes = [8, 32], strides = [1, 1]} : vector<8x96xf32> to vector<8x32xf32>
    %174 = vector.extract_strided_slice %172 {offsets = [0, 0], sizes = [8, 32], strides = [1, 1]} : vector<8x96xf32> to vector<8x32xf32>
    %175 = arith.addf %173, %174 : vector<8x32xf32>
    %176 = arith.negf %175 : vector<8x32xf32>
    %177 = math.exp %176 : vector<8x32xf32>
    %cst_32 = arith.constant 1.000000e+00 : f32
    %178 = vector.broadcast %cst_32 : f32 to vector<8x32xf32>
    %179 = arith.addf %178, %177 : vector<8x32xf32>
    %180 = arith.divf %178, %179 : vector<8x32xf32>
    %181 = vector.extract_strided_slice %168 {offsets = [0, 32], sizes = [8, 32], strides = [1, 1]} : vector<8x96xf32> to vector<8x32xf32>
    %182 = vector.extract_strided_slice %172 {offsets = [0, 32], sizes = [8, 32], strides = [1, 1]} : vector<8x96xf32> to vector<8x32xf32>
    %183 = arith.addf %181, %182 : vector<8x32xf32>
    %184 = arith.negf %183 : vector<8x32xf32>
    %185 = math.exp %184 : vector<8x32xf32>
    %cst_33 = arith.constant 1.000000e+00 : f32
    %186 = vector.broadcast %cst_33 : f32 to vector<8x32xf32>
    %187 = arith.addf %186, %185 : vector<8x32xf32>
    %188 = arith.divf %186, %187 : vector<8x32xf32>
    %189 = vector.extract_strided_slice %168 {offsets = [0, 64], sizes = [8, 32], strides = [1, 1]} : vector<8x96xf32> to vector<8x32xf32>
    %190 = vector.extract_strided_slice %172 {offsets = [0, 64], sizes = [8, 32], strides = [1, 1]} : vector<8x96xf32> to vector<8x32xf32>
    %191 = arith.mulf %180, %190 : vector<8x32xf32>
    %192 = arith.addf %189, %191 : vector<8x32xf32>
    %193 = math.tanh %192 : vector<8x32xf32>
    %cst_34 = arith.constant 1.000000e+00 : f32
    %194 = vector.broadcast %cst_34 : f32 to vector<8x32xf32>
    %195 = arith.subf %194, %188 : vector<8x32xf32>
    %196 = arith.mulf %195, %193 : vector<8x32xf32>
    %197 = arith.mulf %188, %167 : vector<8x32xf32>
    %198 = arith.addf %196, %197 : vector<8x32xf32>
    %199 = vector.extract_strided_slice %11 {offsets = [48, 0], sizes = [8, 96], strides = [1, 1]} : vector<64x96xf32> to vector<8x96xf32>
    %200 = arith.truncf %198 : vector<8x32xf32> to vector<8x32xbf16>
    %cst_35 = arith.constant dense<0.000000e+00> : vector<8x96xf32>
    %201 = tpu.matmul %200, %3, %cst_35 {dimension_numbers = #tpu.dot_dimension_numbers<[1], [0], [0], [1], [0, 0, 1, 1], [], []>} : vector<8x32xbf16>, vector<32x96xbf16>, vector<8x96xf32> -> vector<8x96xf32>
    %202 = vector.broadcast %7 : vector<1x96xf32> to vector<8x96xf32>
    %203 = arith.addf %201, %202 : vector<8x96xf32>
    %204 = vector.extract_strided_slice %199 {offsets = [0, 0], sizes = [8, 32], strides = [1, 1]} : vector<8x96xf32> to vector<8x32xf32>
    %205 = vector.extract_strided_slice %203 {offsets = [0, 0], sizes = [8, 32], strides = [1, 1]} : vector<8x96xf32> to vector<8x32xf32>
    %206 = arith.addf %204, %205 : vector<8x32xf32>
    %207 = arith.negf %206 : vector<8x32xf32>
    %208 = math.exp %207 : vector<8x32xf32>
    %cst_36 = arith.constant 1.000000e+00 : f32
    %209 = vector.broadcast %cst_36 : f32 to vector<8x32xf32>
    %210 = arith.addf %209, %208 : vector<8x32xf32>
    %211 = arith.divf %209, %210 : vector<8x32xf32>
    %212 = vector.extract_strided_slice %199 {offsets = [0, 32], sizes = [8, 32], strides = [1, 1]} : vector<8x96xf32> to vector<8x32xf32>
    %213 = vector.extract_strided_slice %203 {offsets = [0, 32], sizes = [8, 32], strides = [1, 1]} : vector<8x96xf32> to vector<8x32xf32>
    %214 = arith.addf %212, %213 : vector<8x32xf32>
    %215 = arith.negf %214 : vector<8x32xf32>
    %216 = math.exp %215 : vector<8x32xf32>
    %cst_37 = arith.constant 1.000000e+00 : f32
    %217 = vector.broadcast %cst_37 : f32 to vector<8x32xf32>
    %218 = arith.addf %217, %216 : vector<8x32xf32>
    %219 = arith.divf %217, %218 : vector<8x32xf32>
    %220 = vector.extract_strided_slice %199 {offsets = [0, 64], sizes = [8, 32], strides = [1, 1]} : vector<8x96xf32> to vector<8x32xf32>
    %221 = vector.extract_strided_slice %203 {offsets = [0, 64], sizes = [8, 32], strides = [1, 1]} : vector<8x96xf32> to vector<8x32xf32>
    %222 = arith.mulf %211, %221 : vector<8x32xf32>
    %223 = arith.addf %220, %222 : vector<8x32xf32>
    %224 = math.tanh %223 : vector<8x32xf32>
    %cst_38 = arith.constant 1.000000e+00 : f32
    %225 = vector.broadcast %cst_38 : f32 to vector<8x32xf32>
    %226 = arith.subf %225, %219 : vector<8x32xf32>
    %227 = arith.mulf %226, %224 : vector<8x32xf32>
    %228 = arith.mulf %219, %198 : vector<8x32xf32>
    %229 = arith.addf %227, %228 : vector<8x32xf32>
    %230 = vector.extract_strided_slice %11 {offsets = [56, 0], sizes = [8, 96], strides = [1, 1]} : vector<64x96xf32> to vector<8x96xf32>
    %231 = arith.truncf %229 : vector<8x32xf32> to vector<8x32xbf16>
    %cst_39 = arith.constant dense<0.000000e+00> : vector<8x96xf32>
    %232 = tpu.matmul %231, %3, %cst_39 {dimension_numbers = #tpu.dot_dimension_numbers<[1], [0], [0], [1], [0, 0, 1, 1], [], []>} : vector<8x32xbf16>, vector<32x96xbf16>, vector<8x96xf32> -> vector<8x96xf32>
    %233 = vector.broadcast %7 : vector<1x96xf32> to vector<8x96xf32>
    %234 = arith.addf %232, %233 : vector<8x96xf32>
    %235 = vector.extract_strided_slice %230 {offsets = [0, 0], sizes = [8, 32], strides = [1, 1]} : vector<8x96xf32> to vector<8x32xf32>
    %236 = vector.extract_strided_slice %234 {offsets = [0, 0], sizes = [8, 32], strides = [1, 1]} : vector<8x96xf32> to vector<8x32xf32>
    %237 = arith.addf %235, %236 : vector<8x32xf32>
    %238 = arith.negf %237 : vector<8x32xf32>
    %239 = math.exp %238 : vector<8x32xf32>
    %cst_40 = arith.constant 1.000000e+00 : f32
    %240 = vector.broadcast %cst_40 : f32 to vector<8x32xf32>
    %241 = arith.addf %240, %239 : vector<8x32xf32>
    %242 = arith.divf %240, %241 : vector<8x32xf32>
    %243 = vector.extract_strided_slice %230 {offsets = [0, 32], sizes = [8, 32], strides = [1, 1]} : vector<8x96xf32> to vector<8x32xf32>
    %244 = vector.extract_strided_slice %234 {offsets = [0, 32], sizes = [8, 32], strides = [1, 1]} : vector<8x96xf32> to vector<8x32xf32>
    %245 = arith.addf %243, %244 : vector<8x32xf32>
    %246 = arith.negf %245 : vector<8x32xf32>
    %247 = math.exp %246 : vector<8x32xf32>
    %cst_41 = arith.constant 1.000000e+00 : f32
    %248 = vector.broadcast %cst_41 : f32 to vector<8x32xf32>
    %249 = arith.addf %248, %247 : vector<8x32xf32>
    %250 = arith.divf %248, %249 : vector<8x32xf32>
    %251 = vector.extract_strided_slice %230 {offsets = [0, 64], sizes = [8, 32], strides = [1, 1]} : vector<8x96xf32> to vector<8x32xf32>
    %252 = vector.extract_strided_slice %234 {offsets = [0, 64], sizes = [8, 32], strides = [1, 1]} : vector<8x96xf32> to vector<8x32xf32>
    %253 = arith.mulf %242, %252 : vector<8x32xf32>
    %254 = arith.addf %251, %253 : vector<8x32xf32>
    %255 = math.tanh %254 : vector<8x32xf32>
    %cst_42 = arith.constant 1.000000e+00 : f32
    %256 = vector.broadcast %cst_42 : f32 to vector<8x32xf32>
    %257 = arith.subf %256, %250 : vector<8x32xf32>
    %258 = arith.mulf %257, %255 : vector<8x32xf32>
    %259 = arith.mulf %250, %229 : vector<8x32xf32>
    %260 = arith.addf %258, %259 : vector<8x32xf32>
    %c0_43 = arith.constant 0 : index
    %c0_44 = arith.constant 0 : index
    %261 = vector.load %arg4[%c0_43, %c0_44] : memref<48x64xbf16, #tpu.memory_space<vmem>>, vector<32x64xbf16>
    %c32_45 = arith.constant 32 : index
    %c0_46 = arith.constant 0 : index
    %262 = vector.load %arg4[%c32_45, %c0_46] : memref<48x64xbf16, #tpu.memory_space<vmem>>, vector<1x64xbf16>
    %263 = arith.extf %262 : vector<1x64xbf16> to vector<1x64xf32>
    %264 = arith.truncf %260 : vector<8x32xf32> to vector<8x32xbf16>
    %cst_47 = arith.constant dense<0.000000e+00> : vector<8x64xf32>
    %265 = tpu.matmul %264, %261, %cst_47 {dimension_numbers = #tpu.dot_dimension_numbers<[1], [0], [0], [1], [0, 0, 1, 1], [], []>} : vector<8x32xbf16>, vector<32x64xbf16>, vector<8x64xf32> -> vector<8x64xf32>
    %266 = vector.broadcast %263 : vector<1x64xf32> to vector<8x64xf32>
    %267 = arith.addf %265, %266 : vector<8x64xf32>
    %268 = vector.extract_strided_slice %267 {offsets = [0, 0], sizes = [8, 32], strides = [1, 1]} : vector<8x64xf32> to vector<8x32xf32>
    %269 = vector.extract_strided_slice %267 {offsets = [0, 32], sizes = [8, 32], strides = [1, 1]} : vector<8x64xf32> to vector<8x32xf32>
    %cst_48 = arith.constant 0.000000e+00 : f32
    %270 = vector.broadcast %cst_48 : f32 to vector<8x32xf32>
    %271 = arith.maximumf %269, %270 : vector<8x32xf32>
    %c0_49 = arith.constant 0 : index
    %c0_50 = arith.constant 0 : index
    %272 = vector.load %arg5[%c0_49, %c0_50] : memref<256x32xbf16, #tpu.memory_space<vmem>>, vector<32x32xbf16>
    %c32_51 = arith.constant 32 : index
    %c0_52 = arith.constant 0 : index
    %273 = vector.load %arg5[%c32_51, %c0_52] : memref<256x32xbf16, #tpu.memory_space<vmem>>, vector<1x32xbf16>
    %274 = arith.extf %273 : vector<1x32xbf16> to vector<1x32xf32>
    %c48 = arith.constant 48 : index
    %c0_53 = arith.constant 0 : index
    %275 = vector.load %arg5[%c48, %c0_53] : memref<256x32xbf16, #tpu.memory_space<vmem>>, vector<1x32xbf16>
    %276 = arith.extf %275 : vector<1x32xbf16> to vector<1x32xf32>
    %c64_54 = arith.constant 64 : index
    %c0_55 = arith.constant 0 : index
    %277 = vector.load %arg5[%c64_54, %c0_55] : memref<256x32xbf16, #tpu.memory_space<vmem>>, vector<1x1xbf16>
    %278 = arith.extf %277 : vector<1x1xbf16> to vector<1x1xf32>
    %279 = vector.shape_cast %0 : vector<8x8x32xbf16> to vector<64x32xbf16>
    %cst_56 = arith.constant dense<0.000000e+00> : vector<64x32xf32>
    %280 = tpu.matmul %279, %272, %cst_56 {dimension_numbers = #tpu.dot_dimension_numbers<[1], [0], [0], [1], [0, 0, 1, 1], [], []>} : vector<64x32xbf16>, vector<32x32xbf16>, vector<64x32xf32> -> vector<64x32xf32>
    %281 = vector.broadcast %274 : vector<1x32xf32> to vector<64x32xf32>
    %282 = arith.addf %280, %281 : vector<64x32xf32>
    %283 = vector.shape_cast %282 : vector<64x32xf32> to vector<8x8x32xf32>
    %284 = vector.shape_cast %268 : vector<8x32xf32> to vector<8x1x32xf32>
    %285 = vector.broadcast %284 : vector<8x1x32xf32> to vector<8x8x32xf32>
    %286 = arith.addf %283, %285 : vector<8x8x32xf32>
    %cst_57 = arith.constant 0.000000e+00 : f32
    %287 = vector.broadcast %cst_57 : f32 to vector<8x8x32xf32>
    %288 = arith.maximumf %286, %287 : vector<8x8x32xf32>
    %289 = vector.shape_cast %276 : vector<1x32xf32> to vector<1x1x32xf32>
    %290 = vector.broadcast %289 : vector<1x1x32xf32> to vector<8x8x32xf32>
    %291 = arith.mulf %288, %290 : vector<8x8x32xf32>
    %cst_58 = arith.constant dense<0.000000e+00> : vector<8x8xf32>
    %292 = vector.multi_reduction <add>, %291, %cst_58 [2] : vector<8x8x32xf32> to vector<8x8xf32>
    %293 = vector.broadcast %278 : vector<1x1xf32> to vector<8x8xf32>
    %294 = arith.addf %292, %293 : vector<8x8xf32>
    %cst_59 = arith.constant dense<0xFF800000> : vector<8xf32>
    %295 = vector.multi_reduction <maximumf>, %294, %cst_59 [1] : vector<8x8xf32> to vector<8xf32>
    %296 = vector.shape_cast %295 : vector<8xf32> to vector<8x1xf32>
    %297 = vector.broadcast %296 : vector<8x1xf32> to vector<8x8xf32>
    %298 = arith.subf %294, %297 : vector<8x8xf32>
    %299 = math.exp %298 : vector<8x8xf32>
    %cst_60 = arith.constant dense<0.000000e+00> : vector<8xf32>
    %300 = vector.multi_reduction <add>, %299, %cst_60 [1] : vector<8x8xf32> to vector<8xf32>
    %301 = vector.shape_cast %300 : vector<8xf32> to vector<8x1xf32>
    %302 = tpu.reciprocal %301 {approx = true} : vector<8x1xf32> -> vector<8x1xf32>
    %303 = vector.broadcast %302 : vector<8x1xf32> to vector<8x8xf32>
    %304 = arith.mulf %299, %303 : vector<8x8xf32>
    %305 = arith.extf %0 : vector<8x8x32xbf16> to vector<8x8x32xf32>
    %306 = vector.shape_cast %304 : vector<8x8xf32> to vector<8x8x1xf32>
    %307 = vector.broadcast %306 : vector<8x8x1xf32> to vector<8x8x32xf32>
    %308 = arith.mulf %307, %305 : vector<8x8x32xf32>
    %cst_61 = arith.constant dense<0.000000e+00> : vector<8x32xf32>
    %309 = vector.multi_reduction <add>, %308, %cst_61 [1] : vector<8x8x32xf32> to vector<8x32xf32>
    %cst_62 = arith.constant dense<0.000000e+00> : vector<8x32xf32>
    %310 = vector.multi_reduction <add>, %305, %cst_62 [1] : vector<8x8x32xf32> to vector<8x32xf32>
    %cst_63 = arith.constant 8.000000e+00 : f32
    %311 = vector.broadcast %cst_63 : f32 to vector<8x32xf32>
    %312 = arith.divf %310, %311 : vector<8x32xf32>
    %c80_64 = arith.constant 80 : index
    %c0_65 = arith.constant 0 : index
    %313 = vector.load %arg5[%c80_64, %c0_65] : memref<256x32xbf16, #tpu.memory_space<vmem>>, vector<32x32xbf16>
    %c112 = arith.constant 112 : index
    %c0_66 = arith.constant 0 : index
    %314 = vector.load %arg5[%c112, %c0_66] : memref<256x32xbf16, #tpu.memory_space<vmem>>, vector<1x32xbf16>
    %315 = arith.extf %314 : vector<1x32xbf16> to vector<1x32xf32>
    %c128 = arith.constant 128 : index
    %c0_67 = arith.constant 0 : index
    %316 = vector.load %arg5[%c128, %c0_67] : memref<256x32xbf16, #tpu.memory_space<vmem>>, vector<32x32xbf16>
    %c160 = arith.constant 160 : index
    %c0_68 = arith.constant 0 : index
    %317 = vector.load %arg5[%c160, %c0_68] : memref<256x32xbf16, #tpu.memory_space<vmem>>, vector<1x32xbf16>
    %318 = arith.extf %317 : vector<1x32xbf16> to vector<1x32xf32>
    %319 = arith.truncf %309 : vector<8x32xf32> to vector<8x32xbf16>
    %cst_69 = arith.constant dense<0.000000e+00> : vector<8x32xf32>
    %320 = tpu.matmul %319, %313, %cst_69 {dimension_numbers = #tpu.dot_dimension_numbers<[1], [0], [0], [1], [0, 0, 1, 1], [], []>} : vector<8x32xbf16>, vector<32x32xbf16>, vector<8x32xf32> -> vector<8x32xf32>
    %321 = vector.broadcast %315 : vector<1x32xf32> to vector<8x32xf32>
    %322 = arith.addf %320, %321 : vector<8x32xf32>
    %cst_70 = arith.constant 0.000000e+00 : f32
    %323 = vector.broadcast %cst_70 : f32 to vector<8x32xf32>
    %324 = arith.maximumf %322, %323 : vector<8x32xf32>
    %325 = arith.truncf %312 : vector<8x32xf32> to vector<8x32xbf16>
    %cst_71 = arith.constant dense<0.000000e+00> : vector<8x32xf32>
    %326 = tpu.matmul %325, %316, %cst_71 {dimension_numbers = #tpu.dot_dimension_numbers<[1], [0], [0], [1], [0, 0, 1, 1], [], []>} : vector<8x32xbf16>, vector<32x32xbf16>, vector<8x32xf32> -> vector<8x32xf32>
    %327 = vector.broadcast %318 : vector<1x32xf32> to vector<8x32xf32>
    %328 = arith.addf %326, %327 : vector<8x32xf32>
    %cst_72 = arith.constant 0.000000e+00 : f32
    %329 = vector.broadcast %cst_72 : f32 to vector<8x32xf32>
    %330 = arith.maximumf %328, %329 : vector<8x32xf32>
    %331 = arith.mulf %271, %324 : vector<8x32xf32>
    %332 = arith.mulf %271, %330 : vector<8x32xf32>
    %c176 = arith.constant 176 : index
    %c0_73 = arith.constant 0 : index
    %333 = vector.load %arg5[%c176, %c0_73] : memref<256x32xbf16, #tpu.memory_space<vmem>>, vector<64x32xbf16>
    %c240 = arith.constant 240 : index
    %c0_74 = arith.constant 0 : index
    %334 = vector.load %arg5[%c240, %c0_74] : memref<256x32xbf16, #tpu.memory_space<vmem>>, vector<1x32xbf16>
    %335 = arith.extf %334 : vector<1x32xbf16> to vector<1x32xf32>
    %336 = tpu.concatenate %331, %332 in 1 : vector<8x32xf32>, vector<8x32xf32> -> vector<8x64xf32>
    %337 = arith.truncf %336 : vector<8x64xf32> to vector<8x64xbf16>
    %cst_75 = arith.constant dense<0.000000e+00> : vector<8x32xf32>
    %338 = tpu.matmul %337, %333, %cst_75 {dimension_numbers = #tpu.dot_dimension_numbers<[1], [0], [0], [1], [0, 0, 1, 1], [], []>} : vector<8x64xbf16>, vector<64x32xbf16>, vector<8x32xf32> -> vector<8x32xf32>
    %339 = vector.broadcast %335 : vector<1x32xf32> to vector<8x32xf32>
    %340 = arith.addf %338, %339 : vector<8x32xf32>
    %cst_76 = arith.constant 0.000000e+00 : f32
    %341 = vector.broadcast %cst_76 : f32 to vector<8x32xf32>
    %342 = arith.maximumf %340, %341 : vector<8x32xf32>
    %c0_77 = arith.constant 0 : index
    %c0_78 = arith.constant 0 : index
    %343 = vector.load %arg6[%c0_77, %c0_78] : memref<48x128xbf16, #tpu.memory_space<vmem>>, vector<32x128xbf16>
    %c32_79 = arith.constant 32 : index
    %c0_80 = arith.constant 0 : index
    %344 = vector.load %arg6[%c32_79, %c0_80] : memref<48x128xbf16, #tpu.memory_space<vmem>>, vector<1x128xbf16>
    %345 = arith.extf %344 : vector<1x128xbf16> to vector<1x128xf32>
    %346 = arith.truncf %342 : vector<8x32xf32> to vector<8x32xbf16>
    %cst_81 = arith.constant dense<0.000000e+00> : vector<8x128xf32>
    %347 = tpu.matmul %346, %343, %cst_81 {dimension_numbers = #tpu.dot_dimension_numbers<[1], [0], [0], [1], [0, 0, 1, 1], [], []>} : vector<8x32xbf16>, vector<32x128xbf16>, vector<8x128xf32> -> vector<8x128xf32>
    %348 = vector.broadcast %345 : vector<1x128xf32> to vector<8x128xf32>
    %349 = arith.addf %347, %348 : vector<8x128xf32>
    %c0_82 = arith.constant 0 : index
    %c0_83 = arith.constant 0 : index
    %350 = vector.load %arg7[%c0_82, %c0_83] : memref<8x128xf32, #tpu.memory_space<vmem>>, vector<8x128xf32>
    tpu.vector_store %arg7[%c0_82, %c0_83], %349 {strides = array<i32>} : memref<8x128xf32, #tpu.memory_space<vmem>>, vector<8x128xf32>,
    return
  }
  func.func @transform_0(%arg0: i32) -> (i32, i32, i32) {
    %c0_i32 = arith.constant 0 : i32
    %c0_i32_0 = arith.constant 0 : i32
    %c0_i32_1 = arith.constant 0 : i32
    return %arg0, %c0_i32, %c0_i32_0 : i32, i32, i32
  }
  func.func @transform_1(%arg0: i32) -> (i32, i32, i32) {
    %c0_i32 = arith.constant 0 : i32
    %c0_i32_0 = arith.constant 0 : i32
    %c0_i32_1 = arith.constant 0 : i32
    return %c0_i32, %arg0, %c0_i32_0 : i32, i32, i32
  }
  func.func @transform_2(%arg0: i32) -> (i32, i32) {
    %c0_i32 = arith.constant 0 : i32
    %c0_i32_0 = arith.constant 0 : i32
    %c0_i32_1 = arith.constant 0 : i32
    return %c0_i32, %c0_i32_0 : i32, i32
  }
  func.func @transform_3(%arg0: i32) -> (i32, i32) {
    %c0_i32 = arith.constant 0 : i32
    %c0_i32_0 = arith.constant 0 : i32
    %c0_i32_1 = arith.constant 0 : i32
    return %c0_i32, %c0_i32_0 : i32, i32
  }
  func.func @transform_4(%arg0: i32) -> (i32, i32) {
    %c0_i32 = arith.constant 0 : i32
    %c0_i32_0 = arith.constant 0 : i32
    %c0_i32_1 = arith.constant 0 : i32
    return %c0_i32, %c0_i32_0 : i32, i32
  }
  func.func @transform_5(%arg0: i32) -> (i32, i32) {
    %c0_i32 = arith.constant 0 : i32
    %c0_i32_0 = arith.constant 0 : i32
    %c0_i32_1 = arith.constant 0 : i32
    return %c0_i32, %c0_i32_0 : i32, i32
  }
  func.func @transform_6(%arg0: i32) -> (i32, i32) {
    %c0_i32 = arith.constant 0 : i32
    %c0_i32_0 = arith.constant 0 : i32
    return %arg0, %c0_i32 : i32, i32
  }
}

module attributes {stable_mosaic.version = 11 : i64} {
  func.func @butd_kernel(%arg0: i32, %arg1: memref<8x8x32xbf16, #tpu.memory_space<vmem>>, %arg2: memref<8x8x32xbf16, #tpu.memory_space<vmem>>, %arg3: memref<96x96xbf16, #tpu.memory_space<vmem>>, %arg4: memref<48x64xbf16, #tpu.memory_space<vmem>>, %arg5: memref<256x32xbf16, #tpu.memory_space<vmem>>, %arg6: memref<48x128xbf16, #tpu.memory_space<vmem>>, %arg7: memref<8x128xf32, #tpu.memory_space<vmem>>) attributes {dimension_semantics = [#tpu.dimension_semantics<parallel>], iteration_bounds = array<i64: 1>, scalar_prefetch = 0 : i64, scratch_operands = 0 : i64, tpu.core_type = #tpu.core_type<tc>, window_params = [{transform_indices = @transform_0, window_bounds = array<i64: 8, 8, 32>}, {transform_indices = @transform_1, window_bounds = array<i64: 8, 8, 32>}, {pipeline_mode = #tpu.pipeline_mode<synchronous>, transform_indices = @transform_2, window_bounds = array<i64: 96, 96>}, {pipeline_mode = #tpu.pipeline_mode<synchronous>, transform_indices = @transform_3, window_bounds = array<i64: 48, 64>}, {pipeline_mode = #tpu.pipeline_mode<synchronous>, transform_indices = @transform_4, window_bounds = array<i64: 256, 32>}, {pipeline_mode = #tpu.pipeline_mode<synchronous>, transform_indices = @transform_5, window_bounds = array<i64: 48, 128>}, {transform_indices = @transform_6, window_bounds = array<i64: 8, 128>}]} {
    %c0 = arith.constant 0 : index
    %c0_0 = arith.constant 0 : index
    %c0_1 = arith.constant 0 : index
    %0 = vector.load %arg1[%c0, %c0_0, %c0_1] : memref<8x8x32xbf16, #tpu.memory_space<vmem>>, vector<8x8x32xbf16>
    %c0_2 = arith.constant 0 : index
    %c0_3 = arith.constant 0 : index
    %c0_4 = arith.constant 0 : index
    %1 = vector.load %arg2[%c0_2, %c0_3, %c0_4] : memref<8x8x32xbf16, #tpu.memory_space<vmem>>, vector<8x8x32xbf16>
    %c0_5 = arith.constant 0 : index
    %c0_6 = arith.constant 0 : index
    %2 = vector.load %arg3[%c0_5, %c0_6] : memref<96x96xbf16, #tpu.memory_space<vmem>>, vector<32x96xbf16>
    %c32 = arith.constant 32 : index
    %c0_7 = arith.constant 0 : index
    %3 = vector.load %arg3[%c32, %c0_7] : memref<96x96xbf16, #tpu.memory_space<vmem>>, vector<32x96xbf16>
    %c64 = arith.constant 64 : index
    %c0_8 = arith.constant 0 : index
    %4 = vector.load %arg3[%c64, %c0_8] : memref<96x96xbf16, #tpu.memory_space<vmem>>, vector<1x96xbf16>
    %5 = arith.extf %4 : vector<1x96xbf16> to vector<1x96xf32>
    %c80 = arith.constant 80 : index
    %c0_9 = arith.constant 0 : index
    %6 = vector.load %arg3[%c80, %c0_9] : memref<96x96xbf16, #tpu.memory_space<vmem>>, vector<1x96xbf16>
    %7 = arith.extf %6 : vector<1x96xbf16> to vector<1x96xf32>
    %8 = vector.shape_cast %1 : vector<8x8x32xbf16> to vector<64x32xbf16>
    %cst = arith.constant dense<0.000000e+00> : vector<64x96xf32>
    %9 = tpu.matmul %8, %2, %cst {dimension_numbers = #tpu.dot_dimension_numbers<[1], [0], [0], [1], [0, 0, 1, 1], [], []>} : vector<64x32xbf16>, vector<32x96xbf16>, vector<64x96xf32> -> vector<64x96xf32>
    %10 = vector.broadcast %5 : vector<1x96xf32> to vector<64x96xf32>
    %11 = arith.addf %9, %10 : vector<64x96xf32>
    %cst_10 = arith.constant 0.000000e+00 : f32
    %12 = vector.broadcast %cst_10 : f32 to vector<8x32xf32>
    %13 = vector.extract_strided_slice %11 {offsets = [0, 0], sizes = [8, 96], strides = [1, 1]} : vector<64x96xf32> to vector<8x96xf32>
    %14 = arith.truncf %12 : vector<8x32xf32> to vector<8x32xbf16>
    %cst_11 = arith.constant dense<0.000000e+00> : vector<8x96xf32>
    %15 = tpu.matmul %14, %3, %cst_11 {dimension_numbers = #tpu.dot_dimension_numbers<[1], [0], [0], [1], [0, 0, 1, 1], [], []>} : vector<8x32xbf16>, vector<32x96xbf16>, vector<8x96xf32> -> vector<8x96xf32>
    %16 = vector.broadcast %7 : vector<1x96xf32> to vector<8x96xf32>
    %17 = arith.addf %15, %16 : vector<8x96xf32>
    %18 = vector.extract_strided_slice %13 {offsets = [0, 0], sizes = [8, 32], strides = [1, 1]} : vector<8x96xf32> to vector<8x32xf32>
    %19 = vector.extract_strided_slice %17 {offsets = [0, 0], sizes = [8, 32], strides = [1, 1]} : vector<8x96xf32> to vector<8x32xf32>
    %20 = arith.addf %18, %19 : vector<8x32xf32>
    %21 = arith.negf %20 : vector<8x32xf32>
    %22 = math.exp %21 : vector<8x32xf32>
    %cst_12 = arith.constant 1.000000e+00 : f32
    %23 = vector.broadcast %cst_12 : f32 to vector<8x32xf32>
    %24 = arith.addf %23, %22 : vector<8x32xf32>
    %25 = arith.divf %23, %24 : vector<8x32xf32>
    %26 = vector.extract_strided_slice %13 {offsets = [0, 32], sizes = [8, 32], strides = [1, 1]} : vector<8x96xf32> to vector<8x32xf32>
    %27 = vector.extract_strided_slice %17 {offsets = [0, 32], sizes = [8, 32], strides = [1, 1]} : vector<8x96xf32> to vector<8x32xf32>
    %28 = arith.addf %26, %27 : vector<8x32xf32>
    %29 = arith.negf %28 : vector<8x32xf32>
    %30 = math.exp %29 : vector<8x32xf32>
    %cst_13 = arith.constant 1.000000e+00 : f32
    %31 = vector.broadcast %cst_13 : f32 to vector<8x32xf32>
    %32 = arith.addf %31, %30 : vector<8x32xf32>
    %33 = arith.divf %31, %32 : vector<8x32xf32>
    %34 = vector.extract_strided_slice %13 {offsets = [0, 64], sizes = [8, 32], strides = [1, 1]} : vector<8x96xf32> to vector<8x32xf32>
    %35 = vector.extract_strided_slice %17 {offsets = [0, 64], sizes = [8, 32], strides = [1, 1]} : vector<8x96xf32> to vector<8x32xf32>
    %36 = arith.mulf %25, %35 : vector<8x32xf32>
    %37 = arith.addf %34, %36 : vector<8x32xf32>
    %38 = math.tanh %37 : vector<8x32xf32>
    %cst_14 = arith.constant 1.000000e+00 : f32
    %39 = vector.broadcast %cst_14 : f32 to vector<8x32xf32>
    %40 = arith.subf %39, %33 : vector<8x32xf32>
    %41 = arith.mulf %40, %38 : vector<8x32xf32>
    %42 = arith.mulf %33, %12 : vector<8x32xf32>
    %43 = arith.addf %41, %42 : vector<8x32xf32>
    %44 = vector.extract_strided_slice %11 {offsets = [8, 0], sizes = [8, 96], strides = [1, 1]} : vector<64x96xf32> to vector<8x96xf32>
    %45 = arith.truncf %43 : vector<8x32xf32> to vector<8x32xbf16>
    %cst_15 = arith.constant dense<0.000000e+00> : vector<8x96xf32>
    %46 = tpu.matmul %45, %3, %cst_15 {dimension_numbers = #tpu.dot_dimension_numbers<[1], [0], [0], [1], [0, 0, 1, 1], [], []>} : vector<8x32xbf16>, vector<32x96xbf16>, vector<8x96xf32> -> vector<8x96xf32>
    %47 = vector.broadcast %7 : vector<1x96xf32> to vector<8x96xf32>
    %48 = arith.addf %46, %47 : vector<8x96xf32>
    %49 = vector.extract_strided_slice %44 {offsets = [0, 0], sizes = [8, 32], strides = [1, 1]} : vector<8x96xf32> to vector<8x32xf32>
    %50 = vector.extract_strided_slice %48 {offsets = [0, 0], sizes = [8, 32], strides = [1, 1]} : vector<8x96xf32> to vector<8x32xf32>
    %51 = arith.addf %49, %50 : vector<8x32xf32>
    %52 = arith.negf %51 : vector<8x32xf32>
    %53 = math.exp %52 : vector<8x32xf32>
    %cst_16 = arith.constant 1.000000e+00 : f32
    %54 = vector.broadcast %cst_16 : f32 to vector<8x32xf32>
    %55 = arith.addf %54, %53 : vector<8x32xf32>
    %56 = arith.divf %54, %55 : vector<8x32xf32>
    %57 = vector.extract_strided_slice %44 {offsets = [0, 32], sizes = [8, 32], strides = [1, 1]} : vector<8x96xf32> to vector<8x32xf32>
    %58 = vector.extract_strided_slice %48 {offsets = [0, 32], sizes = [8, 32], strides = [1, 1]} : vector<8x96xf32> to vector<8x32xf32>
    %59 = arith.addf %57, %58 : vector<8x32xf32>
    %60 = arith.negf %59 : vector<8x32xf32>
    %61 = math.exp %60 : vector<8x32xf32>
    %cst_17 = arith.constant 1.000000e+00 : f32
    %62 = vector.broadcast %cst_17 : f32 to vector<8x32xf32>
    %63 = arith.addf %62, %61 : vector<8x32xf32>
    %64 = arith.divf %62, %63 : vector<8x32xf32>
    %65 = vector.extract_strided_slice %44 {offsets = [0, 64], sizes = [8, 32], strides = [1, 1]} : vector<8x96xf32> to vector<8x32xf32>
    %66 = vector.extract_strided_slice %48 {offsets = [0, 64], sizes = [8, 32], strides = [1, 1]} : vector<8x96xf32> to vector<8x32xf32>
    %67 = arith.mulf %56, %66 : vector<8x32xf32>
    %68 = arith.addf %65, %67 : vector<8x32xf32>
    %69 = math.tanh %68 : vector<8x32xf32>
    %cst_18 = arith.constant 1.000000e+00 : f32
    %70 = vector.broadcast %cst_18 : f32 to vector<8x32xf32>
    %71 = arith.subf %70, %64 : vector<8x32xf32>
    %72 = arith.mulf %71, %69 : vector<8x32xf32>
    %73 = arith.mulf %64, %43 : vector<8x32xf32>
    %74 = arith.addf %72, %73 : vector<8x32xf32>
    %75 = vector.extract_strided_slice %11 {offsets = [16, 0], sizes = [8, 96], strides = [1, 1]} : vector<64x96xf32> to vector<8x96xf32>
    %76 = arith.truncf %74 : vector<8x32xf32> to vector<8x32xbf16>
    %cst_19 = arith.constant dense<0.000000e+00> : vector<8x96xf32>
    %77 = tpu.matmul %76, %3, %cst_19 {dimension_numbers = #tpu.dot_dimension_numbers<[1], [0], [0], [1], [0, 0, 1, 1], [], []>} : vector<8x32xbf16>, vector<32x96xbf16>, vector<8x96xf32> -> vector<8x96xf32>
    %78 = vector.broadcast %7 : vector<1x96xf32> to vector<8x96xf32>
    %79 = arith.addf %77, %78 : vector<8x96xf32>
    %80 = vector.extract_strided_slice %75 {offsets = [0, 0], sizes = [8, 32], strides = [1, 1]} : vector<8x96xf32> to vector<8x32xf32>
    %81 = vector.extract_strided_slice %79 {offsets = [0, 0], sizes = [8, 32], strides = [1, 1]} : vector<8x96xf32> to vector<8x32xf32>
    %82 = arith.addf %80, %81 : vector<8x32xf32>
    %83 = arith.negf %82 : vector<8x32xf32>
    %84 = math.exp %83 : vector<8x32xf32>
    %cst_20 = arith.constant 1.000000e+00 : f32
    %85 = vector.broadcast %cst_20 : f32 to vector<8x32xf32>
    %86 = arith.addf %85, %84 : vector<8x32xf32>
    %87 = arith.divf %85, %86 : vector<8x32xf32>
    %88 = vector.extract_strided_slice %75 {offsets = [0, 32], sizes = [8, 32], strides = [1, 1]} : vector<8x96xf32> to vector<8x32xf32>
    %89 = vector.extract_strided_slice %79 {offsets = [0, 32], sizes = [8, 32], strides = [1, 1]} : vector<8x96xf32> to vector<8x32xf32>
    %90 = arith.addf %88, %89 : vector<8x32xf32>
    %91 = arith.negf %90 : vector<8x32xf32>
    %92 = math.exp %91 : vector<8x32xf32>
    %cst_21 = arith.constant 1.000000e+00 : f32
    %93 = vector.broadcast %cst_21 : f32 to vector<8x32xf32>
    %94 = arith.addf %93, %92 : vector<8x32xf32>
    %95 = arith.divf %93, %94 : vector<8x32xf32>
    %96 = vector.extract_strided_slice %75 {offsets = [0, 64], sizes = [8, 32], strides = [1, 1]} : vector<8x96xf32> to vector<8x32xf32>
    %97 = vector.extract_strided_slice %79 {offsets = [0, 64], sizes = [8, 32], strides = [1, 1]} : vector<8x96xf32> to vector<8x32xf32>
    %98 = arith.mulf %87, %97 : vector<8x32xf32>
    %99 = arith.addf %96, %98 : vector<8x32xf32>
    %100 = math.tanh %99 : vector<8x32xf32>
    %cst_22 = arith.constant 1.000000e+00 : f32
    %101 = vector.broadcast %cst_22 : f32 to vector<8x32xf32>
    %102 = arith.subf %101, %95 : vector<8x32xf32>
    %103 = arith.mulf %102, %100 : vector<8x32xf32>
    %104 = arith.mulf %95, %74 : vector<8x32xf32>
    %105 = arith.addf %103, %104 : vector<8x32xf32>
    %106 = vector.extract_strided_slice %11 {offsets = [24, 0], sizes = [8, 96], strides = [1, 1]} : vector<64x96xf32> to vector<8x96xf32>
    %107 = arith.truncf %105 : vector<8x32xf32> to vector<8x32xbf16>
    %cst_23 = arith.constant dense<0.000000e+00> : vector<8x96xf32>
    %108 = tpu.matmul %107, %3, %cst_23 {dimension_numbers = #tpu.dot_dimension_numbers<[1], [0], [0], [1], [0, 0, 1, 1], [], []>} : vector<8x32xbf16>, vector<32x96xbf16>, vector<8x96xf32> -> vector<8x96xf32>
    %109 = vector.broadcast %7 : vector<1x96xf32> to vector<8x96xf32>
    %110 = arith.addf %108, %109 : vector<8x96xf32>
    %111 = vector.extract_strided_slice %106 {offsets = [0, 0], sizes = [8, 32], strides = [1, 1]} : vector<8x96xf32> to vector<8x32xf32>
    %112 = vector.extract_strided_slice %110 {offsets = [0, 0], sizes = [8, 32], strides = [1, 1]} : vector<8x96xf32> to vector<8x32xf32>
    %113 = arith.addf %111, %112 : vector<8x32xf32>
    %114 = arith.negf %113 : vector<8x32xf32>
    %115 = math.exp %114 : vector<8x32xf32>
    %cst_24 = arith.constant 1.000000e+00 : f32
    %116 = vector.broadcast %cst_24 : f32 to vector<8x32xf32>
    %117 = arith.addf %116, %115 : vector<8x32xf32>
    %118 = arith.divf %116, %117 : vector<8x32xf32>
    %119 = vector.extract_strided_slice %106 {offsets = [0, 32], sizes = [8, 32], strides = [1, 1]} : vector<8x96xf32> to vector<8x32xf32>
    %120 = vector.extract_strided_slice %110 {offsets = [0, 32], sizes = [8, 32], strides = [1, 1]} : vector<8x96xf32> to vector<8x32xf32>
    %121 = arith.addf %119, %120 : vector<8x32xf32>
    %122 = arith.negf %121 : vector<8x32xf32>
    %123 = math.exp %122 : vector<8x32xf32>
    %cst_25 = arith.constant 1.000000e+00 : f32
    %124 = vector.broadcast %cst_25 : f32 to vector<8x32xf32>
    %125 = arith.addf %124, %123 : vector<8x32xf32>
    %126 = arith.divf %124, %125 : vector<8x32xf32>
    %127 = vector.extract_strided_slice %106 {offsets = [0, 64], sizes = [8, 32], strides = [1, 1]} : vector<8x96xf32> to vector<8x32xf32>
    %128 = vector.extract_strided_slice %110 {offsets = [0, 64], sizes = [8, 32], strides = [1, 1]} : vector<8x96xf32> to vector<8x32xf32>
    %129 = arith.mulf %118, %128 : vector<8x32xf32>
    %130 = arith.addf %127, %129 : vector<8x32xf32>
    %131 = math.tanh %130 : vector<8x32xf32>
    %cst_26 = arith.constant 1.000000e+00 : f32
    %132 = vector.broadcast %cst_26 : f32 to vector<8x32xf32>
    %133 = arith.subf %132, %126 : vector<8x32xf32>
    %134 = arith.mulf %133, %131 : vector<8x32xf32>
    %135 = arith.mulf %126, %105 : vector<8x32xf32>
    %136 = arith.addf %134, %135 : vector<8x32xf32>
    %137 = vector.extract_strided_slice %11 {offsets = [32, 0], sizes = [8, 96], strides = [1, 1]} : vector<64x96xf32> to vector<8x96xf32>
    %138 = arith.truncf %136 : vector<8x32xf32> to vector<8x32xbf16>
    %cst_27 = arith.constant dense<0.000000e+00> : vector<8x96xf32>
    %139 = tpu.matmul %138, %3, %cst_27 {dimension_numbers = #tpu.dot_dimension_numbers<[1], [0], [0], [1], [0, 0, 1, 1], [], []>} : vector<8x32xbf16>, vector<32x96xbf16>, vector<8x96xf32> -> vector<8x96xf32>
    %140 = vector.broadcast %7 : vector<1x96xf32> to vector<8x96xf32>
    %141 = arith.addf %139, %140 : vector<8x96xf32>
    %142 = vector.extract_strided_slice %137 {offsets = [0, 0], sizes = [8, 32], strides = [1, 1]} : vector<8x96xf32> to vector<8x32xf32>
    %143 = vector.extract_strided_slice %141 {offsets = [0, 0], sizes = [8, 32], strides = [1, 1]} : vector<8x96xf32> to vector<8x32xf32>
    %144 = arith.addf %142, %143 : vector<8x32xf32>
    %145 = arith.negf %144 : vector<8x32xf32>
    %146 = math.exp %145 : vector<8x32xf32>
    %cst_28 = arith.constant 1.000000e+00 : f32
    %147 = vector.broadcast %cst_28 : f32 to vector<8x32xf32>
    %148 = arith.addf %147, %146 : vector<8x32xf32>
    %149 = arith.divf %147, %148 : vector<8x32xf32>
    %150 = vector.extract_strided_slice %137 {offsets = [0, 32], sizes = [8, 32], strides = [1, 1]} : vector<8x96xf32> to vector<8x32xf32>
    %151 = vector.extract_strided_slice %141 {offsets = [0, 32], sizes = [8, 32], strides = [1, 1]} : vector<8x96xf32> to vector<8x32xf32>
    %152 = arith.addf %150, %151 : vector<8x32xf32>
    %153 = arith.negf %152 : vector<8x32xf32>
    %154 = math.exp %153 : vector<8x32xf32>
    %cst_29 = arith.constant 1.000000e+00 : f32
    %155 = vector.broadcast %cst_29 : f32 to vector<8x32xf32>
    %156 = arith.addf %155, %154 : vector<8x32xf32>
    %157 = arith.divf %155, %156 : vector<8x32xf32>
    %158 = vector.extract_strided_slice %137 {offsets = [0, 64], sizes = [8, 32], strides = [1, 1]} : vector<8x96xf32> to vector<8x32xf32>
    %159 = vector.extract_strided_slice %141 {offsets = [0, 64], sizes = [8, 32], strides = [1, 1]} : vector<8x96xf32> to vector<8x32xf32>
    %160 = arith.mulf %149, %159 : vector<8x32xf32>
    %161 = arith.addf %158, %160 : vector<8x32xf32>
    %162 = math.tanh %161 : vector<8x32xf32>
    %cst_30 = arith.constant 1.000000e+00 : f32
    %163 = vector.broadcast %cst_30 : f32 to vector<8x32xf32>
    %164 = arith.subf %163, %157 : vector<8x32xf32>
    %165 = arith.mulf %164, %162 : vector<8x32xf32>
    %166 = arith.mulf %157, %136 : vector<8x32xf32>
    %167 = arith.addf %165, %166 : vector<8x32xf32>
    %168 = vector.extract_strided_slice %11 {offsets = [40, 0], sizes = [8, 96], strides = [1, 1]} : vector<64x96xf32> to vector<8x96xf32>
    %169 = arith.truncf %167 : vector<8x32xf32> to vector<8x32xbf16>
    %cst_31 = arith.constant dense<0.000000e+00> : vector<8x96xf32>
    %170 = tpu.matmul %169, %3, %cst_31 {dimension_numbers = #tpu.dot_dimension_numbers<[1], [0], [0], [1], [0, 0, 1, 1], [], []>} : vector<8x32xbf16>, vector<32x96xbf16>, vector<8x96xf32> -> vector<8x96xf32>
    %171 = vector.broadcast %7 : vector<1x96xf32> to vector<8x96xf32>
    %172 = arith.addf %170, %171 : vector<8x96xf32>
    %173 = vector.extract_strided_slice %168 {offsets = [0, 0], sizes = [8, 32], strides = [1, 1]} : vector<8x96xf32> to vector<8x32xf32>
    %174 = vector.extract_strided_slice %172 {offsets = [0, 0], sizes = [8, 32], strides = [1, 1]} : vector<8x96xf32> to vector<8x32xf32>
    %175 = arith.addf %173, %174 : vector<8x32xf32>
    %176 = arith.negf %175 : vector<8x32xf32>
    %177 = math.exp %176 : vector<8x32xf32>
    %cst_32 = arith.constant 1.000000e+00 : f32
    %178 = vector.broadcast %cst_32 : f32 to vector<8x32xf32>
    %179 = arith.addf %178, %177 : vector<8x32xf32>
    %180 = arith.divf %178, %179 : vector<8x32xf32>
    %181 = vector.extract_strided_slice %168 {offsets = [0, 32], sizes = [8, 32], strides = [1, 1]} : vector<8x96xf32> to vector<8x32xf32>
    %182 = vector.extract_strided_slice %172 {offsets = [0, 32], sizes = [8, 32], strides = [1, 1]} : vector<8x96xf32> to vector<8x32xf32>
    %183 = arith.addf %181, %182 : vector<8x32xf32>
    %184 = arith.negf %183 : vector<8x32xf32>
    %185 = math.exp %184 : vector<8x32xf32>
    %cst_33 = arith.constant 1.000000e+00 : f32
    %186 = vector.broadcast %cst_33 : f32 to vector<8x32xf32>
    %187 = arith.addf %186, %185 : vector<8x32xf32>
    %188 = arith.divf %186, %187 : vector<8x32xf32>
    %189 = vector.extract_strided_slice %168 {offsets = [0, 64], sizes = [8, 32], strides = [1, 1]} : vector<8x96xf32> to vector<8x32xf32>
    %190 = vector.extract_strided_slice %172 {offsets = [0, 64], sizes = [8, 32], strides = [1, 1]} : vector<8x96xf32> to vector<8x32xf32>
    %191 = arith.mulf %180, %190 : vector<8x32xf32>
    %192 = arith.addf %189, %191 : vector<8x32xf32>
    %193 = math.tanh %192 : vector<8x32xf32>
    %cst_34 = arith.constant 1.000000e+00 : f32
    %194 = vector.broadcast %cst_34 : f32 to vector<8x32xf32>
    %195 = arith.subf %194, %188 : vector<8x32xf32>
    %196 = arith.mulf %195, %193 : vector<8x32xf32>
    %197 = arith.mulf %188, %167 : vector<8x32xf32>
    %198 = arith.addf %196, %197 : vector<8x32xf32>
    %199 = vector.extract_strided_slice %11 {offsets = [48, 0], sizes = [8, 96], strides = [1, 1]} : vector<64x96xf32> to vector<8x96xf32>
    %200 = arith.truncf %198 : vector<8x32xf32> to vector<8x32xbf16>
    %cst_35 = arith.constant dense<0.000000e+00> : vector<8x96xf32>
    %201 = tpu.matmul %200, %3, %cst_35 {dimension_numbers = #tpu.dot_dimension_numbers<[1], [0], [0], [1], [0, 0, 1, 1], [], []>} : vector<8x32xbf16>, vector<32x96xbf16>, vector<8x96xf32> -> vector<8x96xf32>
    %202 = vector.broadcast %7 : vector<1x96xf32> to vector<8x96xf32>
    %203 = arith.addf %201, %202 : vector<8x96xf32>
    %204 = vector.extract_strided_slice %199 {offsets = [0, 0], sizes = [8, 32], strides = [1, 1]} : vector<8x96xf32> to vector<8x32xf32>
    %205 = vector.extract_strided_slice %203 {offsets = [0, 0], sizes = [8, 32], strides = [1, 1]} : vector<8x96xf32> to vector<8x32xf32>
    %206 = arith.addf %204, %205 : vector<8x32xf32>
    %207 = arith.negf %206 : vector<8x32xf32>
    %208 = math.exp %207 : vector<8x32xf32>
    %cst_36 = arith.constant 1.000000e+00 : f32
    %209 = vector.broadcast %cst_36 : f32 to vector<8x32xf32>
    %210 = arith.addf %209, %208 : vector<8x32xf32>
    %211 = arith.divf %209, %210 : vector<8x32xf32>
    %212 = vector.extract_strided_slice %199 {offsets = [0, 32], sizes = [8, 32], strides = [1, 1]} : vector<8x96xf32> to vector<8x32xf32>
    %213 = vector.extract_strided_slice %203 {offsets = [0, 32], sizes = [8, 32], strides = [1, 1]} : vector<8x96xf32> to vector<8x32xf32>
    %214 = arith.addf %212, %213 : vector<8x32xf32>
    %215 = arith.negf %214 : vector<8x32xf32>
    %216 = math.exp %215 : vector<8x32xf32>
    %cst_37 = arith.constant 1.000000e+00 : f32
    %217 = vector.broadcast %cst_37 : f32 to vector<8x32xf32>
    %218 = arith.addf %217, %216 : vector<8x32xf32>
    %219 = arith.divf %217, %218 : vector<8x32xf32>
    %220 = vector.extract_strided_slice %199 {offsets = [0, 64], sizes = [8, 32], strides = [1, 1]} : vector<8x96xf32> to vector<8x32xf32>
    %221 = vector.extract_strided_slice %203 {offsets = [0, 64], sizes = [8, 32], strides = [1, 1]} : vector<8x96xf32> to vector<8x32xf32>
    %222 = arith.mulf %211, %221 : vector<8x32xf32>
    %223 = arith.addf %220, %222 : vector<8x32xf32>
    %224 = math.tanh %223 : vector<8x32xf32>
    %cst_38 = arith.constant 1.000000e+00 : f32
    %225 = vector.broadcast %cst_38 : f32 to vector<8x32xf32>
    %226 = arith.subf %225, %219 : vector<8x32xf32>
    %227 = arith.mulf %226, %224 : vector<8x32xf32>
    %228 = arith.mulf %219, %198 : vector<8x32xf32>
    %229 = arith.addf %227, %228 : vector<8x32xf32>
    %230 = vector.extract_strided_slice %11 {offsets = [56, 0], sizes = [8, 96], strides = [1, 1]} : vector<64x96xf32> to vector<8x96xf32>
    %231 = arith.truncf %229 : vector<8x32xf32> to vector<8x32xbf16>
    %cst_39 = arith.constant dense<0.000000e+00> : vector<8x96xf32>
    %232 = tpu.matmul %231, %3, %cst_39 {dimension_numbers = #tpu.dot_dimension_numbers<[1], [0], [0], [1], [0, 0, 1, 1], [], []>} : vector<8x32xbf16>, vector<32x96xbf16>, vector<8x96xf32> -> vector<8x96xf32>
    %233 = vector.broadcast %7 : vector<1x96xf32> to vector<8x96xf32>
    %234 = arith.addf %232, %233 : vector<8x96xf32>
    %235 = vector.extract_strided_slice %230 {offsets = [0, 0], sizes = [8, 32], strides = [1, 1]} : vector<8x96xf32> to vector<8x32xf32>
    %236 = vector.extract_strided_slice %234 {offsets = [0, 0], sizes = [8, 32], strides = [1, 1]} : vector<8x96xf32> to vector<8x32xf32>
    %237 = arith.addf %235, %236 : vector<8x32xf32>
    %238 = arith.negf %237 : vector<8x32xf32>
    %239 = math.exp %238 : vector<8x32xf32>
    %cst_40 = arith.constant 1.000000e+00 : f32
    %240 = vector.broadcast %cst_40 : f32 to vector<8x32xf32>
    %241 = arith.addf %240, %239 : vector<8x32xf32>
    %242 = arith.divf %240, %241 : vector<8x32xf32>
    %243 = vector.extract_strided_slice %230 {offsets = [0, 32], sizes = [8, 32], strides = [1, 1]} : vector<8x96xf32> to vector<8x32xf32>
    %244 = vector.extract_strided_slice %234 {offsets = [0, 32], sizes = [8, 32], strides = [1, 1]} : vector<8x96xf32> to vector<8x32xf32>
    %245 = arith.addf %243, %244 : vector<8x32xf32>
    %246 = arith.negf %245 : vector<8x32xf32>
    %247 = math.exp %246 : vector<8x32xf32>
    %cst_41 = arith.constant 1.000000e+00 : f32
    %248 = vector.broadcast %cst_41 : f32 to vector<8x32xf32>
    %249 = arith.addf %248, %247 : vector<8x32xf32>
    %250 = arith.divf %248, %249 : vector<8x32xf32>
    %251 = vector.extract_strided_slice %230 {offsets = [0, 64], sizes = [8, 32], strides = [1, 1]} : vector<8x96xf32> to vector<8x32xf32>
    %252 = vector.extract_strided_slice %234 {offsets = [0, 64], sizes = [8, 32], strides = [1, 1]} : vector<8x96xf32> to vector<8x32xf32>
    %253 = arith.mulf %242, %252 : vector<8x32xf32>
    %254 = arith.addf %251, %253 : vector<8x32xf32>
    %255 = math.tanh %254 : vector<8x32xf32>
    %cst_42 = arith.constant 1.000000e+00 : f32
    %256 = vector.broadcast %cst_42 : f32 to vector<8x32xf32>
    %257 = arith.subf %256, %250 : vector<8x32xf32>
    %258 = arith.mulf %257, %255 : vector<8x32xf32>
    %259 = arith.mulf %250, %229 : vector<8x32xf32>
    %260 = arith.addf %258, %259 : vector<8x32xf32>
    %c0_43 = arith.constant 0 : index
    %c0_44 = arith.constant 0 : index
    %261 = vector.load %arg4[%c0_43, %c0_44] : memref<48x64xbf16, #tpu.memory_space<vmem>>, vector<32x64xbf16>
    %c32_45 = arith.constant 32 : index
    %c0_46 = arith.constant 0 : index
    %262 = vector.load %arg4[%c32_45, %c0_46] : memref<48x64xbf16, #tpu.memory_space<vmem>>, vector<1x64xbf16>
    %263 = arith.extf %262 : vector<1x64xbf16> to vector<1x64xf32>
    %264 = arith.truncf %260 : vector<8x32xf32> to vector<8x32xbf16>
    %cst_47 = arith.constant dense<0.000000e+00> : vector<8x64xf32>
    %265 = tpu.matmul %264, %261, %cst_47 {dimension_numbers = #tpu.dot_dimension_numbers<[1], [0], [0], [1], [0, 0, 1, 1], [], []>} : vector<8x32xbf16>, vector<32x64xbf16>, vector<8x64xf32> -> vector<8x64xf32>
    %266 = vector.broadcast %263 : vector<1x64xf32> to vector<8x64xf32>
    %267 = arith.addf %265, %266 : vector<8x64xf32>
    %268 = vector.extract_strided_slice %267 {offsets = [0, 0], sizes = [8, 32], strides = [1, 1]} : vector<8x64xf32> to vector<8x32xf32>
    %269 = vector.extract_strided_slice %267 {offsets = [0, 32], sizes = [8, 32], strides = [1, 1]} : vector<8x64xf32> to vector<8x32xf32>
    %cst_48 = arith.constant 0.000000e+00 : f32
    %270 = vector.broadcast %cst_48 : f32 to vector<8x32xf32>
    %271 = arith.maximumf %269, %270 : vector<8x32xf32>
    %c0_49 = arith.constant 0 : index
    %c0_50 = arith.constant 0 : index
    %272 = vector.load %arg5[%c0_49, %c0_50] : memref<256x32xbf16, #tpu.memory_space<vmem>>, vector<32x32xbf16>
    %c32_51 = arith.constant 32 : index
    %c0_52 = arith.constant 0 : index
    %273 = vector.load %arg5[%c32_51, %c0_52] : memref<256x32xbf16, #tpu.memory_space<vmem>>, vector<1x32xbf16>
    %274 = arith.extf %273 : vector<1x32xbf16> to vector<1x32xf32>
    %c48 = arith.constant 48 : index
    %c0_53 = arith.constant 0 : index
    %275 = vector.load %arg5[%c48, %c0_53] : memref<256x32xbf16, #tpu.memory_space<vmem>>, vector<1x32xbf16>
    %276 = arith.extf %275 : vector<1x32xbf16> to vector<1x32xf32>
    %c64_54 = arith.constant 64 : index
    %c0_55 = arith.constant 0 : index
    %277 = vector.load %arg5[%c64_54, %c0_55] : memref<256x32xbf16, #tpu.memory_space<vmem>>, vector<1x1xbf16>
    %278 = arith.extf %277 : vector<1x1xbf16> to vector<1x1xf32>
    %279 = vector.shape_cast %0 : vector<8x8x32xbf16> to vector<64x32xbf16>
    %cst_56 = arith.constant dense<0.000000e+00> : vector<64x32xf32>
    %280 = tpu.matmul %279, %272, %cst_56 {dimension_numbers = #tpu.dot_dimension_numbers<[1], [0], [0], [1], [0, 0, 1, 1], [], []>} : vector<64x32xbf16>, vector<32x32xbf16>, vector<64x32xf32> -> vector<64x32xf32>
    %281 = vector.broadcast %274 : vector<1x32xf32> to vector<64x32xf32>
    %282 = arith.addf %280, %281 : vector<64x32xf32>
    %283 = vector.shape_cast %282 : vector<64x32xf32> to vector<8x8x32xf32>
    %284 = vector.shape_cast %268 : vector<8x32xf32> to vector<8x1x32xf32>
    %285 = vector.broadcast %284 : vector<8x1x32xf32> to vector<8x8x32xf32>
    %286 = arith.addf %283, %285 : vector<8x8x32xf32>
    %cst_57 = arith.constant 0.000000e+00 : f32
    %287 = vector.broadcast %cst_57 : f32 to vector<8x8x32xf32>
    %288 = arith.maximumf %286, %287 : vector<8x8x32xf32>
    %289 = vector.shape_cast %276 : vector<1x32xf32> to vector<1x1x32xf32>
    %290 = vector.broadcast %289 : vector<1x1x32xf32> to vector<8x8x32xf32>
    %291 = arith.mulf %288, %290 : vector<8x8x32xf32>
    %cst_58 = arith.constant dense<0.000000e+00> : vector<8x8xf32>
    %292 = vector.multi_reduction <add>, %291, %cst_58 [2] : vector<8x8x32xf32> to vector<8x8xf32>
    %293 = vector.broadcast %278 : vector<1x1xf32> to vector<8x8xf32>
    %294 = arith.addf %292, %293 : vector<8x8xf32>
    %cst_59 = arith.constant dense<0xFF800000> : vector<8xf32>
    %295 = vector.multi_reduction <maximumf>, %294, %cst_59 [1] : vector<8x8xf32> to vector<8xf32>
    %296 = vector.shape_cast %295 : vector<8xf32> to vector<8x1xf32>
    %297 = vector.broadcast %296 : vector<8x1xf32> to vector<8x8xf32>
    %298 = arith.subf %294, %297 : vector<8x8xf32>
    %299 = math.exp %298 : vector<8x8xf32>
    %cst_60 = arith.constant dense<0.000000e+00> : vector<8xf32>
    %300 = vector.multi_reduction <add>, %299, %cst_60 [1] : vector<8x8xf32> to vector<8xf32>
    %301 = vector.shape_cast %300 : vector<8xf32> to vector<8x1xf32>
    %302 = tpu.reciprocal %301 {approx = true} : vector<8x1xf32> -> vector<8x1xf32>
    %303 = vector.broadcast %302 : vector<8x1xf32> to vector<8x8xf32>
    %304 = arith.mulf %299, %303 : vector<8x8xf32>
    %305 = arith.extf %0 : vector<8x8x32xbf16> to vector<8x8x32xf32>
    %306 = vector.shape_cast %304 : vector<8x8xf32> to vector<8x8x1xf32>
    %307 = vector.broadcast %306 : vector<8x8x1xf32> to vector<8x8x32xf32>
    %308 = arith.mulf %307, %305 : vector<8x8x32xf32>
    %cst_61 = arith.constant dense<0.000000e+00> : vector<8x32xf32>
    %309 = vector.multi_reduction <add>, %308, %cst_61 [1] : vector<8x8x32xf32> to vector<8x32xf32>
    %cst_62 = arith.constant dense<0.000000e+00> : vector<8x32xf32>
    %310 = vector.multi_reduction <add>, %305, %cst_62 [1] : vector<8x8x32xf32> to vector<8x32xf32>
    %cst_63 = arith.constant 8.000000e+00 : f32
    %311 = vector.broadcast %cst_63 : f32 to vector<8x32xf32>
    %312 = arith.divf %310, %311 : vector<8x32xf32>
    %c80_64 = arith.constant 80 : index
    %c0_65 = arith.constant 0 : index
    %313 = vector.load %arg5[%c80_64, %c0_65] : memref<256x32xbf16, #tpu.memory_space<vmem>>, vector<32x32xbf16>
    %c112 = arith.constant 112 : index
    %c0_66 = arith.constant 0 : index
    %314 = vector.load %arg5[%c112, %c0_66] : memref<256x32xbf16, #tpu.memory_space<vmem>>, vector<1x32xbf16>
    %315 = arith.extf %314 : vector<1x32xbf16> to vector<1x32xf32>
    %c128 = arith.constant 128 : index
    %c0_67 = arith.constant 0 : index
    %316 = vector.load %arg5[%c128, %c0_67] : memref<256x32xbf16, #tpu.memory_space<vmem>>, vector<32x32xbf16>
    %c160 = arith.constant 160 : index
    %c0_68 = arith.constant 0 : index
    %317 = vector.load %arg5[%c160, %c0_68] : memref<256x32xbf16, #tpu.memory_space<vmem>>, vector<1x32xbf16>
    %318 = arith.extf %317 : vector<1x32xbf16> to vector<1x32xf32>
    %319 = arith.truncf %309 : vector<8x32xf32> to vector<8x32xbf16>
    %cst_69 = arith.constant dense<0.000000e+00> : vector<8x32xf32>
    %320 = tpu.matmul %319, %313, %cst_69 {dimension_numbers = #tpu.dot_dimension_numbers<[1], [0], [0], [1], [0, 0, 1, 1], [], []>} : vector<8x32xbf16>, vector<32x32xbf16>, vector<8x32xf32> -> vector<8x32xf32>
    %321 = vector.broadcast %315 : vector<1x32xf32> to vector<8x32xf32>
    %322 = arith.addf %320, %321 : vector<8x32xf32>
    %cst_70 = arith.constant 0.000000e+00 : f32
    %323 = vector.broadcast %cst_70 : f32 to vector<8x32xf32>
    %324 = arith.maximumf %322, %323 : vector<8x32xf32>
    %325 = arith.truncf %312 : vector<8x32xf32> to vector<8x32xbf16>
    %cst_71 = arith.constant dense<0.000000e+00> : vector<8x32xf32>
    %326 = tpu.matmul %325, %316, %cst_71 {dimension_numbers = #tpu.dot_dimension_numbers<[1], [0], [0], [1], [0, 0, 1, 1], [], []>} : vector<8x32xbf16>, vector<32x32xbf16>, vector<8x32xf32> -> vector<8x32xf32>
    %327 = vector.broadcast %318 : vector<1x32xf32> to vector<8x32xf32>
    %328 = arith.addf %326, %327 : vector<8x32xf32>
    %cst_72 = arith.constant 0.000000e+00 : f32
    %329 = vector.broadcast %cst_72 : f32 to vector<8x32xf32>
    %330 = arith.maximumf %328, %329 : vector<8x32xf32>
    %331 = arith.mulf %271, %324 : vector<8x32xf32>
    %332 = arith.mulf %271, %330 : vector<8x32xf32>
    %c176 = arith.constant 176 : index
    %c0_73 = arith.constant 0 : index
    %333 = vector.load %arg5[%c176, %c0_73] : memref<256x32xbf16, #tpu.memory_space<vmem>>, vector<64x32xbf16>
    %c240 = arith.constant 240 : index
    %c0_74 = arith.constant 0 : index
    %334 = vector.load %arg5[%c240, %c0_74] : memref<256x32xbf16, #tpu.memory_space<vmem>>, vector<1x32xbf16>
    %335 = arith.extf %334 : vector<1x32xbf16> to vector<1x32xf32>
    %336 = tpu.concatenate %331, %332 in 1 : vector<8x32xf32>, vector<8x32xf32> -> vector<8x64xf32>
    %337 = arith.truncf %336 : vector<8x64xf32> to vector<8x64xbf16>
    %cst_75 = arith.constant dense<0.000000e+00> : vector<8x32xf32>
    %338 = tpu.matmul %337, %333, %cst_75 {dimension_numbers = #tpu.dot_dimension_numbers<[1], [0], [0], [1], [0, 0, 1, 1], [], []>} : vector<8x64xbf16>, vector<64x32xbf16>, vector<8x32xf32> -> vector<8x32xf32>
    %339 = vector.broadcast %335 : vector<1x32xf32> to vector<8x32xf32>
    %340 = arith.addf %338, %339 : vector<8x32xf32>
    %cst_76 = arith.constant 0.000000e+00 : f32
    %341 = vector.broadcast %cst_76 : f32 to vector<8x32xf32>
    %342 = arith.maximumf %340, %341 : vector<8x32xf32>
    %c0_77 = arith.constant 0 : index
    %c0_78 = arith.constant 0 : index
    %343 = vector.load %arg6[%c0_77, %c0_78] : memref<48x128xbf16, #tpu.memory_space<vmem>>, vector<32x128xbf16>
    %c32_79 = arith.constant 32 : index
    %c0_80 = arith.constant 0 : index
    %344 = vector.load %arg6[%c32_79, %c0_80] : memref<48x128xbf16, #tpu.memory_space<vmem>>, vector<1x128xbf16>
    %345 = arith.extf %344 : vector<1x128xbf16> to vector<1x128xf32>
    %346 = arith.truncf %342 : vector<8x32xf32> to vector<8x32xbf16>
    %cst_81 = arith.constant dense<0.000000e+00> : vector<8x128xf32>
    %347 = tpu.matmul %346, %343, %cst_81 {dimension_numbers = #tpu.dot_dimension_numbers<[1], [0], [0], [1], [0, 0, 1, 1], [], []>} : vector<8x32xbf16>, vector<32x128xbf16>, vector<8x128xf32> -> vector<8x128xf32>
    %348 = vector.broadcast %345 : vector<1x128xf32> to vector<8x128xf32>
    %349 = arith.addf %347, %348 : vector<8x128xf32>
    %c0_82 = arith.constant 0 : index
    %c0_83 = arith.constant 0 : index
    %350 = vector.load %arg7[%c0_82, %c0_83] : memref<8x128xf32, #tpu.memory_space<vmem>>, vector<8x128xf32>
    tpu.vector_store %arg7[%c0_82, %c0_83], %349 {strides = array<i32>} : memref<8x128xf32, #tpu.memory_space<vmem>>, vector<8x128xf32>,
    return
  }
  func.func @transform_0(%arg0: i32) -> (i32, i32, i32) {
    %c0_i32 = arith.constant 0 : i32
    %c0_i32_0 = arith.constant 0 : i32
    %c0_i32_1 = arith.constant 0 : i32
    return %arg0, %c0_i32, %c0_i32_0 : i32, i32, i32
  }
  func.func @transform_1(%arg0: i32) -> (i32, i32, i32) {
    %c0_i32 = arith.constant 0 : i32
    %c0_i32_0 = arith.constant 0 : i32
    %c0_i32_1 = arith.constant 0 : i32
    return %c0_i32, %arg0, %c0_i32_0 : i32, i32, i32
  }
  func.func @transform_2(%arg0: i32) -> (i32, i32) {
    %c0_i32 = arith.constant 0 : i32
    %c0_i32_0 = arith.constant 0 : i32
    %c0_i32_1 = arith.constant 0 : i32
    return %c0_i32, %c0_i32_0 : i32, i32
  }
  func.func @transform_3(%arg0: i32) -> (i32, i32) {
    %c0_i32 = arith.constant 0 : i32
    %c0_i32_0 = arith.constant 0 : i32
    %c0_i32_1 = arith.constant 0 : i32
    return %c0_i32, %c0_i32_0 : i32, i32
  }
  func.func @transform_4(%arg0: i32) -> (i32, i32) {
    %c0_i32 = arith.constant 0 : i32
    %c0_i32_0 = arith.constant 0 : i32
    %c0_i32_1 = arith.constant 0 : i32
    return %c0_i32, %c0_i32_0 : i32, i32
  }
  func.func @transform_5(%arg0: i32) -> (i32, i32) {
    %c0_i32 = arith.constant 0 : i32
    %c0_i32_0 = arith.constant 0 : i32
    %c0_i32_1 = arith.constant 0 : i32
    return %c0_i32, %c0_i32_0 : i32, i32
  }
  func.func @transform_6(%arg0: i32) -> (i32, i32) {
    %c0_i32 = arith.constant 0 : i32
    %c0_i32_0 = arith.constant 0 : i32
    return %arg0, %c0_i32 : i32, i32
  }
}

</mosaic_0001>

<bundles_post_ra>
// kernel: tpu_custom_call.1
= control target key start
LH: loop header
LB: loop body
LE: loop exit
PB: predicated region body
PF: predicated region fallthrough
CT: control target
= control target key end

     0   :  { %v2285_v1 = vmov 0.0   ;;  %vm2286_vm0 = vmmov 0   ;;  %vm89_vm1 = vcmask 261120   ;;  %v2287_v6 = vmov 0   ;;  %s2786_s0 = inlined_call_operand.vmem [shape: bf16[8,8,32], index: 0, kind: input, shape index: {}]   ;;  %s2787_s1 = inlined_call_operand.vmem [shape: bf16[8,8,32], index: 1, kind: input, shape index: {}]   ;;  %s2788_s2 = inlined_call_operand.vmem [shape: bf16[96,96], index: 2, kind: input, shape index: {}]   ;;  %s2789_s3 = inlined_call_operand.vmem [shape: bf16[48,64], index: 3, kind: input, shape index: {}]   ;;  %s2790_s4 = inlined_call_operand.vmem [shape: bf16[256,32], index: 4, kind: input, shape index: {}]   ;;  %s2791_s5 = inlined_call_operand.vmem [shape: bf16[48,128], index: 5, kind: input, shape index: {}]   ;;  %s2792_s6 = inlined_call_operand.hbm [shape: f32[8,128], index: 6, kind: output, shape index: {}]  }
   0x1   :  { %v2165_v0 = vld [vmem:[%s2788_s2] sm:$0xff]   ;;  %2033 = vmatprep.subr.bf16.mxu1 %v2285_v1  ;;  %v2335_v2 = vld [vmem:[%s2788_s2 + $0x10] sm:$0xff]   ;;  %v2167_v3 = vld [vmem:[%s2788_s2 + $0x8] sm:$0xff]   ;;  %2037 = vmatprep.mubr.msk.bf16.mxu1 %vm2286_vm0, %v2285_v1 }
   0x2   :  { %2021 = vmatprep.subr.bf16.mxu0 %v2165_v0  ;;  %2034 = vmatpush3.bf16.msra.mxu1 %v2335_v2  ;;  %v2346_v4 = vld [vmem:[%s2788_s2 + $0x18] sm:$0xff]   ;;  %v2169_v5 = vld [vmem:[%s2787_s1] sm:$0xff]   ;;  %v2170_v7 = vld [vmem:[%s2787_s1 + $0x8] sm:$0xff]  }
   0x3   :  { %2022 = vmatpush3.bf16.msra.mxu0 %v2165_v0  ;;  %2035 = vmatprep.subr.bf16.mxu1 %v2285_v1 }
   0x4   :  { %2023 = vmatprep.subr.bf16.mxu0 %v2167_v3  ;;  %2164 = vset.pattern.permute.xlu1 %v2287_v6 }
   0x5   :  { %2163 = vset.pattern.permute.xlu0 %v2287_v6  ;;  %2025 = vmatprep.mubr.msk.bf16.mxu0 %vm89_vm1, %v2169_v5 }
   0x6   :  { %2036 = vmatpush3.bf16.msra.mxu1 %v2346_v4 }
   0x7   :  { %2024 = vmatpush3.bf16.msra.mxu0 %v2167_v3  ;;  %2041 = vmatprep.subr.bf16.mxu1 %v2285_v1 }
   0x8   :  { %2049 = vmatprep.subr.bf16.mxu0 %v2285_v1 }
   0x9   :  { %2038 = vmatmul.mubr.bf16.vlgmr.msra.gmra.mrb[0].mxu1 %v2287_v6 }
   0xa   :  { %2026 = vmatmul.mubr.msk.bf16.vlgmr.msra.gmra.mrb[0].mxu0 %vm89_vm1, %v2170_v7  ;;  %2042 = vmatpush3.bf16.msra.mxu1 %v2335_v2 }
   0xb   :  { %2045 = vmatprep.mubr.msk.bf16.mxu1 %vm2286_vm0, %v2285_v1  ;;  %2043 = vmatprep.subr.bf16.mxu1 %v2285_v1 }
   0xc   :  { %2050 = vmatpush3.bf16.msra.mxu0 %v2335_v2 }
   0xd   :  { %2051 = vmatprep.subr.bf16.mxu0 %v2285_v1 }
   0xe   :  { %2044 = vmatpush3.bf16.msra.mxu1 %v2346_v4 }
   0xf   :  { %2057 = vmatprep.subr.bf16.mxu1 %v2285_v1 }
  0x10   :  { %2052 = vmatpush3.bf16.msra.mxu0 %v2346_v4 }
  0x11   :  { %2065 = vmatprep.subr.bf16.mxu0 %v2285_v1 }
  0x12   :  { %11 = vsyncpa [#allocation3], 0  ;;  %v53_v8 = vlaneseq  ;;  %v51_v10 = vld [vmem:[%s2788_s2 + $0x28] sm:$0x1]  ;;  %s2288_s11 = smov 64   ;;  %v2171_v59 = vld [vmem:[%s2787_s1 + $0x10] sm:$0xff]  }
  0x13   :  { %v52_v11 = vunpack.c.l.bf16 %v51_v10  ;;  %v49_v23 = vld [vmem:[%s2788_s2 + $0x20] sm:$0x1]  ;;  %s2289_s2 = smov 96   ;;  %v2172_v60 = vld [vmem:[%s2787_s1 + $0x18] sm:$0xff]   ;;  %2029 = vmatprep.mubr.msk.bf16.mxu0 %vm89_vm1, %v2171_v59  ;;  %vm1152_vm2 = vcmask 1041409   ;;  %vm1154_vm3 = vcmask 1042434  }
  0x14   :  { %v2371_v9 = vshrl.u32 %v53_v8, 7  ;;  %v50_v24 = vunpack.c.l.bf16 %v49_v23  ;;  %2030 = vmatmul.mubr.msk.bf16.gmra.mrb[4].mxu0 %vm89_vm1, %v2172_v60  ;;  %vm1156_vm4 = vcmask 1043459   ;;  %vm1158_vm5 = vcmask 1044484   ;;  %s2291_s7 = smov 32  }
  0x15   :  { %2053 = vmatprep.mubr.msk.bf16.mxu0 %vm2286_vm0, %v2285_v1  ;;  %vm1160_vm6 = vcmask 1045509   ;;  %vm1162_vm7 = vcmask 1046534   ;;  %vm1164_vm8 = vcmask 1047559   ;;  %vm1167_vm9 = vcmask 64512  }
  0x16   :  { %v2377_v12 = vsub.s32 0, %v2371_v9  ;;  %vm1788_vm10 = vcmask 523264  }
  0x18   :  { %v2380_v13 = vrot.slane %v52_v11, %v2377_v12  ;;  %v2392_v25 = vrot.slane %v50_v24, %v2377_v12 }
  0xdc   :  { %v220_v14 = vpop.f32.mrb[0].mxu1 }
  0xdd   :  { %v2382_v15 = vpop.f32.mrb[0].mxu0  ;;  %v221_v16 = vadd.f32 %v220_v14, %v2380_v13  ;;  %v2039_v17 = vpop.f32.mrb[1].mxu1 }
  0xde   :  { %v136_v18 = vpop.f32.mrb[1].mxu0  ;;  %v223_v19 = vpop.f32.mrb[2].mxu1  ;;  %v145_v23 = vadd.f32 %v2382_v15, %v2392_v25 }
  0xdf   :  { %v2385_v20 = vpop.f32.mrb[2].mxu0  ;;  %234 = vrot.lane.b32.xlu0 %v221_v16, %s2288_s11  ;;  %v2040_v21 = vpop.f32.mrb[3].mxu1  ;;  %v137_v26 = vadd.f32 %v136_v18, %v2392_v25 }
  0xe0   :  { %v139_v22 = vpop.f32.mrb[3].mxu0 }
  0xe1   :  { %v226_v27 = vadd.f32 %v221_v16, %v137_v26  ;;  %v140_v49 = vadd.f32 %v139_v22, %v2392_v25 }
  0xe3   :  { %v1926_v28 = vmul.f32 -1.442695, %v226_v27 }
  0xe5   :  { %2195 = vpow2.f32 %v1926_v28 }
  0xe7   :  { %v2421_v7 = vpop.f32.mrb[4].mxu0 }
  0xe8   :  { %v2423_v10 = vpop.f32.mrb[5].mxu0 }
  0xe9   :  { %v2425_v11 = vpop.f32.mrb[6].mxu0 }
  0xea   :  { %v2427_v14 = vpop.f32.mrb[7].mxu0 }
  0xef   :  { %v2196_v29 = vpop.eup %2195 }
  0xf0   :  { %v230_v30 = vadd.f32 1.0, %v2196_v29 }
  0xf2   :  { %2197 = vrcp.f32 %v230_v30 }
  0xfc   :  { %v2198_v31 = vpop.eup %2197 }
  0xfd   :  { %v244_v37 = vsub.f32 1.0, %v2198_v31  ;;  %v250_v39 = vmul.f32 0.0, %v2198_v31 }
 0x151   :  { %v235_v32 = vpop.permute.xlu0 %234 }
 0x152   :  { %v237_v33 = vmul.f32 %v2198_v31, %v235_v32 }
 0x154   :  { %239 = vrot.lane.b32.xlu0 %v237_v33, %s2288_s11 }
 0x1c6   :  { %v240_v34 = vpop.permute.xlu0 %239 }
 0x1c7   :  { %v242_v35 = vadd.f32 %v240_v34, %v137_v26 }
 0x1c9   :  { %2199 = vtanh.f32 %v242_v35 }
 0x1d3   :  { %v2200_v36 = vpop.eup %2199 }
 0x1d4   :  { %246 = vrot.lane.b32.xlu1 %v2200_v36, %s2289_s2 }
 0x246   :  { %v247_v38 = vpop.permute.xlu1 %246 }
 0x247   :  { %v249_v40 = vmul.f32 %v247_v38, %v244_v37 }
 0x249   :  { %v251_v41 = vadd.f32 %v250_v39, %v249_v40 }
 0x24b   :  { %v252_v42 = vpack.c.bf16 %v251_v41, %v251_v41 }
 0x24d   :  { %254 = vrot.lane.b32.xlu1 %v252_v42, %s2289_s2 }
 0x2bf   :  { %v255_v43 = vpop.permute.xlu1 %254 }
 0x2c0   :  { %2046 = vmatmul.mubr.msk.bf16.vlgmr.msra.gmra.mrb[4].mxu1 %vm89_vm1, %v255_v43 }
 0x2c1   :  { %2058 = vmatpush3.bf16.msra.mxu1 %v2335_v2  ;;  %2061 = vmatprep.mubr.msk.bf16.mxu1 %vm2286_vm0, %v2285_v1 }
 0x2c2   :  { %2059 = vmatprep.subr.bf16.mxu1 %v2285_v1 }
 0x2c5   :  { %2060 = vmatpush3.bf16.msra.mxu1 %v2346_v4 }
 0x2c6   :  { %2073 = vmatprep.subr.bf16.mxu1 %v2285_v1 }
 0x393   :  { %v293_v44 = vpop.f32.mrb[4].mxu1 }
 0x394   :  { %v294_v45 = vadd.f32 %v293_v44, %v2380_v13  ;;  %v2047_v46 = vpop.f32.mrb[5].mxu1 }
 0x395   :  { %v296_v47 = vpop.f32.mrb[6].mxu1  ;;  %v148_v46 = vadd.f32 %v2385_v20, %v2392_v25 }
 0x396   :  { %307 = vrot.lane.b32.xlu0 %v294_v45, %s2288_s11  ;;  %v2048_v48 = vpop.f32.mrb[7].mxu1  ;;  %v299_v50 = vadd.f32 %v294_v45, %v140_v49 }
 0x398   :  { %v1928_v51 = vmul.f32 -1.442695, %v299_v50 }
 0x39a   :  { %2201 = vpow2.f32 %v1928_v51 }
 0x3a4   :  { %v2202_v52 = vpop.eup %2201 }
 0x3a5   :  { %v303_v53 = vadd.f32 1.0, %v2202_v52 }
 0x3a7   :  { %2203 = vrcp.f32 %v303_v53 }
 0x3b1   :  { %v2204_v54 = vpop.eup %2203 }
 0x3b2   :  { %v317_v62 = vsub.f32 1.0, %v2204_v54  ;;  %v323_v0 = vmul.f32 %v2204_v54, %v251_v41 }
 0x408   :  { %v308_v55 = vpop.permute.xlu0 %307 }
 0x409   :  { %v310_v56 = vmul.f32 %v2204_v54, %v308_v55 }
 0x40b   :  { %312 = vrot.lane.b32.xlu1 %v310_v56, %s2288_s11 }
 0x47d   :  { %v313_v57 = vpop.permute.xlu1 %312 }
 0x47e   :  { %v315_v58 = vadd.f32 %v313_v57, %v140_v49 }
 0x480   :  { %2205 = vtanh.f32 %v315_v58 }
 0x48a   :  { %v2206_v61 = vpop.eup %2205 }
 0x48b   :  { %319 = vrot.lane.b32.xlu0 %v2206_v61, %s2289_s2 }
 0x4fd   :  { %v320_v63 = vpop.permute.xlu0 %319 }
 0x4fe   :  { %v322_v3 = vmul.f32 %v320_v63, %v317_v62 }
 0x500   :  { %v324_v5 = vadd.f32 %v323_v0, %v322_v3 }
 0x502   :  { %v325_v6 = vpack.c.bf16 %v324_v5, %v324_v5 }
 0x504   :  { %327 = vrot.lane.b32.xlu1 %v325_v6, %s2289_s2 }
 0x576   :  { %v328_v16 = vpop.permute.xlu1 %327 }
 0x577   :  { %2054 = vmatmul.mubr.msk.bf16.vlgmr.msra.gmra.mrb[8].mxu0 %vm89_vm1, %v328_v16  ;;  %v153_v16 = vadd.f32 %v2423_v10, %v2392_v25 }
 0x578   :  { %2066 = vmatpush3.bf16.msra.mxu0 %v2335_v2  ;;  %2069 = vmatprep.mubr.msk.bf16.mxu0 %vm2286_vm0, %v2285_v1 }
 0x579   :  { %2067 = vmatprep.subr.bf16.mxu0 %v2285_v1 }
 0x57c   :  { %2068 = vmatpush3.bf16.msra.mxu0 %v2346_v4 }
 0x57d   :  { %2081 = vmatprep.subr.bf16.mxu0 %v2285_v1 }
 0x64a   :  { %v366_v17 = vpop.f32.mrb[8].mxu0 }
 0x64b   :  { %v367_v18 = vadd.f32 %v366_v17, %v2380_v13  ;;  %v2055_v19 = vpop.f32.mrb[9].mxu0 }
 0x64c   :  { %v369_v21 = vpop.f32.mrb[10].mxu0 }
 0x64d   :  { %380 = vrot.lane.b32.xlu0 %v367_v18, %s2288_s11  ;;  %v2056_v22 = vpop.f32.mrb[11].mxu0  ;;  %v372_v24 = vadd.f32 %v367_v18, %v145_v23 }
 0x64f   :  { %v1930_v26 = vmul.f32 -1.442695, %v372_v24 }
 0x651   :  { %2207 = vpow2.f32 %v1930_v26 }
 0x65b   :  { %v2208_v27 = vpop.eup %2207 }
 0x65c   :  { %v376_v28 = vadd.f32 1.0, %v2208_v27 }
 0x65e   :  { %2209 = vrcp.f32 %v376_v28 }
 0x668   :  { %v2210_v29 = vpop.eup %2209 }
 0x669   :  { %v390_v35 = vsub.f32 1.0, %v2210_v29  ;;  %v396_v15 = vmul.f32 %v2210_v29, %v324_v5 }
 0x6bf   :  { %v381_v30 = vpop.permute.xlu0 %380 }
 0x6c0   :  { %v383_v31 = vmul.f32 %v2210_v29, %v381_v30 }
 0x6c2   :  { %385 = vrot.lane.b32.xlu1 %v383_v31, %s2288_s11 }
 0x734   :  { %v386_v32 = vpop.permute.xlu1 %385 }
 0x735   :  { %v388_v33 = vadd.f32 %v386_v32, %v145_v23 }
 0x737   :  { %2211 = vtanh.f32 %v388_v33 }
 0x741   :  { %v2212_v34 = vpop.eup %2211 }
 0x742   :  { %392 = vrot.lane.b32.xlu0 %v2212_v34, %s2289_s2 }
 0x7b4   :  { %v393_v36 = vpop.permute.xlu0 %392 }
 0x7b5   :  { %v395_v37 = vmul.f32 %v393_v36, %v390_v35 }
 0x7b7   :  { %v397_v38 = vadd.f32 %v396_v15, %v395_v37 }
 0x7b9   :  { %v398_v39 = vpack.c.bf16 %v397_v38, %v397_v38 }
 0x7bb   :  { %400 = vrot.lane.b32.xlu1 %v398_v39, %s2289_s2  ;;  %v156_v39 = vadd.f32 %v2427_v14, %v2392_v25 }
 0x82d   :  { %v401_v40 = vpop.permute.xlu1 %400 }
 0x82e   :  { %2062 = vmatmul.mubr.msk.bf16.vlgmr.msra.gmra.mrb[8].mxu1 %vm89_vm1, %v401_v40 }
 0x82f   :  { %2074 = vmatpush3.bf16.msra.mxu1 %v2335_v2  ;;  %2077 = vmatprep.mubr.msk.bf16.mxu1 %vm2286_vm0, %v2285_v1 }
 0x830   :  { %2075 = vmatprep.subr.bf16.mxu1 %v2285_v1 }
 0x833   :  { %2076 = vmatpush3.bf16.msra.mxu1 %v2346_v4 }
 0x834   :  { %2089 = vmatprep.subr.bf16.mxu1 %v2285_v1 }
 0x901   :  { %v439_v41 = vpop.f32.mrb[8].mxu1 }
 0x902   :  { %v440_v42 = vadd.f32 %v439_v41, %v2380_v13  ;;  %v2063_v43 = vpop.f32.mrb[9].mxu1 }
 0x903   :  { %v442_v44 = vpop.f32.mrb[10].mxu1 }
 0x904   :  { %453 = vrot.lane.b32.xlu0 %v440_v42, %s2288_s11  ;;  %v2064_v45 = vpop.f32.mrb[11].mxu1  ;;  %v445_v47 = vadd.f32 %v440_v42, %v148_v46 }
 0x906   :  { %v1932_v48 = vmul.f32 -1.442695, %v445_v47 }
 0x908   :  { %2213 = vpow2.f32 %v1932_v48 }
 0x912   :  { %v2214_v49 = vpop.eup %2213 }
 0x913   :  { %v449_v50 = vadd.f32 1.0, %v2214_v49 }
 0x915   :  { %2215 = vrcp.f32 %v449_v50 }
 0x91f   :  { %v2216_v51 = vpop.eup %2215 }
 0x920   :  { %v463_v57 = vsub.f32 1.0, %v2216_v51  ;;  %v469_v20 = vmul.f32 %v2216_v51, %v397_v38 }
 0x976   :  { %v454_v52 = vpop.permute.xlu0 %453 }
 0x977   :  { %v456_v53 = vmul.f32 %v2216_v51, %v454_v52 }
 0x979   :  { %458 = vrot.lane.b32.xlu1 %v456_v53, %s2288_s11 }
 0x9eb   :  { %v459_v54 = vpop.permute.xlu1 %458 }
 0x9ec   :  { %v461_v55 = vadd.f32 %v459_v54, %v148_v46 }
 0x9ee   :  { %2217 = vtanh.f32 %v461_v55 }
 0x9f8   :  { %v2218_v56 = vpop.eup %2217 }
 0x9f9   :  { %465 = vrot.lane.b32.xlu0 %v2218_v56, %s2289_s2 }
 0xa6b   :  { %v466_v58 = vpop.permute.xlu0 %465 }
 0xa6c   :  { %v468_v59 = vmul.f32 %v466_v58, %v463_v57 }
 0xa6e   :  { %v470_v60 = vadd.f32 %v469_v20, %v468_v59  ;;  %v161_v20 = vadd.f32 %v2421_v7, %v2392_v25 }
 0xa70   :  { %v471_v61 = vpack.c.bf16 %v470_v60, %v470_v60 }
 0xa72   :  { %473 = vrot.lane.b32.xlu1 %v471_v61, %s2289_s2 }
 0xae4   :  { %v474_v62 = vpop.permute.xlu1 %473 }
 0xae5   :  { %2070 = vmatmul.mubr.msk.bf16.vlgmr.msra.gmra.mrb[12].mxu0 %vm89_vm1, %v474_v62 }
 0xae6   :  { %2082 = vmatpush3.bf16.msra.mxu0 %v2335_v2  ;;  %2085 = vmatprep.mubr.msk.bf16.mxu0 %vm2286_vm0, %v2285_v1 }
 0xae7   :  { %2083 = vmatprep.subr.bf16.mxu0 %v2285_v1 }
 0xaea   :  { %2084 = vmatpush3.bf16.msra.mxu0 %v2346_v4 }
 0xaeb   :  { %2097 = vmatprep.subr.bf16.mxu0 %v2285_v1 }
 0xbb8   :  { %v512_v63 = vpop.f32.mrb[12].mxu0 }
 0xbb9   :  { %v513_v0 = vadd.f32 %v512_v63, %v2380_v13  ;;  %v2071_v3 = vpop.f32.mrb[13].mxu0 }
 0xbba   :  { %v515_v5 = vpop.f32.mrb[14].mxu0 }
 0xbbb   :  { %526 = vrot.lane.b32.xlu0 %v513_v0, %s2288_s11  ;;  %v2072_v6 = vpop.f32.mrb[15].mxu0  ;;  %v518_v17 = vadd.f32 %v513_v0, %v153_v16 }
 0xbbd   :  { %v1934_v18 = vmul.f32 -1.442695, %v518_v17 }
 0xbbf   :  { %2219 = vpow2.f32 %v1934_v18 }
 0xbc9   :  { %v2220_v19 = vpop.eup %2219 }
 0xbca   :  { %v522_v21 = vadd.f32 1.0, %v2220_v19 }
 0xbcc   :  { %2221 = vrcp.f32 %v522_v21 }
 0xbd6   :  { %v2222_v22 = vpop.eup %2221 }
 0xbd7   :  { %v536_v29 = vsub.f32 1.0, %v2222_v22  ;;  %v542_v10 = vmul.f32 %v2222_v22, %v470_v60 }
 0xc2d   :  { %v527_v23 = vpop.permute.xlu0 %526 }
 0xc2e   :  { %v529_v24 = vmul.f32 %v2222_v22, %v527_v23 }
 0xc30   :  { %531 = vrot.lane.b32.xlu1 %v529_v24, %s2288_s11 }
 0xca2   :  { %v532_v26 = vpop.permute.xlu1 %531 }
 0xca3   :  { %v534_v27 = vadd.f32 %v532_v26, %v153_v16 }
 0xca5   :  { %2223 = vtanh.f32 %v534_v27 }
 0xcaf   :  { %v2224_v28 = vpop.eup %2223 }
 0xcb0   :  { %538 = vrot.lane.b32.xlu0 %v2224_v28, %s2289_s2 }
 0xd22   :  { %v539_v30 = vpop.permute.xlu0 %538 }
 0xd23   :  { %v541_v31 = vmul.f32 %v539_v30, %v536_v29  ;;  %v164_v30 = vadd.f32 %v2425_v11, %v2392_v25  ;;  %v2174_v25 = vld [vmem:[%s2789_s3] sm:$0xff]   ;;  %v2175_v11 = vld [vmem:[%s2790_s4 + $0x8] sm:$0xff]  }
 0xd25   :  { %v543_v32 = vadd.f32 %v542_v10, %v541_v31 }
 0xd27   :  { %v544_v33 = vpack.c.bf16 %v543_v32, %v543_v32 }
 0xd29   :  { %546 = vrot.lane.b32.xlu1 %v544_v33, %s2289_s2 }
 0xd9b   :  { %v547_v34 = vpop.permute.xlu1 %546 }
 0xd9c   :  { %2078 = vmatmul.mubr.msk.bf16.vlgmr.msra.gmra.mrb[12].mxu1 %vm89_vm1, %v547_v34 }
 0xd9d   :  { %2090 = vmatpush3.bf16.msra.mxu1 %v2335_v2  ;;  %2093 = vmatprep.mubr.msk.bf16.mxu1 %vm2286_vm0, %v2285_v1 }
 0xd9e   :  { %2091 = vmatprep.subr.bf16.mxu1 %v2285_v1 }
 0xda1   :  { %2092 = vmatpush3.bf16.msra.mxu1 %v2346_v4 }
 0xe6f   :  { %v585_v35 = vpop.f32.mrb[12].mxu1 }
 0xe70   :  { %v586_v36 = vadd.f32 %v585_v35, %v2380_v13  ;;  %v2079_v15 = vpop.f32.mrb[13].mxu1 }
 0xe71   :  { %v588_v37 = vpop.f32.mrb[14].mxu1 }
 0xe72   :  { %599 = vrot.lane.b32.xlu0 %v586_v36, %s2288_s11  ;;  %v2080_v38 = vpop.f32.mrb[15].mxu1  ;;  %v591_v40 = vadd.f32 %v586_v36, %v156_v39  ;;  %v2173_v37 = vld [vmem:[%s2790_s4] sm:$0xff]  }
 0xe73   :  { %v2512_v38 = vld [vmem:[%s2786_s0] sm:$0xff]   ;;  %2105 = vmatprep.subr.bf16.mxu1 %v2173_v37 }
 0xe74   :  { %v1936_v2 = vmul.f32 -1.442695, %v591_v40 }
 0xe76   :  { %2225 = vpow2.f32 %v1936_v2  ;;  %v2526_v2 = vld [vmem:[%s2786_s0 + $0x8] sm:$0xff]  }
 0xe80   :  { %v2226_v41 = vpop.eup %2225 }
 0xe81   :  { %v595_v42 = vadd.f32 1.0, %v2226_v41  ;;  %v2533_v41 = vld [vmem:[%s2786_s0 + $0x10] sm:$0xff]  }
 0xe83   :  { %2227 = vrcp.f32 %v595_v42  ;;  %v2538_v42 = vld [vmem:[%s2786_s0 + $0x18] sm:$0xff]  }
 0xe8d   :  { %v2228_v43 = vpop.eup %2227 }
 0xe8e   :  { %v609_v48 = vsub.f32 1.0, %v2228_v43  ;;  %v615_v14 = vmul.f32 %v2228_v43, %v543_v32 }
 0xee4   :  { %v600_v44 = vpop.permute.xlu0 %599 }
 0xee5   :  { %v602_v4 = vmul.f32 %v2228_v43, %v600_v44 }
 0xee7   :  { %604 = vrot.lane.b32.xlu1 %v602_v4, %s2288_s11 }
 0xf59   :  { %v605_v45 = vpop.permute.xlu1 %604 }
 0xf5a   :  { %v607_v46 = vadd.f32 %v605_v45, %v156_v39  ;;  %v2176_v39 = vld [vmem:[%s2789_s3 + $0x8] sm:$0xff]  }
 0xf5c   :  { %2229 = vtanh.f32 %v607_v46 }
 0xf66   :  { %v2230_v47 = vpop.eup %2229 }
 0xf67   :  { %611 = vrot.lane.b32.xlu0 %v2230_v47, %s2289_s2 }
 0xfd9   :  { %v612_v49 = vpop.permute.xlu0 %611 }
 0xfda   :  { %v614_v50 = vmul.f32 %v612_v49, %v609_v48 }
 0xfdc   :  { %v616_v51 = vadd.f32 %v615_v14, %v614_v50 }
 0xfde   :  { %v617_v52 = vpack.c.bf16 %v616_v51, %v616_v51 }
 0xfe0   :  { %619 = vrot.lane.b32.xlu1 %v617_v52, %s2289_s2 }
0x1052   :  { %v620_v53 = vpop.permute.xlu1 %619 }
0x1053   :  { %2086 = vmatmul.mubr.msk.bf16.vlgmr.msra.gmra.mrb[16].mxu0 %vm89_vm1, %v620_v53 }
0x1054   :  { %2101 = vmatprep.mubr.msk.bf16.mxu0 %vm2286_vm0, %v2285_v1  ;;  %2098 = vmatpush3.bf16.msra.mxu0 %v2174_v25 }
0x1055   :  { %2099 = vmatprep.subr.bf16.mxu0 %v2285_v1 }
0x1058   :  { %2100 = vmatpush3.bf16.msra.mxu0 %v2176_v39 }
0x1059   :  { %2117 = vmatprep.subr.bf16.mxu0 %v2285_v1 }
0x1126   :  { %v658_v54 = vpop.f32.mrb[16].mxu0 }
0x1127   :  { %v659_v55 = vadd.f32 %v658_v54, %v2380_v13  ;;  %v2087_v56 = vpop.f32.mrb[17].mxu0 }
0x1128   :  { %v661_v57 = vpop.f32.mrb[18].mxu0  ;;  %v841_v56 = vld [vmem:[%s2790_s4 + $0x20] sm:$0x1] }
0x1129   :  { %672 = vrot.lane.b32.xlu0 %v659_v55, %s2288_s11  ;;  %v2088_v58 = vpop.f32.mrb[19].mxu0  ;;  %v664_v59 = vadd.f32 %v659_v55, %v161_v20  ;;  %v842_v57 = vunpack.c.l.bf16 %v841_v56 }
0x112a   :  { %v767_v58 = vld [vmem:[%s2789_s3 + $0x10] sm:$0x1] }
0x112b   :  { %v1938_v60 = vmul.f32 -1.442695, %v664_v59  ;;  %2153 = vpush %v842_v57 }
0x112d   :  { %2231 = vpow2.f32 %v1938_v60  ;;  %v768_v60 = vunpack.c.l.bf16 %v767_v58 }
0x1137   :  { %v2232_v61 = vpop.eup %2231 }
0x1138   :  { %v668_v62 = vadd.f32 1.0, %v2232_v61  ;;  %v837_v61 = vld [vmem:[%s2790_s4 + $0x10] sm:$0x1] }
0x113a   :  { %2233 = vrcp.f32 %v668_v62 }
0x1144   :  { %v2234_v63 = vpop.eup %2233 }
0x1145   :  { %v682_v17 = vsub.f32 1.0, %v2234_v63  ;;  %v688_v7 = vmul.f32 %v2234_v63, %v616_v51 }
0x115c   :  { %s2154_s15 = spop %2153 }
0x119b   :  { %v673_v0 = vpop.permute.xlu0 %672 }
0x119c   :  { %v675_v3 = vmul.f32 %v2234_v63, %v673_v0  ;;  %v773_v63 = vrot.slane %v768_v60, %v2377_v12  ;;  %v838_v0 = vunpack.c.l.bf16 %v837_v61 }
0x119e   :  { %677 = vrot.lane.b32.xlu1 %v675_v3, %s2288_s11 }
0x1210   :  { %v678_v5 = vpop.permute.xlu1 %677 }
0x1211   :  { %v680_v6 = vadd.f32 %v678_v5, %v161_v20  ;;  %v2290_v20 = vmov 1966171168  }
0x1212   :  { %v959_v59 = vunpack.c.l.s4 %v2290_v20 }
0x1213   :  { %2235 = vtanh.f32 %v680_v6 }
0x1214   :  { %v960_v62 = vunpack.c.0.s8 %v959_v59 }
0x1216   :  { %v963_v3 = vsub.s32 %v960_v62, %v2371_v9 }
0x121d   :  { %v2236_v16 = vpop.eup %2235 }
0x121e   :  { %684 = vrot.lane.b32.xlu0 %v2236_v16, %s2289_s2 }
0x1290   :  { %v685_v18 = vpop.permute.xlu0 %684 }
0x1291   :  { %v687_v19 = vmul.f32 %v685_v18, %v682_v17  ;;  %v846_v17 = vrot.slane %v838_v0, %v2377_v12  ;;  %v839_v18 = vld [vmem:[%s2790_s4 + $0x18] sm:$0x1] }
0x1293   :  { %v689_v21 = vadd.f32 %v688_v7, %v687_v19 }
0x1295   :  { %v690_v22 = vpack.c.bf16 %v689_v21, %v689_v21 }
0x1297   :  { %692 = vrot.lane.b32.xlu1 %v690_v22, %s2289_s2 }
0x1309   :  { %v693_v23 = vpop.permute.xlu1 %692 }
0x130a   :  { %2094 = vmatmul.mubr.msk.bf16.vlgmr.msra.gmra.mrb[16].mxu1 %vm89_vm1, %v693_v23  ;;  %v840_v23 = vunpack.c.l.bf16 %v839_v18 }
0x130b   :  { %2106 = vmatpush3.bf16.msra.mxu1 %v2173_v37  ;;  %2109 = vmatprep.mubr.msk.bf16.mxu1 %vm89_vm1, %v2512_v38 }
0x130c   :  { %2107 = vmatprep.subr.bf16.mxu1 %v2175_v11  ;;  %v1065_v37 = vrot.slane %v840_v23, %v2377_v12 }
0x130f   :  { %2108 = vmatpush3.bf16.msra.mxu1 %v2175_v11 }
0x1310   :  { %2133 = vmatprep.subr.bf16.mxu1 %v2285_v1 }
0x1312   :  { %2110 = vmatmul.mubr.msk.bf16.vlgmr.msra.gmra.mrb[20].mxu1 %vm89_vm1, %v2526_v2 }
0x1313   :  { %2113 = vmatprep.mubr.msk.bf16.mxu1 %vm89_vm1, %v2533_v41 }
0x131a   :  { %2114 = vmatmul.mubr.msk.bf16.gmra.mrb[24].mxu1 %vm89_vm1, %v2538_v42 }
0x131b   :  { %2141 = vmatprep.mubr.msk.bf16.mxu1 %vm2286_vm0, %v2285_v1 }
0x13dd   :  { %v731_v24 = vpop.f32.mrb[16].mxu1 }
0x13de   :  { %v732_v26 = vadd.f32 %v731_v24, %v2380_v13  ;;  %v2095_v27 = vpop.f32.mrb[17].mxu1 }
0x13df   :  { %v734_v28 = vpop.f32.mrb[18].mxu1 }
0x13e0   :  { %745 = vrot.lane.b32.xlu0 %v732_v26, %s2288_s11  ;;  %v2096_v29 = vpop.f32.mrb[19].mxu1  ;;  %v737_v10 = vadd.f32 %v732_v26, %v164_v30 }
0x13e2   :  { %v1940_v31 = vmul.f32 -1.442695, %v737_v10 }
0x13e4   :  { %2237 = vpow2.f32 %v1940_v31 }
0x13e5   :  { %v2111_v49 = vpop.f32.mrb[20].mxu1 }
0x13e6   :  { %v925_v14 = vpop.f32.mrb[21].mxu1  ;;  %v934_v29 = vadd.f32 %v2111_v49, %v846_v17 }
0x13e7   :  { %v2112_v50 = vpop.f32.mrb[22].mxu1  ;;  %v926_v28 = vadd.f32 %v925_v14, %v846_v17 }
0x13e8   :  { %v928_v51 = vpop.f32.mrb[23].mxu1 }
0x13e9   :  { %v929_v10 = vadd.f32 %v928_v51, %v846_v17 }
0x13ed   :  { %v2115_v52 = vpop.f32.mrb[24].mxu1 }
0x13ee   :  { %v2238_v32 = vpop.eup %2237  ;;  %v941_v53 = vpop.f32.mrb[25].mxu1 }
0x13ef   :  { %v741_v33 = vadd.f32 1.0, %v2238_v32  ;;  %v2116_v54 = vpop.f32.mrb[26].mxu1  ;;  %v942_v31 = vadd.f32 %v941_v53, %v846_v17 }
0x13f0   :  { %v944_v55 = vpop.f32.mrb[27].mxu1 }
0x13f1   :  { %2239 = vrcp.f32 %v741_v33 }
0x13fb   :  { %v2240_v34 = vpop.eup %2239 }
0x13fc   :  { %v755_v43 = vsub.f32 1.0, %v2240_v34  ;;  %v761_v4 = vmul.f32 %v2240_v34, %v689_v21 }
0x1452   :  { %v746_v35 = vpop.permute.xlu0 %745 }
0x1453   :  { %v748_v36 = vmul.f32 %v2240_v34, %v746_v35 }
0x1455   :  { %750 = vrot.lane.b32.xlu1 %v748_v36, %s2288_s11  ;;  %v950_v36 = vadd.f32 %v2115_v52, %v846_v17 }
0x14c7   :  { %v751_v13 = vpop.permute.xlu1 %750 }
0x14c8   :  { %v753_v15 = vadd.f32 %v751_v13, %v164_v30  ;;  %v937_v30 = vadd.f32 %v2112_v50, %v846_v17 }
0x14ca   :  { %2241 = vtanh.f32 %v753_v15  ;;  %v945_v15 = vadd.f32 %v944_v55, %v846_v17 }
0x14d4   :  { %v2242_v40 = vpop.eup %2241 }
0x14d5   :  { %757 = vrot.lane.b32.xlu0 %v2242_v40, %s2289_s2 }
0x1547   :  { %v758_v44 = vpop.permute.xlu0 %757 }
0x1548   :  { %v760_v45 = vmul.f32 %v758_v44, %v755_v43 }
0x154a   :  { %v762_v46 = vadd.f32 %v761_v4, %v760_v45  ;;  %v953_v4 = vadd.f32 %v2116_v54, %v846_v17 }
0x154c   :  { %v769_v47 = vpack.c.bf16 %v762_v46, %v762_v46 }
0x154e   :  { %775 = vrot.lane.b32.xlu1 %v769_v47, %s2289_s2 }
0x15c0   :  { %v776_v48 = vpop.permute.xlu1 %775 }
0x15c1   :  { %2102 = vmatmul.mubr.msk.bf16.vlgmr.msra.gmra.mrb[20].mxu0 %vm89_vm1, %v776_v48 }
0x15c2   :  { %2121 = vmatprep.mubr.msk.bf16.mxu0 %vm2286_vm0, %v2285_v1 }
0x1694   :  { %v826_v5 = vpop.f32.mrb[20].mxu0 }
0x1695   :  { %v2561_v6 = vadd.f32 %v826_v5, %v773_v63  ;;  %v2103_v16 = vpop.f32.mrb[21].mxu0 }
0x1696   :  { %v829_v7 = vpop.f32.mrb[22].mxu0 }
0x1697   :  { %v957_v19 = vcombine.high %v2561_v6, %v2561_v6  ;;  %v964_v21 = vrot.slane %v2561_v6, %v963_v3  ;;  %v2104_v22 = vpop.f32.mrb[23].mxu0 }
0x1699   :  { %v971_v24 = vrot.slane %v957_v19, %v963_v3  ;;  %v972_v26 = vcombine.high %v964_v21, %v964_v21  ;;  %v980_v27 = vrot.slane %v964_v21, %v963_v3 }
0x169b   :  { %v973_v32 = vcombine.high %v971_v24, %v971_v24  ;;  %v1002_v33 = vcombine.high %v980_v27, %v980_v27  ;;  %v1009_v34 = vrot.slane %v980_v27, %v2377_v12  ;;  %v994_v35 = vrot.slane %v972_v26, %v963_v3 }
0x169c   :  { %v987_v13 = vrot.slane %v971_v24, %v963_v3 }
0x169d   :  { %v1017_v25 = vrot.slane %v1002_v33, %v2377_v12  ;;  %v1046_v11 = vadd.f32 %v1009_v34, %v926_v28  ;;  %v1004_v39 = vcombine.high %v994_v35, %v994_v35  ;;  %v1013_v40 = vrot.slane %v994_v35, %v2377_v12 }
0x169e   :  { %v1003_v43 = vcombine.high %v987_v13, %v987_v13  ;;  %v1025_v44 = vrot.slane %v987_v13, %v2377_v12  ;;  %v1001_v45 = vrot.slane %v973_v32, %v963_v3 }
0x169f   :  { %v1048_v46 = vadd.f32 %v1017_v25, %v934_v29  ;;  %v1054_v47 = vmax.f32 %v1046_v11, 0.0  ;;  %v1021_v48 = vrot.slane %v1004_v39, %v2377_v12  ;;  %v1047_v49 = vadd.f32 %v1013_v40, %v929_v10 }
0x16a0   :  { %v1033_v14 = vrot.slane %v1003_v43, %v2377_v12  ;;  %v1050_v50 = vadd.f32 %v1025_v44, %v942_v31  ;;  %v1005_v51 = vcombine.high %v1001_v45, %v1001_v45  ;;  %v1029_v52 = vrot.slane %v1001_v45, %v2377_v12 }
0x16a1   :  { %v1056_v53 = vmax.f32 %v1048_v46, 0.0  ;;  %v1049_v55 = vadd.f32 %v1021_v48, %v937_v30  ;;  %v1055_v56 = vmax.f32 %v1047_v49, 0.0  ;;  %v1066_v57 = vmul.f32 %v1065_v37, %v1054_v47 }
0x16a2   :  { %v1052_v58 = vadd.f32 %v1033_v14, %v950_v36  ;;  %v1058_v20 = vmax.f32 %v1050_v50, 0.0  ;;  %v1037_v54 = vrot.slane %v1005_v51, %v2377_v12  ;;  %v1051_v59 = vadd.f32 %v1029_v52, %v945_v15 }
0x16a3   :  { %v1057_v60 = vmax.f32 %v1049_v55, 0.0  ;;  %v1074_v61 = vsel %vm89_vm1, %v1066_v57, 0.0  ;;  %v1067_v62 = vmul.f32 %v1065_v37, %v1055_v56  ;;  %v1068_v63 = vmul.f32 %v1065_v37, %v1056_v53 }
0x16a4   :  { %v1053_v0 = vadd.f32 %v1037_v54, %v953_v4  ;;  %1075 = vadd.xlane.f32.xlu0 %v1074_v61  ;;  %v1060_v3 = vmax.f32 %v1052_v58, 0.0  ;;  %v1070_v16 = vmul.f32 %v1065_v37, %v1058_v20  ;;  %v1059_v17 = vmax.f32 %v1051_v59, 0.0 }
0x16a5   :  { %v1077_v5 = vsel %vm89_vm1, %v1067_v62, 0.0  ;;  %v1080_v18 = vsel %vm89_vm1, %v1068_v63, 0.0  ;;  %v1069_v7 = vmul.f32 %v1065_v37, %v1057_v60  ;;  %v1119_v30 = vand.u32 127, %v53_v8 }
0x16a6   :  { %1078 = vadd.xlane.f32.xlu1 %v1077_v5  ;;  %v1086_v19 = vsel %vm89_vm1, %v1070_v16, 0.0  ;;  %v1072_v21 = vmul.f32 %v1065_v37, %v1060_v3  ;;  %v1061_v22 = vmax.f32 %v1053_v0, 0.0  ;;  %v1071_v24 = vmul.f32 %v1065_v37, %v1059_v17 }
0x16a7   :  { %v1083_v23 = vsel %vm89_vm1, %v1069_v7, 0.0  ;;  %v1100_v10 = vstv %s2154_s15  ;;  %v2589_v33 = vsub.s32 %v1119_v30, %v2371_v9  ;;  %v1178_v59 = vsub.s32 1, %v2371_v9 }
0x16a8   :  { %1081 = vadd.xlane.f32.xlu0 %v1080_v18  ;;  %v1092_v26 = vsel %vm89_vm1, %v1072_v21, 0.0  ;;  %v1089_v27 = vsel %vm89_vm1, %v1071_v24, 0.0  ;;  %v1073_v28 = vmul.f32 %v1065_v37, %v1061_v22  ;;  %v1182_v60 = vsub.s32 2, %v2371_v9 }
0x16a9   :  { %v1186_v61 = vsub.s32 3, %v2371_v9  ;;  %v1190_v17 = vsub.s32 4, %v2371_v9  ;;  %v1194_v22 = vsub.s32 5, %v2371_v9 }
0x16aa   :  { %1087 = vadd.xlane.f32.xlu1 %v1086_v19  ;;  %v1095_v29 = vsel %vm89_vm1, %v1073_v28, 0.0 }
0x16ac   :  { %1084 = vadd.xlane.f32.xlu0 %v1083_v23 }
0x16ae   :  { %1093 = vadd.xlane.f32.xlu1 %v1092_v26 }
0x16b0   :  { %1090 = vadd.xlane.f32.xlu0 %v1089_v27  ;;  %v1198_v27 = vsub.s32 6, %v2371_v9 }
0x16b4   :  { %1096 = vadd.xlane.f32.xlu0 %v1095_v29 }
0x1731   :  { %v1076_v31 = vpop.xlane.xlu0 %1075 }
0x1732   :  { %v1102_v34 = vadd.f32 %v1100_v10, %v1076_v31 }
0x1733   :  { %v1079_v32 = vpop.xlane.xlu1 %1078 }
0x1734   :  { %v1103_v35 = vadd.f32 %v1100_v10, %v1079_v32  ;;  %v1123_v25 = vrot.slane %v1102_v34, %v2589_v33 }
0x1735   :  { %v1082_v36 = vpop.xlane.xlu0 %1081 }
0x1736   :  { %v1127_v13 = vrot.slane %v1103_v35, %v2589_v33  ;;  %v1104_v15 = vadd.f32 %v1100_v10, %v1082_v36 }
0x1737   :  { %v1088_v37 = vpop.xlane.xlu1 %1087 }
0x1738   :  { %v1131_v11 = vrot.slane %v1104_v15, %v2589_v33  ;;  %v1153_v8 = vsel %vm1152_vm2, %v1127_v13, %v1123_v25  ;;  %v1106_v43 = vadd.f32 %v1100_v10, %v1088_v37 }
0x1739   :  { %v1085_v39 = vpop.xlane.xlu0 %1084 }
0x173a   :  { %v1105_v40 = vadd.f32 %v1100_v10, %v1085_v39  ;;  %v1155_v45 = vsel %vm1154_vm3, %v1131_v11, %v1153_v8  ;;  %v1139_v49 = vrot.slane %v1106_v43, %v2589_v33 }
0x173b   :  { %v1094_v4 = vpop.xlane.xlu1 %1093 }
0x173c   :  { %v1135_v44 = vrot.slane %v1105_v40, %v2589_v33  ;;  %v1108_v14 = vadd.f32 %v1100_v10, %v1094_v4 }
0x173d   :  { %v1091_v46 = vpop.xlane.xlu0 %1090 }
0x173e   :  { %v1157_v47 = vsel %vm1156_vm4, %v1135_v44, %v1155_v45  ;;  %v1107_v48 = vadd.f32 %v1100_v10, %v1091_v46  ;;  %v1147_v56 = vrot.slane %v1108_v14, %v2589_v33 }
0x173f   :  { %v1159_v52 = vsel %vm1158_vm5, %v1139_v49, %v1157_v47 }
0x1740   :  { %v1143_v50 = vrot.slane %v1107_v48, %v2589_v33 }
0x1741   :  { %v1097_v51 = vpop.xlane.xlu0 %1096 }
0x1742   :  { %v1109_v53 = vadd.f32 %v1100_v10, %v1097_v51  ;;  %v1161_v55 = vsel %vm1160_vm6, %v1143_v50, %v1159_v52  ;;  %v1202_v10 = vsub.s32 7, %v2371_v9  ;;  %v1361_v9 = vunpack.c.l.bf16 %v2512_v38 }
0x1743   :  { %v1163_v58 = vsel %vm1162_vm7, %v1147_v56, %v1161_v55 }
0x1744   :  { %v1151_v57 = vrot.slane %v1109_v53, %v2589_v33 }
0x1746   :  { %v1165_v20 = vsel %vm1164_vm8, %v1151_v57, %v1163_v58 }
0x1747   :  { %v1168_v54 = vsel %vm1167_vm9, %v1165_v20, -inf }
0x1748   :  { %1169 = vmax.xlane.f32.xlu1 %v1168_v54 }
0x17d5   :  { %v1170_v62 = vpop.xlane.xlu1 %1169 }
0x17d6   :  { %v1175_v63 = vrot.slane %v1170_v62, %v2377_v12  ;;  %v1179_v0 = vrot.slane %v1170_v62, %v1178_v59  ;;  %v1183_v3 = vrot.slane %v1170_v62, %v1182_v60  ;;  %v1187_v18 = vrot.slane %v1170_v62, %v1186_v61 }
0x17d7   :  { %v1191_v23 = vrot.slane %v1170_v62, %v1190_v17  ;;  %v1195_v28 = vrot.slane %v1170_v62, %v1194_v22  ;;  %v1199_v31 = vrot.slane %v1170_v62, %v1198_v27  ;;  %v1203_v13 = vrot.slane %v1170_v62, %v1202_v10 }
0x17d8   :  { %v1212_v5 = vsub.f32 %v1102_v34, %v1175_v63  ;;  %v1213_v16 = vsub.f32 %v1103_v35, %v1179_v0  ;;  %v1214_v7 = vsub.f32 %v1104_v15, %v1183_v3  ;;  %v1215_v24 = vsub.f32 %v1105_v40, %v1187_v18 }
0x17d9   :  { %v1216_v29 = vsub.f32 %v1106_v43, %v1191_v23  ;;  %v1217_v32 = vsub.f32 %v1107_v48, %v1195_v28  ;;  %v1218_v15 = vsub.f32 %v1108_v14, %v1199_v31  ;;  %v1219_v11 = vsub.f32 %v1109_v53, %v1203_v13 }
0x17da   :  { %v1220_v19 = vmul.f32 1.442695, %v1212_v5  ;;  %v1222_v21 = vmul.f32 1.442695, %v1213_v16  ;;  %v1224_v26 = vmul.f32 1.442695, %v1214_v7 }
0x17db   :  { %v1226_v30 = vmul.f32 1.442695, %v1215_v24  ;;  %v1228_v34 = vmul.f32 1.442695, %v1216_v29  ;;  %v1230_v37 = vmul.f32 1.442695, %v1217_v32 }
0x17dc   :  { %2243 = vpow2.f32 %v1220_v19  ;;  %v1232_v39 = vmul.f32 1.442695, %v1218_v15  ;;  %v1234_v40 = vmul.f32 1.442695, %v1219_v11  ;;  %v1363_v11 = vunpack.c.l.bf16 %v2526_v2 }
0x17dd   :  { %2245 = vpow2.f32 %v1222_v21 }
0x17de   :  { %2247 = vpow2.f32 %v1224_v26 }
0x17df   :  { %2249 = vpow2.f32 %v1226_v30 }
0x17e0   :  { %2251 = vpow2.f32 %v1228_v34 }
0x17e1   :  { %2253 = vpow2.f32 %v1230_v37 }
0x17e2   :  { %2255 = vpow2.f32 %v1232_v39 }
0x17e3   :  { %2257 = vpow2.f32 %v1234_v40 }
0x17e6   :  { %v2244_v35 = vpop.eup %2243 }
0x17e7   :  { %v2246_v36 = vpop.eup %2245  ;;  %1245 = vperm.xlu0 %2163, %v2244_v35  }
0x17e8   :  { %1248 = vperm.xlu1 %2164, %v2246_v36   ;;  %v2248_v25 = vpop.eup %2247 }
0x17e9   :  { %v2250_v8 = vpop.eup %2249 }
0x17ea   :  { %v2252_v43 = vpop.eup %2251 }
0x17eb   :  { %v2254_v44 = vpop.eup %2253 }
0x17ec   :  { %1251 = vperm.xlu1 %2164, %v2248_v25   ;;  %v2256_v4 = vpop.eup %2255 }
0x17ed   :  { %v2258_v45 = vpop.eup %2257 }
0x17f0   :  { %1254 = vperm.xlu1 %2164, %v2250_v8  }
0x17f4   :  { %1257 = vperm.xlu1 %2164, %v2252_v43  }
0x17f8   :  { %1260 = vperm.xlu1 %2164, %v2254_v44  }
0x17fc   :  { %1263 = vperm.xlu1 %2164, %v2256_v4  }
0x1800   :  { %1266 = vperm.xlu1 %2164, %v2258_v45  }
0x1866   :  { %v1246_v14 = vpop.permute.xlu0 %1245 }
0x1867   :  { %v1249_v46 = vpop.permute.xlu1 %1248  ;;  %v1271_v52 = vrot.slane %v1246_v14, %v2589_v33 }
0x1868   :  { %v1275_v51 = vrot.slane %v1249_v46, %v2589_v33 }
0x186a   :  { %v1300_v58 = vsel %vm1152_vm2, %v1275_v51, %v1271_v52 }
0x186b   :  { %v1252_v47 = vpop.permute.xlu1 %1251 }
0x186c   :  { %v1279_v53 = vrot.slane %v1252_v47, %v2589_v33 }
0x186e   :  { %v1301_v54 = vsel %vm1154_vm3, %v1279_v53, %v1300_v58  ;;  %v1365_v53 = vunpack.c.l.bf16 %v2533_v41  ;;  %v1366_v58 = vunpack.c.h.bf16 %v2533_v41 }
0x186f   :  { %v1255_v48 = vpop.permute.xlu1 %1254 }
0x1870   :  { %v1283_v55 = vrot.slane %v1255_v48, %v2589_v33  ;;  %v1364_v48 = vunpack.c.h.bf16 %v2526_v2 }
0x1872   :  { %v1302_v63 = vsel %vm1156_vm4, %v1283_v55, %v1301_v54 }
0x1873   :  { %v1258_v49 = vpop.permute.xlu1 %1257 }
0x1874   :  { %v1287_v56 = vrot.slane %v1258_v49, %v2589_v33 }
0x1876   :  { %v1303_v0 = vsel %vm1158_vm5, %v1287_v56, %v1302_v63 }
0x1877   :  { %v1261_v50 = vpop.permute.xlu1 %1260 }
0x1878   :  { %v1291_v20 = vrot.slane %v1261_v50, %v2589_v33 }
0x187a   :  { %v1304_v5 = vsel %vm1160_vm6, %v1291_v20, %v1303_v0  ;;  %v1508_v0 = vsel %vm89_vm1, %v1366_v58, 0.0 }
0x187b   :  { %v1264_v57 = vpop.permute.xlu1 %1263 }
0x187c   :  { %v1295_v62 = vrot.slane %v1264_v57, %v2589_v33  ;;  %v1501_v57 = vsel %vm89_vm1, %v1365_v53, 0.0 }
0x187e   :  { %v1305_v18 = vsel %vm1162_vm7, %v1295_v62, %v1304_v5  ;;  %v1502_v5 = vrot.slane %v1501_v57, 4 }
0x187f   :  { %v1267_v3 = vpop.permute.xlu1 %1266 }
0x1880   :  { %v1299_v16 = vrot.slane %v1267_v3, %v2589_v33 }
0x1882   :  { %v1306_v7 = vsel %vm1164_vm8, %v1299_v16, %v1305_v18 }
0x1883   :  { %v1308_v19 = vsel %vm1167_vm9, %v1306_v7, 0.0 }
0x1884   :  { %1309 = vadd.xlane.f32.xlu1 %v1308_v19 }
0x1911   :  { %v1310_v21 = vpop.xlane.xlu1 %1309 }
0x1912   :  { %2259 = vrcp.f32 %v1310_v21  ;;  %v1509_v21 = vrot.slane %v1508_v0, 4 }
0x191c   :  { %v2260_v23 = vpop.eup %2259 }
0x191d   :  { %v1316_v24 = vrot.slane %v2260_v23, %v2377_v12  ;;  %v1320_v28 = vrot.slane %v2260_v23, %v1178_v59  ;;  %v1324_v33 = vrot.slane %v2260_v23, %v1182_v60  ;;  %v1328_v31 = vrot.slane %v2260_v23, %v1186_v61 }
0x191e   :  { %v1332_v34 = vrot.slane %v2260_v23, %v1190_v17  ;;  %v1336_v59 = vrot.slane %v2260_v23, %v1194_v22  ;;  %v1340_v60 = vrot.slane %v2260_v23, %v1198_v27  ;;  %v1344_v61 = vrot.slane %v2260_v23, %v1202_v10  ;;  %v2181_v17 = vld [vmem:[%s2790_s4 + $0x28] sm:$0xff]   ;;  %v2182_v22 = vld [vmem:[%s2790_s4 + $0x30] sm:$0xff]  }
0x191f   :  { %v1353_v26 = vmul.f32 %v2244_v35, %v1316_v24  ;;  %v1354_v29 = vmul.f32 %v2246_v36, %v1320_v28  ;;  %v1355_v30 = vmul.f32 %v2248_v25, %v1324_v33  ;;  %v1356_v32 = vmul.f32 %v2250_v8, %v1328_v31  ;;  %2118 = vmatpush3.bf16.msra.mxu0 %v2181_v17 }
0x1920   :  { %v1357_v35 = vmul.f32 %v2252_v43, %v1332_v34  ;;  %v1358_v36 = vmul.f32 %v2254_v44, %v1336_v59  ;;  %v1359_v13 = vmul.f32 %v2256_v4, %v1340_v60  ;;  %v1360_v15 = vmul.f32 %v2258_v45, %v1344_v61  ;;  %2119 = vmatprep.subr.bf16.mxu0 %v2285_v1 }
0x1921   :  { %1371 = vperm.xlu0 %2163, %v1353_v26   ;;  %v1473_v27 = vsel %vm89_vm1, %v1361_v9, 0.0  ;;  %v1362_v10 = vunpack.c.h.bf16 %v2512_v38  ;;  %v1487_v8 = vsel %vm89_vm1, %v1363_v11, 0.0  ;;  %v1494_v38 = vsel %vm89_vm1, %v1364_v48, 0.0 }
0x1922   :  { %v1474_v37 = vrot.slane %v1473_v27, 4  ;;  %v1488_v43 = vrot.slane %v1487_v8, 4  ;;  %v1495_v52 = vrot.slane %v1494_v38, 4  ;;  %v1367_v23 = vunpack.c.l.bf16 %v2538_v42 }
0x1923   :  { %2120 = vmatpush3.bf16.msra.mxu0 %v2182_v22  ;;  %v1480_v25 = vsel %vm89_vm1, %v1362_v10, 0.0  ;;  %v1503_v31 = vadd.f32 %v1502_v5, %v1501_v57 }
0x1924   :  { %2125 = vmatprep.subr.bf16.mxu0 %v2285_v1  ;;  %v1481_v39 = vrot.slane %v1480_v25, 4  ;;  %v1475_v40 = vadd.f32 %v1474_v37, %v1473_v27  ;;  %v1489_v45 = vadd.f32 %v1488_v43, %v1487_v8  ;;  %v1496_v2 = vadd.f32 %v1495_v52, %v1494_v38 }
0x1925   :  { %1376 = vperm.xlu0 %2163, %v1354_v29   ;;  %v1368_v29 = vunpack.c.h.bf16 %v2538_v42  ;;  %v1504_v37 = vrot.slane %v1503_v31, 2 }
0x1926   :  { %v1482_v44 = vadd.f32 %v1481_v39, %v1480_v25  ;;  %v1476_v4 = vrot.slane %v1475_v40, 2  ;;  %v1490_v49 = vrot.slane %v1489_v45, 2  ;;  %v1497_v28 = vrot.slane %v1496_v2, 2 }
0x1927   :  { %v1522_v61 = vsel %vm89_vm1, %v1368_v29, 0.0 }
0x1928   :  { %v1483_v46 = vrot.slane %v1482_v44, 2  ;;  %v1477_v47 = vadd.f32 %v1476_v4, %v1475_v40  ;;  %v1491_v55 = vadd.f32 %v1490_v49, %v1489_v45  ;;  %v1498_v17 = vadd.f32 %v1497_v28, %v1496_v2 }
0x1929   :  { %1381 = vperm.xlu0 %2163, %v1355_v30   ;;  %v1523_v8 = vrot.slane %v1522_v61, 4 }
0x192a   :  { %v1484_v14 = vadd.f32 %v1483_v46, %v1482_v44  ;;  %v1478_v50 = vrot.slane %v1477_v47, 1  ;;  %v1492_v3 = vrot.slane %v1491_v55, 1  ;;  %v1499_v46 = vrot.slane %v1498_v17, 1 }
0x192c   :  { %v1485_v56 = vrot.slane %v1484_v14, 1  ;;  %v1479_v20 = vadd.f32 %v1478_v50, %v1477_v47  ;;  %v1493_v30 = vadd.f32 %v1492_v3, %v1491_v55  ;;  %v1505_v50 = vadd.f32 %v1504_v37, %v1503_v31 }
0x192d   :  { %1386 = vperm.xlu0 %2163, %v1356_v32   ;;  %v1515_v32 = vsel %vm89_vm1, %v1367_v23, 0.0  ;;  %v1500_v2 = vadd.f32 %v1499_v46, %v1498_v17 }
0x192e   :  { %v1486_v16 = vadd.f32 %v1485_v56, %v1484_v14  ;;  %v1530_v7 = vmul.f32 0.125, %v1479_v20  ;;  %v1524_v56 = vadd.f32 %v1523_v8, %v1522_v61 }
0x1930   :  { %v1531_v34 = vmul.f32 0.125, %v1486_v16  ;;  %v1506_v16 = vrot.slane %v1505_v50, 1 }
0x1931   :  { %1391 = vperm.xlu0 %2163, %v1357_v35  }
0x1932   :  { %v1643_v25 = vpack.c.bf16 %v1531_v34, %v1531_v34 }
0x1935   :  { %1396 = vperm.xlu0 %2163, %v1358_v36  }
0x1939   :  { %1401 = vperm.xlu0 %2163, %v1359_v13   ;;  %v1510_v13 = vadd.f32 %v1509_v21, %v1508_v0 }
0x193b   :  { %v1511_v4 = vrot.slane %v1510_v13, 2 }
0x193d   :  { %1406 = vperm.xlu0 %2163, %v1360_v15   ;;  %v1642_v15 = vpack.c.bf16 %v1530_v7, %v1530_v7 }
0x193f   :  { %v1662_v45 = vunpack.c.l.b16 %v1642_v15 }
0x19a0   :  { %v1372_v51 = vpop.permute.xlu0 %1371 }
0x19a1   :  { %v1409_v62 = vmul.f32 %v1372_v51, %v1361_v9  ;;  %v1516_v9 = vrot.slane %v1515_v32, 4  ;;  %v1663_v51 = vunpack.c.l.b16 %v1643_v25 }
0x19a3   :  { %v1417_v24 = vsel %vm89_vm1, %v1409_v62, 0.0  ;;  %v1517_v49 = vadd.f32 %v1516_v9, %v1515_v32  ;;  %v1512_v62 = vadd.f32 %v1511_v4, %v1510_v13  ;;  %v1670_v7 = vsel %vm1152_vm2, %v1663_v51, %v1662_v45 }
0x19a4   :  { %v1377_v54 = vpop.permute.xlu0 %1376  ;;  %v1418_v59 = vrot.slane %v1417_v24, 4  ;;  %v1533_v32 = vmul.f32 0.125, %v1500_v2 }
0x19a5   :  { %v1410_v63 = vmul.f32 %v1377_v54, %v1362_v10  ;;  %v1532_v10 = vmul.f32 0.125, %v1493_v30  ;;  %v1513_v30 = vrot.slane %v1512_v62, 1 }
0x19a6   :  { %v1419_v40 = vadd.f32 %v1418_v59, %v1417_v24  ;;  %v1525_v24 = vrot.slane %v1524_v56, 2 }
0x19a7   :  { %v1424_v18 = vsel %vm89_vm1, %v1410_v63, 0.0  ;;  %v1644_v14 = vpack.c.bf16 %v1532_v10, %v1532_v10 }
0x19a8   :  { %v1382_v19 = vpop.permute.xlu0 %1381  ;;  %v1425_v33 = vrot.slane %v1424_v18, 4  ;;  %v1420_v57 = vrot.slane %v1419_v40, 2  ;;  %v1526_v17 = vadd.f32 %v1525_v24, %v1524_v56 }
0x19a9   :  { %v1411_v26 = vmul.f32 %v1382_v19, %v1363_v11  ;;  %v1664_v5 = vunpack.c.l.b16 %v1644_v14 }
0x19aa   :  { %v1426_v27 = vadd.f32 %v1425_v33, %v1424_v18  ;;  %v1527_v46 = vrot.slane %v1526_v17, 1 }
0x19ab   :  { %v1431_v35 = vsel %vm89_vm1, %v1411_v26, 0.0  ;;  %v1421_v26 = vadd.f32 %v1420_v57, %v1419_v40  ;;  %v1671_v59 = vsel %vm1154_vm3, %v1664_v5, %v1670_v7  ;;  %v1645_v40 = vpack.c.bf16 %v1533_v32, %v1533_v32 }
0x19ac   :  { %v1432_v36 = vrot.slane %v1431_v35, 4  ;;  %v1387_v60 = vpop.permute.xlu0 %1386  ;;  %v1427_v38 = vrot.slane %v1426_v27, 2 }
0x19ad   :  { %v1412_v22 = vmul.f32 %v1387_v60, %v1364_v48  ;;  %v1665_v42 = vunpack.c.l.b16 %v1645_v40 }
0x19ae   :  { %v1433_v11 = vadd.f32 %v1432_v36, %v1431_v35  ;;  %v1428_v3 = vadd.f32 %v1427_v38, %v1426_v27  ;;  %v1507_v36 = vadd.f32 %v1506_v16, %v1505_v50  ;;  %v1514_v27 = vadd.f32 %v1513_v30, %v1512_v62 }
0x19af   :  { %v1438_v39 = vsel %vm89_vm1, %v1412_v22, 0.0  ;;  %v1422_v22 = vrot.slane %v1421_v26, 1 }
0x19b0   :  { %v1439_v43 = vrot.slane %v1438_v39, 4  ;;  %v1392_v44 = vpop.permute.xlu0 %1391  ;;  %v1434_v52 = vrot.slane %v1433_v11, 2  ;;  %v1429_v35 = vrot.slane %v1428_v3, 1  ;;  %v1535_v51 = vmul.f32 0.125, %v1514_v27 }
0x19b1   :  { %v1413_v47 = vmul.f32 %v1392_v44, %v1365_v53  ;;  %v1518_v53 = vrot.slane %v1517_v49, 2 }
0x19b2   :  { %v1440_v48 = vadd.f32 %v1439_v43, %v1438_v39  ;;  %v1435_v19 = vadd.f32 %v1434_v52, %v1433_v11  ;;  %v1430_v8 = vadd.f32 %v1429_v35, %v1428_v3  ;;  %v1534_v43 = vmul.f32 0.125, %v1507_v36 }
0x19b3   :  { %v1445_v55 = vsel %vm89_vm1, %v1413_v47, 0.0  ;;  %v1519_v41 = vadd.f32 %v1518_v53, %v1517_v49  ;;  %v1423_v49 = vadd.f32 %v1422_v22, %v1421_v26  ;;  %v1647_v16 = vpack.c.bf16 %v1535_v51, %v1535_v51  ;;  %v2185_v51 = vld [vmem:[%s2790_s4 + $0x58] sm:$0xff]  }
0x19b4   :  { %v1441_v20 = vrot.slane %v1440_v48, 2  ;;  %v1446_v54 = vrot.slane %v1445_v55, 4  ;;  %v1397_v63 = vpop.permute.xlu0 %1396  ;;  %v1436_v13 = vrot.slane %v1435_v19, 1  ;;  %v1551_v56 = vpack.c.bf16 %v1430_v8, %v1430_v8  ;;  %2134 = vmatpush3.bf16.msra.mxu1 %v2185_v51 }
0x19b5   :  { %v1414_v0 = vmul.f32 %v1397_v63, %v1366_v58  ;;  %v1520_v39 = vrot.slane %v1519_v41, 1  ;;  %v1528_v63 = vadd.f32 %v1527_v46, %v1526_v17  ;;  %v1550_v2 = vpack.c.bf16 %v1423_v49, %v1423_v49  ;;  %v1542_v49 = vld [vmem:[%s2790_s4 + $0x38] sm:$0x1]  ;;  %2135 = vmatprep.subr.bf16.mxu1 %v2285_v1 }
0x19b6   :  { %v1447_v18 = vadd.f32 %v1446_v54, %v1445_v55  ;;  %v1442_v28 = vadd.f32 %v1441_v20, %v1440_v48  ;;  %v1437_v4 = vadd.f32 %v1436_v13, %v1435_v19  ;;  %v1646_v54 = vpack.c.bf16 %v1534_v43, %v1534_v43  ;;  %v2183_v43 = vld [vmem:[%s2790_s4 + $0x40] sm:$0xff]  }
0x19b7   :  { %v1452_v21 = vsel %vm89_vm1, %v1414_v0, 0.0  ;;  %v1521_v55 = vadd.f32 %v1520_v39, %v1519_v41  ;;  %v1571_v7 = vunpack.c.l.b16 %v1551_v56  ;;  %v1537_v30 = vmul.f32 0.125, %v1528_v63 }
0x19b8   :  { %v1448_v33 = vrot.slane %v1447_v18, 2  ;;  %v1402_v31 = vpop.permute.xlu0 %1401  ;;  %v1453_v34 = vrot.slane %v1452_v21, 4  ;;  %v1443_v9 = vrot.slane %v1442_v28, 1  ;;  %v1552_v20 = vpack.c.bf16 %v1437_v4, %v1437_v4 }
0x19b9   :  { %v1415_v58 = vmul.f32 %v1402_v31, %v1367_v23  ;;  %v1570_v31 = vunpack.c.l.b16 %v1550_v2 }
0x19ba   :  { %v1449_v60 = vadd.f32 %v1448_v33, %v1447_v18  ;;  %v1454_v61 = vadd.f32 %v1453_v34, %v1452_v21  ;;  %v1444_v38 = vadd.f32 %v1443_v9, %v1442_v28  ;;  %v1536_v18 = vmul.f32 0.125, %v1521_v55 }
0x19bb   :  { %v1459_v15 = vsel %vm89_vm1, %v1415_v58, 0.0  ;;  %v1572_v26 = vunpack.c.l.b16 %v1552_v20  ;;  %v1672_v28 = vsel %vm1156_vm4, %v1665_v42, %v1671_v59  ;;  %v1666_v33 = vunpack.c.l.b16 %v1646_v54 }
0x19bc   :  { %v1460_v10 = vrot.slane %v1459_v15, 4  ;;  %v1407_v37 = vpop.permute.xlu0 %1406  ;;  %v1450_v25 = vrot.slane %v1449_v60, 1  ;;  %v1455_v11 = vrot.slane %v1454_v61, 2  ;;  %v1553_v0 = vpack.c.bf16 %v1444_v38, %v1444_v38 }
0x19bd   :  { %v1416_v23 = vmul.f32 %v1407_v37, %v1368_v29  ;;  %v1648_v35 = vpack.c.bf16 %v1536_v18, %v1536_v18  ;;  %v1578_v36 = vsel %vm1152_vm2, %v1571_v7, %v1570_v31  ;;  %v1673_v17 = vsel %vm1158_vm5, %v1666_v33, %v1672_v28  ;;  %v2189_v18 = vld [vmem:[%s2791_s5] sm:$0xff]   ;;  %v2190_v31 = vld [vmem:[%s2791_s5 + $0x8] sm:$0xff]  }
0x19be   :  { %v1461_v44 = vadd.f32 %v1460_v10, %v1459_v15  ;;  %v1456_v45 = vadd.f32 %v1455_v11, %v1454_v61  ;;  %v1451_v50 = vadd.f32 %v1450_v25, %v1449_v60  ;;  %v1573_v32 = vunpack.c.l.b16 %v1553_v0 }
0x19bf   :  { %v1466_v47 = vsel %vm89_vm1, %v1416_v23, 0.0  ;;  %v1667_v60 = vunpack.c.l.b16 %v1647_v16  ;;  %v1579_v15 = vsel %vm1154_vm3, %v1572_v26, %v1578_v36  ;;  %v1649_v9 = vpack.c.bf16 %v1537_v30, %v1537_v30 }
0x19c0   :  { %v1462_v14 = vrot.slane %v1461_v44, 2  ;;  %v1467_v48 = vrot.slane %v1466_v47, 4  ;;  %v1457_v52 = vrot.slane %v1456_v45, 1  ;;  %v1554_v5 = vpack.c.bf16 %v1451_v50, %v1451_v50 }
0x19c1   :  { %v1580_v59 = vsel %vm1156_vm4, %v1573_v32, %v1579_v15  ;;  %v1668_v37 = vunpack.c.l.b16 %v1648_v35  ;;  %v1674_v25 = vsel %vm1160_vm6, %v1667_v60, %v1673_v17  ;;  %v1669_v8 = vunpack.c.l.b16 %v1649_v9 }
0x19c2   :  { %v1463_v29 = vadd.f32 %v1462_v14, %v1461_v44  ;;  %v1468_v57 = vadd.f32 %v1467_v48, %v1466_v47  ;;  %v1458_v62 = vadd.f32 %v1457_v52, %v1456_v45  ;;  %v1574_v58 = vunpack.c.l.b16 %v1554_v5  ;;  %v2184_v45 = vld [vmem:[%s2790_s4 + $0x48] sm:$0xff]   ;;  %v1548_v48 = vld [vmem:[%s2790_s4 + $0x50] sm:$0x1] }
0x19c3   :  { %v1675_v4 = vsel %vm1162_vm7, %v1668_v37, %v1674_v25  ;;  %v1543_v38 = vunpack.c.l.bf16 %v1542_v49  ;;  %v1549_v56 = vunpack.c.l.bf16 %v1548_v48  ;;  %v832_v7 = vmax.f32 %v2561_v6, 0.0 }
0x19c4   :  { %v1464_v53 = vrot.slane %v1463_v29, 1  ;;  %v1469_v3 = vrot.slane %v1468_v57, 2  ;;  %v1555_v19 = vpack.c.bf16 %v1458_v62, %v1458_v62  ;;  %v1581_v10 = vsel %vm1158_vm5, %v1574_v58, %v1580_v59  ;;  %v2187_v62 = vld [vmem:[%s2790_s4 + $0x68] sm:$0xff]  }
0x19c5   :  { %v1676_v46 = vsel %vm1164_vm8, %v1669_v8, %v1675_v4  ;;  %v1561_v14 = vrot.slane %v1543_v38, %v2377_v12  ;;  %v1653_v54 = vrot.slane %v1549_v56, %v2377_v12 }
0x19c6   :  { %v1465_v21 = vadd.f32 %v1464_v53, %v1463_v29  ;;  %v1470_v24 = vadd.f32 %v1469_v3, %v1468_v57  ;;  %v1575_v13 = vunpack.c.l.b16 %v1555_v19  ;;  %v1677_v47 = vpack.c.b16 %v1676_v46, %v1676_v46  ;;  %v2186_v29 = vld [vmem:[%s2790_s4 + $0x60] sm:$0xff]   ;;  %v2188_v3 = vld [vmem:[%s2790_s4 + $0x70] sm:$0xff]  }
0x19c7   :  { %2136 = vmatpush3.bf16.msra.mxu1 %v2186_v29 }
0x19c8   :  { %v1556_v34 = vpack.c.bf16 %v1465_v21, %v1465_v21  ;;  %v1471_v41 = vrot.slane %v1470_v24, 1  ;;  %v1582_v11 = vsel %vm1160_vm6, %v1575_v13, %v1581_v10  ;;  %2137 = vmatprep.subr.bf16.mxu1 %v2285_v1 }
0x19ca   :  { %v1472_v61 = vadd.f32 %v1471_v41, %v1470_v24  ;;  %v1576_v22 = vunpack.c.l.b16 %v1556_v34 }
0x19cb   :  { %2138 = vmatpush3.bf16.msra.mxu1 %v2187_v62 }
0x19cc   :  { %v1557_v27 = vpack.c.bf16 %v1472_v61, %v1472_v61  ;;  %v1583_v23 = vsel %vm1162_vm7, %v1576_v22, %v1582_v11  ;;  %2139 = vmatprep.subr.bf16.mxu1 %v2285_v1  ;;  %v1837_v61 = vld [vmem:[%s2791_s5 + $0x10] sm:$0x1] }
0x19cd   :  { %v1838_v15 = vunpack.c.l.bf16 %v1837_v61 }
0x19ce   :  { %v1577_v39 = vunpack.c.l.b16 %v1557_v27 }
0x19cf   :  { %2140 = vmatpush3.bf16.msra.mxu1 %v2188_v3  ;;  %v1843_v17 = vrot.slane %v1838_v15, %v2377_v12 }
0x19d0   :  { %v1584_v40 = vsel %vm1164_vm8, %v1577_v39, %v1583_v23 }
0x19d1   :  { %v1585_v44 = vpack.c.b16 %v1584_v40, %v1584_v40 }
0x19d3   :  { %2122 = vmatmul.mubr.msk.bf16.vlgmr.msra.gmra.mrb[24].mxu0 %vm89_vm1, %v1585_v44 }
0x19d4   :  { %2126 = vmatpush3.bf16.msra.mxu0 %v2183_v43  ;;  %2129 = vmatprep.mubr.msk.bf16.mxu0 %vm2286_vm0, %v2285_v1 }
0x19d5   :  { %2127 = vmatprep.subr.bf16.mxu0 %v2285_v1 }
0x19d8   :  { %2128 = vmatpush3.bf16.msra.mxu0 %v2184_v45 }
0x19d9   :  { %2145 = vmatprep.subr.bf16.mxu0 %v2285_v1 }
0x19db   :  { %2130 = vmatmul.mubr.msk.bf16.vlgmr.msra.gmra.mrb[28].mxu0 %vm89_vm1, %v1677_v47 }
0x19dc   :  { %2149 = vmatprep.mubr.msk.bf16.mxu0 %vm2286_vm0, %v2285_v1  ;;  %2146 = vmatpush3.bf16.msra.mxu0 %v2189_v18 }
0x19dd   :  { %2147 = vmatprep.subr.bf16.mxu0 %v2285_v1  ;;  %v1752_v1 = vld [vmem:[%s2790_s4 + $0x78] sm:$0x1]  ;;  %s2292_s4 = smov [#allocation2]  }
0x19de   :  { %v1753_v6 = vunpack.c.l.bf16 %v1752_v1  ;;  %s1906_s17 = sshll.u32 %s2292_s4, 4  ;;  %s1907_s17 = int_to_ptr.vmem [resolvable:$true] %s1906_s17 }
0x19df   :  { %s2261_s1 = scalar_lea.vmem %s1907_s17, 128  ;;  %p2266_p1 = scmp.lt.s32.totalorder %s1907_s17, %s1907_s17 }
0x19e0   :  { %2148 = vmatpush3.bf16.msra.mxu0 %v2190_v31  ;;  %v1763_v32 = vrot.slane %v1753_v6, %v2377_v12  ;;  %p2262_p0 = scmp.ne.s32.totalorder %s1907_s17, %s2261_s1  ;;  %p2267_p2 = scmp.lt.s32.totalorder %s2261_s1, %s2261_s1 }
0x19e2   :  { %p2268_p3 = por %p2267_p2, %p2266_p1 }
0x19e4   :  { %p2269_p4 = pnand %p2268_p3, %p2262_p0 }
0x1aa6   :  { %v1635_v50 = vpop.f32.mrb[24].mxu0 }
0x1aa7   :  { %v1636_v52 = vadd.f32 %v1635_v50, %v1561_v14  ;;  %v2123_v55 = vpop.f32.mrb[25].mxu0 }
0x1aa8   :  { %v1638_v42 = vpop.f32.mrb[26].mxu0 }
0x1aa9   :  { %v1641_v57 = vmax.f32 %v1636_v52, 0.0  ;;  %v2124_v20 = vpop.f32.mrb[27].mxu0 }
0x1aab   :  { %1735 = vrot.lane.b32.xlu0 %v1641_v57, %s2291_s7 }
0x1aae   :  { %v1727_v63 = vpop.f32.mrb[28].mxu0 }
0x1aaf   :  { %v1728_v2 = vadd.f32 %v1727_v63, %v1653_v54  ;;  %v2131_v0 = vpop.f32.mrb[29].mxu0 }
0x1ab0   :  { %v1730_v53 = vpop.f32.mrb[30].mxu0 }
0x1ab1   :  { %v1733_v5 = vmax.f32 %v1728_v2, 0.0  ;;  %v2132_v16 = vpop.f32.mrb[31].mxu0 }
0x1ab3   :  { %1740 = vrot.lane.b32.xlu1 %v1733_v5, %s2291_s7 }
0x1b1d   :  { %v1736_v19 = vpop.permute.xlu0 %1735 }
0x1b1e   :  { %v1738_v21 = vmul.f32 %v1736_v19, %v832_v7 }
0x1b20   :  { %1755 = vrot.lane.b32.xlu0 %v1738_v21, %s2289_s2 }
0x1b25   :  { %v1741_v24 = vpop.permute.xlu1 %1740 }
0x1b26   :  { %v1743_v26 = vmul.f32 %v1741_v24, %v832_v7 }
0x1b92   :  { %v1756_v28 = vpop.permute.xlu0 %1755 }
0x1b93   :  { %v1758_v33 = vsel %vm89_vm1, %v1756_v28, %v1743_v26 }
0x1b94   :  { %v1759_v30 = vpack.c.bf16 %v1758_v33, %v1758_v33 }
0x1b96   :  { %2142 = vmatmul.mubr.msk.bf16.vlgmr.msra.gmra.mrb[28].mxu1 %vm1788_vm10, %v1759_v30 }
0x1c69   :  { %v1826_v34 = vpop.f32.mrb[28].mxu1 }
0x1c6a   :  { %v1827_v41 = vadd.f32 %v1826_v34, %v1763_v32  ;;  %v2143_v58 = vpop.f32.mrb[29].mxu1 }
0x1c6b   :  { %v1829_v35 = vpop.f32.mrb[30].mxu1 }
0x1c6c   :  { %v1832_v36 = vmax.f32 %v1827_v41, 0.0  ;;  %v2144_v60 = vpop.f32.mrb[31].mxu1 }
0x1c6e   :  { %v1839_v13 = vpack.c.bf16 %v1832_v36, %v1832_v36 }
0x1c70   :  { %2150 = vmatmul.mubr.msk.bf16.vlgmr.msra.gmra.mrb[32].mxu0 %vm89_vm1, %v1839_v13 }
0x1d43   :  { %v1893_v22 = vpop.f32.mrb[32].mxu0 }
0x1d44   :  { %v1894_v59 = vadd.f32 %v1893_v22, %v1843_v17  ;;  %v2151_v9 = vpop.f32.mrb[33].mxu0 }
0x1d45   :  { %v1896_v27 = vpop.f32.mrb[34].mxu0 }
0x1d46   :  { %1899 = vst [vmem:[#allocation2] sm:$0xff] %v1894_v59  ;;  %v2152_v10 = vpop.f32.mrb[35].mxu0 }
0x1d47   :  { %2272 = shalt.err (!%p2269_p4)
}
0x1d48   :  { %s2273_s19 = scalar_lea.hbm %s2792_s6, 128 }
0x1d49   :  { %p2274_p5 = scmp.ne.s32.totalorder %s2792_s6, %s2273_s19  ;;  %p2277_p6 = scmp.lt.u32.totalorder %s2273_s19, %s2792_s6 }
0x1d4b   :  { %p2279_p7 = pnand %p2277_p6, %p2274_p5 }
0x1d4d   :  { %2282 = shalt.err (!%p2279_p7)
}
0x1d4e   :  { %1909 = dma.vmem_to_hbm [thread:$0]  %s1907_s17, 128, %s2792_s6, [#allocation3]  }
0x1d4f   :  { %2283 = dma.done.wait [#allocation3], 128  }
0x1d50   :  { %2284 = vsyncadd [#allocation3], 4294967168 }
0x1d51   :  { %1913 = vsyncpa [#allocation3], 1 }

// kernel: tpu_custom_call.1
= control target key start
LH: loop header
LB: loop body
LE: loop exit
PB: predicated region body
PF: predicated region fallthrough
CT: control target
= control target key end

     0   :  { %v2285_v1 = vmov 0.0   ;;  %vm2286_vm0 = vmmov 0   ;;  %vm89_vm1 = vcmask 261120   ;;  %v2287_v6 = vmov 0   ;;  %s2786_s0 = inlined_call_operand.vmem [shape: bf16[8,8,32], index: 0, kind: input, shape index: {}]   ;;  %s2787_s1 = inlined_call_operand.vmem [shape: bf16[8,8,32], index: 1, kind: input, shape index: {}]   ;;  %s2788_s2 = inlined_call_operand.vmem [shape: bf16[96,96], index: 2, kind: input, shape index: {}]   ;;  %s2789_s3 = inlined_call_operand.vmem [shape: bf16[48,64], index: 3, kind: input, shape index: {}]   ;;  %s2790_s4 = inlined_call_operand.vmem [shape: bf16[256,32], index: 4, kind: input, shape index: {}]   ;;  %s2791_s5 = inlined_call_operand.vmem [shape: bf16[48,128], index: 5, kind: input, shape index: {}]   ;;  %s2792_s6 = inlined_call_operand.hbm [shape: f32[8,128], index: 6, kind: output, shape index: {}]  }
   0x1   :  { %v2165_v0 = vld [vmem:[%s2788_s2] sm:$0xff]   ;;  %2033 = vmatprep.subr.bf16.mxu1 %v2285_v1  ;;  %v2335_v2 = vld [vmem:[%s2788_s2 + $0x10] sm:$0xff]   ;;  %v2167_v3 = vld [vmem:[%s2788_s2 + $0x8] sm:$0xff]   ;;  %2037 = vmatprep.mubr.msk.bf16.mxu1 %vm2286_vm0, %v2285_v1 }
   0x2   :  { %2021 = vmatprep.subr.bf16.mxu0 %v2165_v0  ;;  %2034 = vmatpush3.bf16.msra.mxu1 %v2335_v2  ;;  %v2346_v4 = vld [vmem:[%s2788_s2 + $0x18] sm:$0xff]   ;;  %v2169_v5 = vld [vmem:[%s2787_s1] sm:$0xff]   ;;  %v2170_v7 = vld [vmem:[%s2787_s1 + $0x8] sm:$0xff]  }
   0x3   :  { %2022 = vmatpush3.bf16.msra.mxu0 %v2165_v0  ;;  %2035 = vmatprep.subr.bf16.mxu1 %v2285_v1 }
   0x4   :  { %2023 = vmatprep.subr.bf16.mxu0 %v2167_v3  ;;  %2164 = vset.pattern.permute.xlu1 %v2287_v6 }
   0x5   :  { %2163 = vset.pattern.permute.xlu0 %v2287_v6  ;;  %2025 = vmatprep.mubr.msk.bf16.mxu0 %vm89_vm1, %v2169_v5 }
   0x6   :  { %2036 = vmatpush3.bf16.msra.mxu1 %v2346_v4 }
   0x7   :  { %2024 = vmatpush3.bf16.msra.mxu0 %v2167_v3  ;;  %2041 = vmatprep.subr.bf16.mxu1 %v2285_v1 }
   0x8   :  { %2049 = vmatprep.subr.bf16.mxu0 %v2285_v1 }
   0x9   :  { %2038 = vmatmul.mubr.bf16.vlgmr.msra.gmra.mrb[0].mxu1 %v2287_v6 }
   0xa   :  { %2026 = vmatmul.mubr.msk.bf16.vlgmr.msra.gmra.mrb[0].mxu0 %vm89_vm1, %v2170_v7  ;;  %2042 = vmatpush3.bf16.msra.mxu1 %v2335_v2 }
   0xb   :  { %2045 = vmatprep.mubr.msk.bf16.mxu1 %vm2286_vm0, %v2285_v1  ;;  %2043 = vmatprep.subr.bf16.mxu1 %v2285_v1 }
   0xc   :  { %2050 = vmatpush3.bf16.msra.mxu0 %v2335_v2 }
   0xd   :  { %2051 = vmatprep.subr.bf16.mxu0 %v2285_v1 }
   0xe   :  { %2044 = vmatpush3.bf16.msra.mxu1 %v2346_v4 }
   0xf   :  { %2057 = vmatprep.subr.bf16.mxu1 %v2285_v1 }
  0x10   :  { %2052 = vmatpush3.bf16.msra.mxu0 %v2346_v4 }
  0x11   :  { %2065 = vmatprep.subr.bf16.mxu0 %v2285_v1 }
  0x12   :  { %11 = vsyncpa [#allocation3], 0  ;;  %v53_v8 = vlaneseq  ;;  %v51_v10 = vld [vmem:[%s2788_s2 + $0x28] sm:$0x1]  ;;  %s2288_s11 = smov 64   ;;  %v2171_v59 = vld [vmem:[%s2787_s1 + $0x10] sm:$0xff]  }
  0x13   :  { %v52_v11 = vunpack.c.l.bf16 %v51_v10  ;;  %v49_v23 = vld [vmem:[%s2788_s2 + $0x20] sm:$0x1]  ;;  %s2289_s2 = smov 96   ;;  %v2172_v60 = vld [vmem:[%s2787_s1 + $0x18] sm:$0xff]   ;;  %2029 = vmatprep.mubr.msk.bf16.mxu0 %vm89_vm1, %v2171_v59  ;;  %vm1152_vm2 = vcmask 1041409   ;;  %vm1154_vm3 = vcmask 1042434  }
  0x14   :  { %v2371_v9 = vshrl.u32 %v53_v8, 7  ;;  %v50_v24 = vunpack.c.l.bf16 %v49_v23  ;;  %2030 = vmatmul.mubr.msk.bf16.gmra.mrb[4].mxu0 %vm89_vm1, %v2172_v60  ;;  %vm1156_vm4 = vcmask 1043459   ;;  %vm1158_vm5 = vcmask 1044484   ;;  %s2291_s7 = smov 32  }
  0x15   :  { %2053 = vmatprep.mubr.msk.bf16.mxu0 %vm2286_vm0, %v2285_v1  ;;  %vm1160_vm6 = vcmask 1045509   ;;  %vm1162_vm7 = vcmask 1046534   ;;  %vm1164_vm8 = vcmask 1047559   ;;  %vm1167_vm9 = vcmask 64512  }
  0x16   :  { %v2377_v12 = vsub.s32 0, %v2371_v9  ;;  %vm1788_vm10 = vcmask 523264  }
  0x18   :  { %v2380_v13 = vrot.slane %v52_v11, %v2377_v12  ;;  %v2392_v25 = vrot.slane %v50_v24, %v2377_v12 }
  0xdc   :  { %v220_v14 = vpop.f32.mrb[0].mxu1 }
  0xdd   :  { %v2382_v15 = vpop.f32.mrb[0].mxu0  ;;  %v221_v16 = vadd.f32 %v220_v14, %v2380_v13  ;;  %v2039_v17 = vpop.f32.mrb[1].mxu1 }
  0xde   :  { %v136_v18 = vpop.f32.mrb[1].mxu0  ;;  %v223_v19 = vpop.f32.mrb[2].mxu1  ;;  %v145_v23 = vadd.f32 %v2382_v15, %v2392_v25 }
  0xdf   :  { %v2385_v20 = vpop.f32.mrb[2].mxu0  ;;  %234 = vrot.lane.b32.xlu0 %v221_v16, %s2288_s11  ;;  %v2040_v21 = vpop.f32.mrb[3].mxu1  ;;  %v137_v26 = vadd.f32 %v136_v18, %v2392_v25 }
  0xe0   :  { %v139_v22 = vpop.f32.mrb[3].mxu0 }
  0xe1   :  { %v226_v27 = vadd.f32 %v221_v16, %v137_v26  ;;  %v140_v49 = vadd.f32 %v139_v22, %v2392_v25 }
  0xe3   :  { %v1926_v28 = vmul.f32 -1.442695, %v226_v27 }
  0xe5   :  { %2195 = vpow2.f32 %v1926_v28 }
  0xe7   :  { %v2421_v7 = vpop.f32.mrb[4].mxu0 }
  0xe8   :  { %v2423_v10 = vpop.f32.mrb[5].mxu0 }
  0xe9   :  { %v2425_v11 = vpop.f32.mrb[6].mxu0 }
  0xea   :  { %v2427_v14 = vpop.f32.mrb[7].mxu0 }
  0xef   :  { %v2196_v29 = vpop.eup %2195 }
  0xf0   :  { %v230_v30 = vadd.f32 1.0, %v2196_v29 }
  0xf2   :  { %2197 = vrcp.f32 %v230_v30 }
  0xfc   :  { %v2198_v31 = vpop.eup %2197 }
  0xfd   :  { %v244_v37 = vsub.f32 1.0, %v2198_v31  ;;  %v250_v39 = vmul.f32 0.0, %v2198_v31 }
 0x151   :  { %v235_v32 = vpop.permute.xlu0 %234 }
 0x152   :  { %v237_v33 = vmul.f32 %v2198_v31, %v235_v32 }
 0x154   :  { %239 = vrot.lane.b32.xlu0 %v237_v33, %s2288_s11 }
 0x1c6   :  { %v240_v34 = vpop.permute.xlu0 %239 }
 0x1c7   :  { %v242_v35 = vadd.f32 %v240_v34, %v137_v26 }
 0x1c9   :  { %2199 = vtanh.f32 %v242_v35 }
 0x1d3   :  { %v2200_v36 = vpop.eup %2199 }
 0x1d4   :  { %246 = vrot.lane.b32.xlu1 %v2200_v36, %s2289_s2 }
 0x246   :  { %v247_v38 = vpop.permute.xlu1 %246 }
 0x247   :  { %v249_v40 = vmul.f32 %v247_v38, %v244_v37 }
 0x249   :  { %v251_v41 = vadd.f32 %v250_v39, %v249_v40 }
 0x24b   :  { %v252_v42 = vpack.c.bf16 %v251_v41, %v251_v41 }
 0x24d   :  { %254 = vrot.lane.b32.xlu1 %v252_v42, %s2289_s2 }
 0x2bf   :  { %v255_v43 = vpop.permute.xlu1 %254 }
 0x2c0   :  { %2046 = vmatmul.mubr.msk.bf16.vlgmr.msra.gmra.mrb[4].mxu1 %vm89_vm1, %v255_v43 }
 0x2c1   :  { %2058 = vmatpush3.bf16.msra.mxu1 %v2335_v2  ;;  %2061 = vmatprep.mubr.msk.bf16.mxu1 %vm2286_vm0, %v2285_v1 }
 0x2c2   :  { %2059 = vmatprep.subr.bf16.mxu1 %v2285_v1 }
 0x2c5   :  { %2060 = vmatpush3.bf16.msra.mxu1 %v2346_v4 }
 0x2c6   :  { %2073 = vmatprep.subr.bf16.mxu1 %v2285_v1 }
 0x393   :  { %v293_v44 = vpop.f32.mrb[4].mxu1 }
 0x394   :  { %v294_v45 = vadd.f32 %v293_v44, %v2380_v13  ;;  %v2047_v46 = vpop.f32.mrb[5].mxu1 }
 0x395   :  { %v296_v47 = vpop.f32.mrb[6].mxu1  ;;  %v148_v46 = vadd.f32 %v2385_v20, %v2392_v25 }
 0x396   :  { %307 = vrot.lane.b32.xlu0 %v294_v45, %s2288_s11  ;;  %v2048_v48 = vpop.f32.mrb[7].mxu1  ;;  %v299_v50 = vadd.f32 %v294_v45, %v140_v49 }
 0x398   :  { %v1928_v51 = vmul.f32 -1.442695, %v299_v50 }
 0x39a   :  { %2201 = vpow2.f32 %v1928_v51 }
 0x3a4   :  { %v2202_v52 = vpop.eup %2201 }
 0x3a5   :  { %v303_v53 = vadd.f32 1.0, %v2202_v52 }
 0x3a7   :  { %2203 = vrcp.f32 %v303_v53 }
 0x3b1   :  { %v2204_v54 = vpop.eup %2203 }
 0x3b2   :  { %v317_v62 = vsub.f32 1.0, %v2204_v54  ;;  %v323_v0 = vmul.f32 %v2204_v54, %v251_v41 }
 0x408   :  { %v308_v55 = vpop.permute.xlu0 %307 }
 0x409   :  { %v310_v56 = vmul.f32 %v2204_v54, %v308_v55 }
 0x40b   :  { %312 = vrot.lane.b32.xlu1 %v310_v56, %s2288_s11 }
 0x47d   :  { %v313_v57 = vpop.permute.xlu1 %312 }
 0x47e   :  { %v315_v58 = vadd.f32 %v313_v57, %v140_v49 }
 0x480   :  { %2205 = vtanh.f32 %v315_v58 }
 0x48a   :  { %v2206_v61 = vpop.eup %2205 }
 0x48b   :  { %319 = vrot.lane.b32.xlu0 %v2206_v61, %s2289_s2 }
 0x4fd   :  { %v320_v63 = vpop.permute.xlu0 %319 }
 0x4fe   :  { %v322_v3 = vmul.f32 %v320_v63, %v317_v62 }
 0x500   :  { %v324_v5 = vadd.f32 %v323_v0, %v322_v3 }
 0x502   :  { %v325_v6 = vpack.c.bf16 %v324_v5, %v324_v5 }
 0x504   :  { %327 = vrot.lane.b32.xlu1 %v325_v6, %s2289_s2 }
 0x576   :  { %v328_v16 = vpop.permute.xlu1 %327 }
 0x577   :  { %2054 = vmatmul.mubr.msk.bf16.vlgmr.msra.gmra.mrb[8].mxu0 %vm89_vm1, %v328_v16  ;;  %v153_v16 = vadd.f32 %v2423_v10, %v2392_v25 }
 0x578   :  { %2066 = vmatpush3.bf16.msra.mxu0 %v2335_v2  ;;  %2069 = vmatprep.mubr.msk.bf16.mxu0 %vm2286_vm0, %v2285_v1 }
 0x579   :  { %2067 = vmatprep.subr.bf16.mxu0 %v2285_v1 }
 0x57c   :  { %2068 = vmatpush3.bf16.msra.mxu0 %v2346_v4 }
 0x57d   :  { %2081 = vmatprep.subr.bf16.mxu0 %v2285_v1 }
 0x64a   :  { %v366_v17 = vpop.f32.mrb[8].mxu0 }
 0x64b   :  { %v367_v18 = vadd.f32 %v366_v17, %v2380_v13  ;;  %v2055_v19 = vpop.f32.mrb[9].mxu0 }
 0x64c   :  { %v369_v21 = vpop.f32.mrb[10].mxu0 }
 0x64d   :  { %380 = vrot.lane.b32.xlu0 %v367_v18, %s2288_s11  ;;  %v2056_v22 = vpop.f32.mrb[11].mxu0  ;;  %v372_v24 = vadd.f32 %v367_v18, %v145_v23 }
 0x64f   :  { %v1930_v26 = vmul.f32 -1.442695, %v372_v24 }
 0x651   :  { %2207 = vpow2.f32 %v1930_v26 }
 0x65b   :  { %v2208_v27 = vpop.eup %2207 }
 0x65c   :  { %v376_v28 = vadd.f32 1.0, %v2208_v27 }
 0x65e   :  { %2209 = vrcp.f32 %v376_v28 }
 0x668   :  { %v2210_v29 = vpop.eup %2209 }
 0x669   :  { %v390_v35 = vsub.f32 1.0, %v2210_v29  ;;  %v396_v15 = vmul.f32 %v2210_v29, %v324_v5 }
 0x6bf   :  { %v381_v30 = vpop.permute.xlu0 %380 }
 0x6c0   :  { %v383_v31 = vmul.f32 %v2210_v29, %v381_v30 }
 0x6c2   :  { %385 = vrot.lane.b32.xlu1 %v383_v31, %s2288_s11 }
 0x734   :  { %v386_v32 = vpop.permute.xlu1 %385 }
 0x735   :  { %v388_v33 = vadd.f32 %v386_v32, %v145_v23 }
 0x737   :  { %2211 = vtanh.f32 %v388_v33 }
 0x741   :  { %v2212_v34 = vpop.eup %2211 }
 0x742   :  { %392 = vrot.lane.b32.xlu0 %v2212_v34, %s2289_s2 }
 0x7b4   :  { %v393_v36 = vpop.permute.xlu0 %392 }
 0x7b5   :  { %v395_v37 = vmul.f32 %v393_v36, %v390_v35 }
 0x7b7   :  { %v397_v38 = vadd.f32 %v396_v15, %v395_v37 }
 0x7b9   :  { %v398_v39 = vpack.c.bf16 %v397_v38, %v397_v38 }
 0x7bb   :  { %400 = vrot.lane.b32.xlu1 %v398_v39, %s2289_s2  ;;  %v156_v39 = vadd.f32 %v2427_v14, %v2392_v25 }
 0x82d   :  { %v401_v40 = vpop.permute.xlu1 %400 }
 0x82e   :  { %2062 = vmatmul.mubr.msk.bf16.vlgmr.msra.gmra.mrb[8].mxu1 %vm89_vm1, %v401_v40 }
 0x82f   :  { %2074 = vmatpush3.bf16.msra.mxu1 %v2335_v2  ;;  %2077 = vmatprep.mubr.msk.bf16.mxu1 %vm2286_vm0, %v2285_v1 }
 0x830   :  { %2075 = vmatprep.subr.bf16.mxu1 %v2285_v1 }
 0x833   :  { %2076 = vmatpush3.bf16.msra.mxu1 %v2346_v4 }
 0x834   :  { %2089 = vmatprep.subr.bf16.mxu1 %v2285_v1 }
 0x901   :  { %v439_v41 = vpop.f32.mrb[8].mxu1 }
 0x902   :  { %v440_v42 = vadd.f32 %v439_v41, %v2380_v13  ;;  %v2063_v43 = vpop.f32.mrb[9].mxu1 }
 0x903   :  { %v442_v44 = vpop.f32.mrb[10].mxu1 }
 0x904   :  { %453 = vrot.lane.b32.xlu0 %v440_v42, %s2288_s11  ;;  %v2064_v45 = vpop.f32.mrb[11].mxu1  ;;  %v445_v47 = vadd.f32 %v440_v42, %v148_v46 }
 0x906   :  { %v1932_v48 = vmul.f32 -1.442695, %v445_v47 }
 0x908   :  { %2213 = vpow2.f32 %v1932_v48 }
 0x912   :  { %v2214_v49 = vpop.eup %2213 }
 0x913   :  { %v449_v50 = vadd.f32 1.0, %v2214_v49 }
 0x915   :  { %2215 = vrcp.f32 %v449_v50 }
 0x91f   :  { %v2216_v51 = vpop.eup %2215 }
 0x920   :  { %v463_v57 = vsub.f32 1.0, %v2216_v51  ;;  %v469_v20 = vmul.f32 %v2216_v51, %v397_v38 }
 0x976   :  { %v454_v52 = vpop.permute.xlu0 %453 }
 0x977   :  { %v456_v53 = vmul.f32 %v2216_v51, %v454_v52 }
 0x979   :  { %458 = vrot.lane.b32.xlu1 %v456_v53, %s2288_s11 }
 0x9eb   :  { %v459_v54 = vpop.permute.xlu1 %458 }
 0x9ec   :  { %v461_v55 = vadd.f32 %v459_v54, %v148_v46 }
 0x9ee   :  { %2217 = vtanh.f32 %v461_v55 }
 0x9f8   :  { %v2218_v56 = vpop.eup %2217 }
 0x9f9   :  { %465 = vrot.lane.b32.xlu0 %v2218_v56, %s2289_s2 }
 0xa6b   :  { %v466_v58 = vpop.permute.xlu0 %465 }
 0xa6c   :  { %v468_v59 = vmul.f32 %v466_v58, %v463_v57 }
 0xa6e   :  { %v470_v60 = vadd.f32 %v469_v20, %v468_v59  ;;  %v161_v20 = vadd.f32 %v2421_v7, %v2392_v25 }
 0xa70   :  { %v471_v61 = vpack.c.bf16 %v470_v60, %v470_v60 }
 0xa72   :  { %473 = vrot.lane.b32.xlu1 %v471_v61, %s2289_s2 }
 0xae4   :  { %v474_v62 = vpop.permute.xlu1 %473 }
 0xae5   :  { %2070 = vmatmul.mubr.msk.bf16.vlgmr.msra.gmra.mrb[12].mxu0 %vm89_vm1, %v474_v62 }
 0xae6   :  { %2082 = vmatpush3.bf16.msra.mxu0 %v2335_v2  ;;  %2085 = vmatprep.mubr.msk.bf16.mxu0 %vm2286_vm0, %v2285_v1 }
 0xae7   :  { %2083 = vmatprep.subr.bf16.mxu0 %v2285_v1 }
 0xaea   :  { %2084 = vmatpush3.bf16.msra.mxu0 %v2346_v4 }
 0xaeb   :  { %2097 = vmatprep.subr.bf16.mxu0 %v2285_v1 }
 0xbb8   :  { %v512_v63 = vpop.f32.mrb[12].mxu0 }
 0xbb9   :  { %v513_v0 = vadd.f32 %v512_v63, %v2380_v13  ;;  %v2071_v3 = vpop.f32.mrb[13].mxu0 }
 0xbba   :  { %v515_v5 = vpop.f32.mrb[14].mxu0 }
 0xbbb   :  { %526 = vrot.lane.b32.xlu0 %v513_v0, %s2288_s11  ;;  %v2072_v6 = vpop.f32.mrb[15].mxu0  ;;  %v518_v17 = vadd.f32 %v513_v0, %v153_v16 }
 0xbbd   :  { %v1934_v18 = vmul.f32 -1.442695, %v518_v17 }
 0xbbf   :  { %2219 = vpow2.f32 %v1934_v18 }
 0xbc9   :  { %v2220_v19 = vpop.eup %2219 }
 0xbca   :  { %v522_v21 = vadd.f32 1.0, %v2220_v19 }
 0xbcc   :  { %2221 = vrcp.f32 %v522_v21 }
 0xbd6   :  { %v2222_v22 = vpop.eup %2221 }
 0xbd7   :  { %v536_v29 = vsub.f32 1.0, %v2222_v22  ;;  %v542_v10 = vmul.f32 %v2222_v22, %v470_v60 }
 0xc2d   :  { %v527_v23 = vpop.permute.xlu0 %526 }
 0xc2e   :  { %v529_v24 = vmul.f32 %v2222_v22, %v527_v23 }
 0xc30   :  { %531 = vrot.lane.b32.xlu1 %v529_v24, %s2288_s11 }
 0xca2   :  { %v532_v26 = vpop.permute.xlu1 %531 }
 0xca3   :  { %v534_v27 = vadd.f32 %v532_v26, %v153_v16 }
 0xca5   :  { %2223 = vtanh.f32 %v534_v27 }
 0xcaf   :  { %v2224_v28 = vpop.eup %2223 }
 0xcb0   :  { %538 = vrot.lane.b32.xlu0 %v2224_v28, %s2289_s2 }
 0xd22   :  { %v539_v30 = vpop.permute.xlu0 %538 }
 0xd23   :  { %v541_v31 = vmul.f32 %v539_v30, %v536_v29  ;;  %v164_v30 = vadd.f32 %v2425_v11, %v2392_v25  ;;  %v2174_v25 = vld [vmem:[%s2789_s3] sm:$0xff]   ;;  %v2175_v11 = vld [vmem:[%s2790_s4 + $0x8] sm:$0xff]  }
 0xd25   :  { %v543_v32 = vadd.f32 %v542_v10, %v541_v31 }
 0xd27   :  { %v544_v33 = vpack.c.bf16 %v543_v32, %v543_v32 }
 0xd29   :  { %546 = vrot.lane.b32.xlu1 %v544_v33, %s2289_s2 }
 0xd9b   :  { %v547_v34 = vpop.permute.xlu1 %546 }
 0xd9c   :  { %2078 = vmatmul.mubr.msk.bf16.vlgmr.msra.gmra.mrb[12].mxu1 %vm89_vm1, %v547_v34 }
 0xd9d   :  { %2090 = vmatpush3.bf16.msra.mxu1 %v2335_v2  ;;  %2093 = vmatprep.mubr.msk.bf16.mxu1 %vm2286_vm0, %v2285_v1 }
 0xd9e   :  { %2091 = vmatprep.subr.bf16.mxu1 %v2285_v1 }
 0xda1   :  { %2092 = vmatpush3.bf16.msra.mxu1 %v2346_v4 }
 0xe6f   :  { %v585_v35 = vpop.f32.mrb[12].mxu1 }
 0xe70   :  { %v586_v36 = vadd.f32 %v585_v35, %v2380_v13  ;;  %v2079_v15 = vpop.f32.mrb[13].mxu1 }
 0xe71   :  { %v588_v37 = vpop.f32.mrb[14].mxu1 }
 0xe72   :  { %599 = vrot.lane.b32.xlu0 %v586_v36, %s2288_s11  ;;  %v2080_v38 = vpop.f32.mrb[15].mxu1  ;;  %v591_v40 = vadd.f32 %v586_v36, %v156_v39  ;;  %v2173_v37 = vld [vmem:[%s2790_s4] sm:$0xff]  }
 0xe73   :  { %v2512_v38 = vld [vmem:[%s2786_s0] sm:$0xff]   ;;  %2105 = vmatprep.subr.bf16.mxu1 %v2173_v37 }
 0xe74   :  { %v1936_v2 = vmul.f32 -1.442695, %v591_v40 }
 0xe76   :  { %2225 = vpow2.f32 %v1936_v2  ;;  %v2526_v2 = vld [vmem:[%s2786_s0 + $0x8] sm:$0xff]  }
 0xe80   :  { %v2226_v41 = vpop.eup %2225 }
 0xe81   :  { %v595_v42 = vadd.f32 1.0, %v2226_v41  ;;  %v2533_v41 = vld [vmem:[%s2786_s0 + $0x10] sm:$0xff]  }
 0xe83   :  { %2227 = vrcp.f32 %v595_v42  ;;  %v2538_v42 = vld [vmem:[%s2786_s0 + $0x18] sm:$0xff]  }
 0xe8d   :  { %v2228_v43 = vpop.eup %2227 }
 0xe8e   :  { %v609_v48 = vsub.f32 1.0, %v2228_v43  ;;  %v615_v14 = vmul.f32 %v2228_v43, %v543_v32 }
 0xee4   :  { %v600_v44 = vpop.permute.xlu0 %599 }
 0xee5   :  { %v602_v4 = vmul.f32 %v2228_v43, %v600_v44 }
 0xee7   :  { %604 = vrot.lane.b32.xlu1 %v602_v4, %s2288_s11 }
 0xf59   :  { %v605_v45 = vpop.permute.xlu1 %604 }
 0xf5a   :  { %v607_v46 = vadd.f32 %v605_v45, %v156_v39  ;;  %v2176_v39 = vld [vmem:[%s2789_s3 + $0x8] sm:$0xff]  }
 0xf5c   :  { %2229 = vtanh.f32 %v607_v46 }
 0xf66   :  { %v2230_v47 = vpop.eup %2229 }
 0xf67   :  { %611 = vrot.lane.b32.xlu0 %v2230_v47, %s2289_s2 }
 0xfd9   :  { %v612_v49 = vpop.permute.xlu0 %611 }
 0xfda   :  { %v614_v50 = vmul.f32 %v612_v49, %v609_v48 }
 0xfdc   :  { %v616_v51 = vadd.f32 %v615_v14, %v614_v50 }
 0xfde   :  { %v617_v52 = vpack.c.bf16 %v616_v51, %v616_v51 }
 0xfe0   :  { %619 = vrot.lane.b32.xlu1 %v617_v52, %s2289_s2 }
0x1052   :  { %v620_v53 = vpop.permute.xlu1 %619 }
0x1053   :  { %2086 = vmatmul.mubr.msk.bf16.vlgmr.msra.gmra.mrb[16].mxu0 %vm89_vm1, %v620_v53 }
0x1054   :  { %2101 = vmatprep.mubr.msk.bf16.mxu0 %vm2286_vm0, %v2285_v1  ;;  %2098 = vmatpush3.bf16.msra.mxu0 %v2174_v25 }
0x1055   :  { %2099 = vmatprep.subr.bf16.mxu0 %v2285_v1 }
0x1058   :  { %2100 = vmatpush3.bf16.msra.mxu0 %v2176_v39 }
0x1059   :  { %2117 = vmatprep.subr.bf16.mxu0 %v2285_v1 }
0x1126   :  { %v658_v54 = vpop.f32.mrb[16].mxu0 }
0x1127   :  { %v659_v55 = vadd.f32 %v658_v54, %v2380_v13  ;;  %v2087_v56 = vpop.f32.mrb[17].mxu0 }
0x1128   :  { %v661_v57 = vpop.f32.mrb[18].mxu0  ;;  %v841_v56 = vld [vmem:[%s2790_s4 + $0x20] sm:$0x1] }
0x1129   :  { %672 = vrot.lane.b32.xlu0 %v659_v55, %s2288_s11  ;;  %v2088_v58 = vpop.f32.mrb[19].mxu0  ;;  %v664_v59 = vadd.f32 %v659_v55, %v161_v20  ;;  %v842_v57 = vunpack.c.l.bf16 %v841_v56 }
0x112a   :  { %v767_v58 = vld [vmem:[%s2789_s3 + $0x10] sm:$0x1] }
0x112b   :  { %v1938_v60 = vmul.f32 -1.442695, %v664_v59  ;;  %2153 = vpush %v842_v57 }
0x112d   :  { %2231 = vpow2.f32 %v1938_v60  ;;  %v768_v60 = vunpack.c.l.bf16 %v767_v58 }
0x1137   :  { %v2232_v61 = vpop.eup %2231 }
0x1138   :  { %v668_v62 = vadd.f32 1.0, %v2232_v61  ;;  %v837_v61 = vld [vmem:[%s2790_s4 + $0x10] sm:$0x1] }
0x113a   :  { %2233 = vrcp.f32 %v668_v62 }
0x1144   :  { %v2234_v63 = vpop.eup %2233 }
0x1145   :  { %v682_v17 = vsub.f32 1.0, %v2234_v63  ;;  %v688_v7 = vmul.f32 %v2234_v63, %v616_v51 }
0x115c   :  { %s2154_s15 = spop %2153 }
0x119b   :  { %v673_v0 = vpop.permute.xlu0 %672 }
0x119c   :  { %v675_v3 = vmul.f32 %v2234_v63, %v673_v0  ;;  %v773_v63 = vrot.slane %v768_v60, %v2377_v12  ;;  %v838_v0 = vunpack.c.l.bf16 %v837_v61 }
0x119e   :  { %677 = vrot.lane.b32.xlu1 %v675_v3, %s2288_s11 }
0x1210   :  { %v678_v5 = vpop.permute.xlu1 %677 }
0x1211   :  { %v680_v6 = vadd.f32 %v678_v5, %v161_v20  ;;  %v2290_v20 = vmov 1966171168  }
0x1212   :  { %v959_v59 = vunpack.c.l.s4 %v2290_v20 }
0x1213   :  { %2235 = vtanh.f32 %v680_v6 }
0x1214   :  { %v960_v62 = vunpack.c.0.s8 %v959_v59 }
0x1216   :  { %v963_v3 = vsub.s32 %v960_v62, %v2371_v9 }
0x121d   :  { %v2236_v16 = vpop.eup %2235 }
0x121e   :  { %684 = vrot.lane.b32.xlu0 %v2236_v16, %s2289_s2 }
0x1290   :  { %v685_v18 = vpop.permute.xlu0 %684 }
0x1291   :  { %v687_v19 = vmul.f32 %v685_v18, %v682_v17  ;;  %v846_v17 = vrot.slane %v838_v0, %v2377_v12  ;;  %v839_v18 = vld [vmem:[%s2790_s4 + $0x18] sm:$0x1] }
0x1293   :  { %v689_v21 = vadd.f32 %v688_v7, %v687_v19 }
0x1295   :  { %v690_v22 = vpack.c.bf16 %v689_v21, %v689_v21 }
0x1297   :  { %692 = vrot.lane.b32.xlu1 %v690_v22, %s2289_s2 }
0x1309   :  { %v693_v23 = vpop.permute.xlu1 %692 }
0x130a   :  { %2094 = vmatmul.mubr.msk.bf16.vlgmr.msra.gmra.mrb[16].mxu1 %vm89_vm1, %v693_v23  ;;  %v840_v23 = vunpack.c.l.bf16 %v839_v18 }
0x130b   :  { %2106 = vmatpush3.bf16.msra.mxu1 %v2173_v37  ;;  %2109 = vmatprep.mubr.msk.bf16.mxu1 %vm89_vm1, %v2512_v38 }
0x130c   :  { %2107 = vmatprep.subr.bf16.mxu1 %v2175_v11  ;;  %v1065_v37 = vrot.slane %v840_v23, %v2377_v12 }
0x130f   :  { %2108 = vmatpush3.bf16.msra.mxu1 %v2175_v11 }
0x1310   :  { %2133 = vmatprep.subr.bf16.mxu1 %v2285_v1 }
0x1312   :  { %2110 = vmatmul.mubr.msk.bf16.vlgmr.msra.gmra.mrb[20].mxu1 %vm89_vm1, %v2526_v2 }
0x1313   :  { %2113 = vmatprep.mubr.msk.bf16.mxu1 %vm89_vm1, %v2533_v41 }
0x131a   :  { %2114 = vmatmul.mubr.msk.bf16.gmra.mrb[24].mxu1 %vm89_vm1, %v2538_v42 }
0x131b   :  { %2141 = vmatprep.mubr.msk.bf16.mxu1 %vm2286_vm0, %v2285_v1 }
0x13dd   :  { %v731_v24 = vpop.f32.mrb[16].mxu1 }
0x13de   :  { %v732_v26 = vadd.f32 %v731_v24, %v2380_v13  ;;  %v2095_v27 = vpop.f32.mrb[17].mxu1 }
0x13df   :  { %v734_v28 = vpop.f32.mrb[18].mxu1 }
0x13e0   :  { %745 = vrot.lane.b32.xlu0 %v732_v26, %s2288_s11  ;;  %v2096_v29 = vpop.f32.mrb[19].mxu1  ;;  %v737_v10 = vadd.f32 %v732_v26, %v164_v30 }
0x13e2   :  { %v1940_v31 = vmul.f32 -1.442695, %v737_v10 }
0x13e4   :  { %2237 = vpow2.f32 %v1940_v31 }
0x13e5   :  { %v2111_v49 = vpop.f32.mrb[20].mxu1 }
0x13e6   :  { %v925_v14 = vpop.f32.mrb[21].mxu1  ;;  %v934_v29 = vadd.f32 %v2111_v49, %v846_v17 }
0x13e7   :  { %v2112_v50 = vpop.f32.mrb[22].mxu1  ;;  %v926_v28 = vadd.f32 %v925_v14, %v846_v17 }
0x13e8   :  { %v928_v51 = vpop.f32.mrb[23].mxu1 }
0x13e9   :  { %v929_v10 = vadd.f32 %v928_v51, %v846_v17 }
0x13ed   :  { %v2115_v52 = vpop.f32.mrb[24].mxu1 }
0x13ee   :  { %v2238_v32 = vpop.eup %2237  ;;  %v941_v53 = vpop.f32.mrb[25].mxu1 }
0x13ef   :  { %v741_v33 = vadd.f32 1.0, %v2238_v32  ;;  %v2116_v54 = vpop.f32.mrb[26].mxu1  ;;  %v942_v31 = vadd.f32 %v941_v53, %v846_v17 }
0x13f0   :  { %v944_v55 = vpop.f32.mrb[27].mxu1 }
0x13f1   :  { %2239 = vrcp.f32 %v741_v33 }
0x13fb   :  { %v2240_v34 = vpop.eup %2239 }
0x13fc   :  { %v755_v43 = vsub.f32 1.0, %v2240_v34  ;;  %v761_v4 = vmul.f32 %v2240_v34, %v689_v21 }
0x1452   :  { %v746_v35 = vpop.permute.xlu0 %745 }
0x1453   :  { %v748_v36 = vmul.f32 %v2240_v34, %v746_v35 }
0x1455   :  { %750 = vrot.lane.b32.xlu1 %v748_v36, %s2288_s11  ;;  %v950_v36 = vadd.f32 %v2115_v52, %v846_v17 }
0x14c7   :  { %v751_v13 = vpop.permute.xlu1 %750 }
0x14c8   :  { %v753_v15 = vadd.f32 %v751_v13, %v164_v30  ;;  %v937_v30 = vadd.f32 %v2112_v50, %v846_v17 }
0x14ca   :  { %2241 = vtanh.f32 %v753_v15  ;;  %v945_v15 = vadd.f32 %v944_v55, %v846_v17 }
0x14d4   :  { %v2242_v40 = vpop.eup %2241 }
0x14d5   :  { %757 = vrot.lane.b32.xlu0 %v2242_v40, %s2289_s2 }
0x1547   :  { %v758_v44 = vpop.permute.xlu0 %757 }
0x1548   :  { %v760_v45 = vmul.f32 %v758_v44, %v755_v43 }
0x154a   :  { %v762_v46 = vadd.f32 %v761_v4, %v760_v45  ;;  %v953_v4 = vadd.f32 %v2116_v54, %v846_v17 }
0x154c   :  { %v769_v47 = vpack.c.bf16 %v762_v46, %v762_v46 }
0x154e   :  { %775 = vrot.lane.b32.xlu1 %v769_v47, %s2289_s2 }
0x15c0   :  { %v776_v48 = vpop.permute.xlu1 %775 }
0x15c1   :  { %2102 = vmatmul.mubr.msk.bf16.vlgmr.msra.gmra.mrb[20].mxu0 %vm89_vm1, %v776_v48 }
0x15c2   :  { %2121 = vmatprep.mubr.msk.bf16.mxu0 %vm2286_vm0, %v2285_v1 }
0x1694   :  { %v826_v5 = vpop.f32.mrb[20].mxu0 }
0x1695   :  { %v2561_v6 = vadd.f32 %v826_v5, %v773_v63  ;;  %v2103_v16 = vpop.f32.mrb[21].mxu0 }
0x1696   :  { %v829_v7 = vpop.f32.mrb[22].mxu0 }
0x1697   :  { %v957_v19 = vcombine.high %v2561_v6, %v2561_v6  ;;  %v964_v21 = vrot.slane %v2561_v6, %v963_v3  ;;  %v2104_v22 = vpop.f32.mrb[23].mxu0 }
0x1699   :  { %v971_v24 = vrot.slane %v957_v19, %v963_v3  ;;  %v972_v26 = vcombine.high %v964_v21, %v964_v21  ;;  %v980_v27 = vrot.slane %v964_v21, %v963_v3 }
0x169b   :  { %v973_v32 = vcombine.high %v971_v24, %v971_v24  ;;  %v1002_v33 = vcombine.high %v980_v27, %v980_v27  ;;  %v1009_v34 = vrot.slane %v980_v27, %v2377_v12  ;;  %v994_v35 = vrot.slane %v972_v26, %v963_v3 }
0x169c   :  { %v987_v13 = vrot.slane %v971_v24, %v963_v3 }
0x169d   :  { %v1017_v25 = vrot.slane %v1002_v33, %v2377_v12  ;;  %v1046_v11 = vadd.f32 %v1009_v34, %v926_v28  ;;  %v1004_v39 = vcombine.high %v994_v35, %v994_v35  ;;  %v1013_v40 = vrot.slane %v994_v35, %v2377_v12 }
0x169e   :  { %v1003_v43 = vcombine.high %v987_v13, %v987_v13  ;;  %v1025_v44 = vrot.slane %v987_v13, %v2377_v12  ;;  %v1001_v45 = vrot.slane %v973_v32, %v963_v3 }
0x169f   :  { %v1048_v46 = vadd.f32 %v1017_v25, %v934_v29  ;;  %v1054_v47 = vmax.f32 %v1046_v11, 0.0  ;;  %v1021_v48 = vrot.slane %v1004_v39, %v2377_v12  ;;  %v1047_v49 = vadd.f32 %v1013_v40, %v929_v10 }
0x16a0   :  { %v1033_v14 = vrot.slane %v1003_v43, %v2377_v12  ;;  %v1050_v50 = vadd.f32 %v1025_v44, %v942_v31  ;;  %v1005_v51 = vcombine.high %v1001_v45, %v1001_v45  ;;  %v1029_v52 = vrot.slane %v1001_v45, %v2377_v12 }
0x16a1   :  { %v1056_v53 = vmax.f32 %v1048_v46, 0.0  ;;  %v1049_v55 = vadd.f32 %v1021_v48, %v937_v30  ;;  %v1055_v56 = vmax.f32 %v1047_v49, 0.0  ;;  %v1066_v57 = vmul.f32 %v1065_v37, %v1054_v47 }
0x16a2   :  { %v1052_v58 = vadd.f32 %v1033_v14, %v950_v36  ;;  %v1058_v20 = vmax.f32 %v1050_v50, 0.0  ;;  %v1037_v54 = vrot.slane %v1005_v51, %v2377_v12  ;;  %v1051_v59 = vadd.f32 %v1029_v52, %v945_v15 }
0x16a3   :  { %v1057_v60 = vmax.f32 %v1049_v55, 0.0  ;;  %v1074_v61 = vsel %vm89_vm1, %v1066_v57, 0.0  ;;  %v1067_v62 = vmul.f32 %v1065_v37, %v1055_v56  ;;  %v1068_v63 = vmul.f32 %v1065_v37, %v1056_v53 }
0x16a4   :  { %v1053_v0 = vadd.f32 %v1037_v54, %v953_v4  ;;  %1075 = vadd.xlane.f32.xlu0 %v1074_v61  ;;  %v1060_v3 = vmax.f32 %v1052_v58, 0.0  ;;  %v1070_v16 = vmul.f32 %v1065_v37, %v1058_v20  ;;  %v1059_v17 = vmax.f32 %v1051_v59, 0.0 }
0x16a5   :  { %v1077_v5 = vsel %vm89_vm1, %v1067_v62, 0.0  ;;  %v1080_v18 = vsel %vm89_vm1, %v1068_v63, 0.0  ;;  %v1069_v7 = vmul.f32 %v1065_v37, %v1057_v60  ;;  %v1119_v30 = vand.u32 127, %v53_v8 }
0x16a6   :  { %1078 = vadd.xlane.f32.xlu1 %v1077_v5  ;;  %v1086_v19 = vsel %vm89_vm1, %v1070_v16, 0.0  ;;  %v1072_v21 = vmul.f32 %v1065_v37, %v1060_v3  ;;  %v1061_v22 = vmax.f32 %v1053_v0, 0.0  ;;  %v1071_v24 = vmul.f32 %v1065_v37, %v1059_v17 }
0x16a7   :  { %v1083_v23 = vsel %vm89_vm1, %v1069_v7, 0.0  ;;  %v1100_v10 = vstv %s2154_s15  ;;  %v2589_v33 = vsub.s32 %v1119_v30, %v2371_v9  ;;  %v1178_v59 = vsub.s32 1, %v2371_v9 }
0x16a8   :  { %1081 = vadd.xlane.f32.xlu0 %v1080_v18  ;;  %v1092_v26 = vsel %vm89_vm1, %v1072_v21, 0.0  ;;  %v1089_v27 = vsel %vm89_vm1, %v1071_v24, 0.0  ;;  %v1073_v28 = vmul.f32 %v1065_v37, %v1061_v22  ;;  %v1182_v60 = vsub.s32 2, %v2371_v9 }
0x16a9   :  { %v1186_v61 = vsub.s32 3, %v2371_v9  ;;  %v1190_v17 = vsub.s32 4, %v2371_v9  ;;  %v1194_v22 = vsub.s32 5, %v2371_v9 }
0x16aa   :  { %1087 = vadd.xlane.f32.xlu1 %v1086_v19  ;;  %v1095_v29 = vsel %vm89_vm1, %v1073_v28, 0.0 }
0x16ac   :  { %1084 = vadd.xlane.f32.xlu0 %v1083_v23 }
0x16ae   :  { %1093 = vadd.xlane.f32.xlu1 %v1092_v26 }
0x16b0   :  { %1090 = vadd.xlane.f32.xlu0 %v1089_v27  ;;  %v1198_v27 = vsub.s32 6, %v2371_v9 }
0x16b4   :  { %1096 = vadd.xlane.f32.xlu0 %v1095_v29 }
0x1731   :  { %v1076_v31 = vpop.xlane.xlu0 %1075 }
0x1732   :  { %v1102_v34 = vadd.f32 %v1100_v10, %v1076_v31 }
0x1733   :  { %v1079_v32 = vpop.xlane.xlu1 %1078 }
0x1734   :  { %v1103_v35 = vadd.f32 %v1100_v10, %v1079_v32  ;;  %v1123_v25 = vrot.slane %v1102_v34, %v2589_v33 }
0x1735   :  { %v1082_v36 = vpop.xlane.xlu0 %1081 }
0x1736   :  { %v1127_v13 = vrot.slane %v1103_v35, %v2589_v33  ;;  %v1104_v15 = vadd.f32 %v1100_v10, %v1082_v36 }
0x1737   :  { %v1088_v37 = vpop.xlane.xlu1 %1087 }
0x1738   :  { %v1131_v11 = vrot.slane %v1104_v15, %v2589_v33  ;;  %v1153_v8 = vsel %vm1152_vm2, %v1127_v13, %v1123_v25  ;;  %v1106_v43 = vadd.f32 %v1100_v10, %v1088_v37 }
0x1739   :  { %v1085_v39 = vpop.xlane.xlu0 %1084 }
0x173a   :  { %v1105_v40 = vadd.f32 %v1100_v10, %v1085_v39  ;;  %v1155_v45 = vsel %vm1154_vm3, %v1131_v11, %v1153_v8  ;;  %v1139_v49 = vrot.slane %v1106_v43, %v2589_v33 }
0x173b   :  { %v1094_v4 = vpop.xlane.xlu1 %1093 }
0x173c   :  { %v1135_v44 = vrot.slane %v1105_v40, %v2589_v33  ;;  %v1108_v14 = vadd.f32 %v1100_v10, %v1094_v4 }
0x173d   :  { %v1091_v46 = vpop.xlane.xlu0 %1090 }
0x173e   :  { %v1157_v47 = vsel %vm1156_vm4, %v1135_v44, %v1155_v45  ;;  %v1107_v48 = vadd.f32 %v1100_v10, %v1091_v46  ;;  %v1147_v56 = vrot.slane %v1108_v14, %v2589_v33 }
0x173f   :  { %v1159_v52 = vsel %vm1158_vm5, %v1139_v49, %v1157_v47 }
0x1740   :  { %v1143_v50 = vrot.slane %v1107_v48, %v2589_v33 }
0x1741   :  { %v1097_v51 = vpop.xlane.xlu0 %1096 }
0x1742   :  { %v1109_v53 = vadd.f32 %v1100_v10, %v1097_v51  ;;  %v1161_v55 = vsel %vm1160_vm6, %v1143_v50, %v1159_v52  ;;  %v1202_v10 = vsub.s32 7, %v2371_v9  ;;  %v1361_v9 = vunpack.c.l.bf16 %v2512_v38 }
0x1743   :  { %v1163_v58 = vsel %vm1162_vm7, %v1147_v56, %v1161_v55 }
0x1744   :  { %v1151_v57 = vrot.slane %v1109_v53, %v2589_v33 }
0x1746   :  { %v1165_v20 = vsel %vm1164_vm8, %v1151_v57, %v1163_v58 }
0x1747   :  { %v1168_v54 = vsel %vm1167_vm9, %v1165_v20, -inf }
0x1748   :  { %1169 = vmax.xlane.f32.xlu1 %v1168_v54 }
0x17d5   :  { %v1170_v62 = vpop.xlane.xlu1 %1169 }
0x17d6   :  { %v1175_v63 = vrot.slane %v1170_v62, %v2377_v12  ;;  %v1179_v0 = vrot.slane %v1170_v62, %v1178_v59  ;;  %v1183_v3 = vrot.slane %v1170_v62, %v1182_v60  ;;  %v1187_v18 = vrot.slane %v1170_v62, %v1186_v61 }
0x17d7   :  { %v1191_v23 = vrot.slane %v1170_v62, %v1190_v17  ;;  %v1195_v28 = vrot.slane %v1170_v62, %v1194_v22  ;;  %v1199_v31 = vrot.slane %v1170_v62, %v1198_v27  ;;  %v1203_v13 = vrot.slane %v1170_v62, %v1202_v10 }
0x17d8   :  { %v1212_v5 = vsub.f32 %v1102_v34, %v1175_v63  ;;  %v1213_v16 = vsub.f32 %v1103_v35, %v1179_v0  ;;  %v1214_v7 = vsub.f32 %v1104_v15, %v1183_v3  ;;  %v1215_v24 = vsub.f32 %v1105_v40, %v1187_v18 }
0x17d9   :  { %v1216_v29 = vsub.f32 %v1106_v43, %v1191_v23  ;;  %v1217_v32 = vsub.f32 %v1107_v48, %v1195_v28  ;;  %v1218_v15 = vsub.f32 %v1108_v14, %v1199_v31  ;;  %v1219_v11 = vsub.f32 %v1109_v53, %v1203_v13 }
0x17da   :  { %v1220_v19 = vmul.f32 1.442695, %v1212_v5  ;;  %v1222_v21 = vmul.f32 1.442695, %v1213_v16  ;;  %v1224_v26 = vmul.f32 1.442695, %v1214_v7 }
0x17db   :  { %v1226_v30 = vmul.f32 1.442695, %v1215_v24  ;;  %v1228_v34 = vmul.f32 1.442695, %v1216_v29  ;;  %v1230_v37 = vmul.f32 1.442695, %v1217_v32 }
0x17dc   :  { %2243 = vpow2.f32 %v1220_v19  ;;  %v1232_v39 = vmul.f32 1.442695, %v1218_v15  ;;  %v1234_v40 = vmul.f32 1.442695, %v1219_v11  ;;  %v1363_v11 = vunpack.c.l.bf16 %v2526_v2 }
0x17dd   :  { %2245 = vpow2.f32 %v1222_v21 }
0x17de   :  { %2247 = vpow2.f32 %v1224_v26 }
0x17df   :  { %2249 = vpow2.f32 %v1226_v30 }
0x17e0   :  { %2251 = vpow2.f32 %v1228_v34 }
0x17e1   :  { %2253 = vpow2.f32 %v1230_v37 }
0x17e2   :  { %2255 = vpow2.f32 %v1232_v39 }
0x17e3   :  { %2257 = vpow2.f32 %v1234_v40 }
0x17e6   :  { %v2244_v35 = vpop.eup %2243 }
0x17e7   :  { %v2246_v36 = vpop.eup %2245  ;;  %1245 = vperm.xlu0 %2163, %v2244_v35  }
0x17e8   :  { %1248 = vperm.xlu1 %2164, %v2246_v36   ;;  %v2248_v25 = vpop.eup %2247 }
0x17e9   :  { %v2250_v8 = vpop.eup %2249 }
0x17ea   :  { %v2252_v43 = vpop.eup %2251 }
0x17eb   :  { %v2254_v44 = vpop.eup %2253 }
0x17ec   :  { %1251 = vperm.xlu1 %2164, %v2248_v25   ;;  %v2256_v4 = vpop.eup %2255 }
0x17ed   :  { %v2258_v45 = vpop.eup %2257 }
0x17f0   :  { %1254 = vperm.xlu1 %2164, %v2250_v8  }
0x17f4   :  { %1257 = vperm.xlu1 %2164, %v2252_v43  }
0x17f8   :  { %1260 = vperm.xlu1 %2164, %v2254_v44  }
0x17fc   :  { %1263 = vperm.xlu1 %2164, %v2256_v4  }
0x1800   :  { %1266 = vperm.xlu1 %2164, %v2258_v45  }
0x1866   :  { %v1246_v14 = vpop.permute.xlu0 %1245 }
0x1867   :  { %v1249_v46 = vpop.permute.xlu1 %1248  ;;  %v1271_v52 = vrot.slane %v1246_v14, %v2589_v33 }
0x1868   :  { %v1275_v51 = vrot.slane %v1249_v46, %v2589_v33 }
0x186a   :  { %v1300_v58 = vsel %vm1152_vm2, %v1275_v51, %v1271_v52 }
0x186b   :  { %v1252_v47 = vpop.permute.xlu1 %1251 }
0x186c   :  { %v1279_v53 = vrot.slane %v1252_v47, %v2589_v33 }
0x186e   :  { %v1301_v54 = vsel %vm1154_vm3, %v1279_v53, %v1300_v58  ;;  %v1365_v53 = vunpack.c.l.bf16 %v2533_v41  ;;  %v1366_v58 = vunpack.c.h.bf16 %v2533_v41 }
0x186f   :  { %v1255_v48 = vpop.permute.xlu1 %1254 }
0x1870   :  { %v1283_v55 = vrot.slane %v1255_v48, %v2589_v33  ;;  %v1364_v48 = vunpack.c.h.bf16 %v2526_v2 }
0x1872   :  { %v1302_v63 = vsel %vm1156_vm4, %v1283_v55, %v1301_v54 }
0x1873   :  { %v1258_v49 = vpop.permute.xlu1 %1257 }
0x1874   :  { %v1287_v56 = vrot.slane %v1258_v49, %v2589_v33 }
0x1876   :  { %v1303_v0 = vsel %vm1158_vm5, %v1287_v56, %v1302_v63 }
0x1877   :  { %v1261_v50 = vpop.permute.xlu1 %1260 }
0x1878   :  { %v1291_v20 = vrot.slane %v1261_v50, %v2589_v33 }
0x187a   :  { %v1304_v5 = vsel %vm1160_vm6, %v1291_v20, %v1303_v0  ;;  %v1508_v0 = vsel %vm89_vm1, %v1366_v58, 0.0 }
0x187b   :  { %v1264_v57 = vpop.permute.xlu1 %1263 }
0x187c   :  { %v1295_v62 = vrot.slane %v1264_v57, %v2589_v33  ;;  %v1501_v57 = vsel %vm89_vm1, %v1365_v53, 0.0 }
0x187e   :  { %v1305_v18 = vsel %vm1162_vm7, %v1295_v62, %v1304_v5  ;;  %v1502_v5 = vrot.slane %v1501_v57, 4 }
0x187f   :  { %v1267_v3 = vpop.permute.xlu1 %1266 }
0x1880   :  { %v1299_v16 = vrot.slane %v1267_v3, %v2589_v33 }
0x1882   :  { %v1306_v7 = vsel %vm1164_vm8, %v1299_v16, %v1305_v18 }
0x1883   :  { %v1308_v19 = vsel %vm1167_vm9, %v1306_v7, 0.0 }
0x1884   :  { %1309 = vadd.xlane.f32.xlu1 %v1308_v19 }
0x1911   :  { %v1310_v21 = vpop.xlane.xlu1 %1309 }
0x1912   :  { %2259 = vrcp.f32 %v1310_v21  ;;  %v1509_v21 = vrot.slane %v1508_v0, 4 }
0x191c   :  { %v2260_v23 = vpop.eup %2259 }
0x191d   :  { %v1316_v24 = vrot.slane %v2260_v23, %v2377_v12  ;;  %v1320_v28 = vrot.slane %v2260_v23, %v1178_v59  ;;  %v1324_v33 = vrot.slane %v2260_v23, %v1182_v60  ;;  %v1328_v31 = vrot.slane %v2260_v23, %v1186_v61 }
0x191e   :  { %v1332_v34 = vrot.slane %v2260_v23, %v1190_v17  ;;  %v1336_v59 = vrot.slane %v2260_v23, %v1194_v22  ;;  %v1340_v60 = vrot.slane %v2260_v23, %v1198_v27  ;;  %v1344_v61 = vrot.slane %v2260_v23, %v1202_v10  ;;  %v2181_v17 = vld [vmem:[%s2790_s4 + $0x28] sm:$0xff]   ;;  %v2182_v22 = vld [vmem:[%s2790_s4 + $0x30] sm:$0xff]  }
0x191f   :  { %v1353_v26 = vmul.f32 %v2244_v35, %v1316_v24  ;;  %v1354_v29 = vmul.f32 %v2246_v36, %v1320_v28  ;;  %v1355_v30 = vmul.f32 %v2248_v25, %v1324_v33  ;;  %v1356_v32 = vmul.f32 %v2250_v8, %v1328_v31  ;;  %2118 = vmatpush3.bf16.msra.mxu0 %v2181_v17 }
0x1920   :  { %v1357_v35 = vmul.f32 %v2252_v43, %v1332_v34  ;;  %v1358_v36 = vmul.f32 %v2254_v44, %v1336_v59  ;;  %v1359_v13 = vmul.f32 %v2256_v4, %v1340_v60  ;;  %v1360_v15 = vmul.f32 %v2258_v45, %v1344_v61  ;;  %2119 = vmatprep.subr.bf16.mxu0 %v2285_v1 }
0x1921   :  { %1371 = vperm.xlu0 %2163, %v1353_v26   ;;  %v1473_v27 = vsel %vm89_vm1, %v1361_v9, 0.0  ;;  %v1362_v10 = vunpack.c.h.bf16 %v2512_v38  ;;  %v1487_v8 = vsel %vm89_vm1, %v1363_v11, 0.0  ;;  %v1494_v38 = vsel %vm89_vm1, %v1364_v48, 0.0 }
0x1922   :  { %v1474_v37 = vrot.slane %v1473_v27, 4  ;;  %v1488_v43 = vrot.slane %v1487_v8, 4  ;;  %v1495_v52 = vrot.slane %v1494_v38, 4  ;;  %v1367_v23 = vunpack.c.l.bf16 %v2538_v42 }
0x1923   :  { %2120 = vmatpush3.bf16.msra.mxu0 %v2182_v22  ;;  %v1480_v25 = vsel %vm89_vm1, %v1362_v10, 0.0  ;;  %v1503_v31 = vadd.f32 %v1502_v5, %v1501_v57 }
0x1924   :  { %2125 = vmatprep.subr.bf16.mxu0 %v2285_v1  ;;  %v1481_v39 = vrot.slane %v1480_v25, 4  ;;  %v1475_v40 = vadd.f32 %v1474_v37, %v1473_v27  ;;  %v1489_v45 = vadd.f32 %v1488_v43, %v1487_v8  ;;  %v1496_v2 = vadd.f32 %v1495_v52, %v1494_v38 }
0x1925   :  { %1376 = vperm.xlu0 %2163, %v1354_v29   ;;  %v1368_v29 = vunpack.c.h.bf16 %v2538_v42  ;;  %v1504_v37 = vrot.slane %v1503_v31, 2 }
0x1926   :  { %v1482_v44 = vadd.f32 %v1481_v39, %v1480_v25  ;;  %v1476_v4 = vrot.slane %v1475_v40, 2  ;;  %v1490_v49 = vrot.slane %v1489_v45, 2  ;;  %v1497_v28 = vrot.slane %v1496_v2, 2 }
0x1927   :  { %v1522_v61 = vsel %vm89_vm1, %v1368_v29, 0.0 }
0x1928   :  { %v1483_v46 = vrot.slane %v1482_v44, 2  ;;  %v1477_v47 = vadd.f32 %v1476_v4, %v1475_v40  ;;  %v1491_v55 = vadd.f32 %v1490_v49, %v1489_v45  ;;  %v1498_v17 = vadd.f32 %v1497_v28, %v1496_v2 }
0x1929   :  { %1381 = vperm.xlu0 %2163, %v1355_v30   ;;  %v1523_v8 = vrot.slane %v1522_v61, 4 }
0x192a   :  { %v1484_v14 = vadd.f32 %v1483_v46, %v1482_v44  ;;  %v1478_v50 = vrot.slane %v1477_v47, 1  ;;  %v1492_v3 = vrot.slane %v1491_v55, 1  ;;  %v1499_v46 = vrot.slane %v1498_v17, 1 }
0x192c   :  { %v1485_v56 = vrot.slane %v1484_v14, 1  ;;  %v1479_v20 = vadd.f32 %v1478_v50, %v1477_v47  ;;  %v1493_v30 = vadd.f32 %v1492_v3, %v1491_v55  ;;  %v1505_v50 = vadd.f32 %v1504_v37, %v1503_v31 }
0x192d   :  { %1386 = vperm.xlu0 %2163, %v1356_v32   ;;  %v1515_v32 = vsel %vm89_vm1, %v1367_v23, 0.0  ;;  %v1500_v2 = vadd.f32 %v1499_v46, %v1498_v17 }
0x192e   :  { %v1486_v16 = vadd.f32 %v1485_v56, %v1484_v14  ;;  %v1530_v7 = vmul.f32 0.125, %v1479_v20  ;;  %v1524_v56 = vadd.f32 %v1523_v8, %v1522_v61 }
0x1930   :  { %v1531_v34 = vmul.f32 0.125, %v1486_v16  ;;  %v1506_v16 = vrot.slane %v1505_v50, 1 }
0x1931   :  { %1391 = vperm.xlu0 %2163, %v1357_v35  }
0x1932   :  { %v1643_v25 = vpack.c.bf16 %v1531_v34, %v1531_v34 }
0x1935   :  { %1396 = vperm.xlu0 %2163, %v1358_v36  }
0x1939   :  { %1401 = vperm.xlu0 %2163, %v1359_v13   ;;  %v1510_v13 = vadd.f32 %v1509_v21, %v1508_v0 }
0x193b   :  { %v1511_v4 = vrot.slane %v1510_v13, 2 }
0x193d   :  { %1406 = vperm.xlu0 %2163, %v1360_v15   ;;  %v1642_v15 = vpack.c.bf16 %v1530_v7, %v1530_v7 }
0x193f   :  { %v1662_v45 = vunpack.c.l.b16 %v1642_v15 }
0x19a0   :  { %v1372_v51 = vpop.permute.xlu0 %1371 }
0x19a1   :  { %v1409_v62 = vmul.f32 %v1372_v51, %v1361_v9  ;;  %v1516_v9 = vrot.slane %v1515_v32, 4  ;;  %v1663_v51 = vunpack.c.l.b16 %v1643_v25 }
0x19a3   :  { %v1417_v24 = vsel %vm89_vm1, %v1409_v62, 0.0  ;;  %v1517_v49 = vadd.f32 %v1516_v9, %v1515_v32  ;;  %v1512_v62 = vadd.f32 %v1511_v4, %v1510_v13  ;;  %v1670_v7 = vsel %vm1152_vm2, %v1663_v51, %v1662_v45 }
0x19a4   :  { %v1377_v54 = vpop.permute.xlu0 %1376  ;;  %v1418_v59 = vrot.slane %v1417_v24, 4  ;;  %v1533_v32 = vmul.f32 0.125, %v1500_v2 }
0x19a5   :  { %v1410_v63 = vmul.f32 %v1377_v54, %v1362_v10  ;;  %v1532_v10 = vmul.f32 0.125, %v1493_v30  ;;  %v1513_v30 = vrot.slane %v1512_v62, 1 }
0x19a6   :  { %v1419_v40 = vadd.f32 %v1418_v59, %v1417_v24  ;;  %v1525_v24 = vrot.slane %v1524_v56, 2 }
0x19a7   :  { %v1424_v18 = vsel %vm89_vm1, %v1410_v63, 0.0  ;;  %v1644_v14 = vpack.c.bf16 %v1532_v10, %v1532_v10 }
0x19a8   :  { %v1382_v19 = vpop.permute.xlu0 %1381  ;;  %v1425_v33 = vrot.slane %v1424_v18, 4  ;;  %v1420_v57 = vrot.slane %v1419_v40, 2  ;;  %v1526_v17 = vadd.f32 %v1525_v24, %v1524_v56 }
0x19a9   :  { %v1411_v26 = vmul.f32 %v1382_v19, %v1363_v11  ;;  %v1664_v5 = vunpack.c.l.b16 %v1644_v14 }
0x19aa   :  { %v1426_v27 = vadd.f32 %v1425_v33, %v1424_v18  ;;  %v1527_v46 = vrot.slane %v1526_v17, 1 }
0x19ab   :  { %v1431_v35 = vsel %vm89_vm1, %v1411_v26, 0.0  ;;  %v1421_v26 = vadd.f32 %v1420_v57, %v1419_v40  ;;  %v1671_v59 = vsel %vm1154_vm3, %v1664_v5, %v1670_v7  ;;  %v1645_v40 = vpack.c.bf16 %v1533_v32, %v1533_v32 }
0x19ac   :  { %v1432_v36 = vrot.slane %v1431_v35, 4  ;;  %v1387_v60 = vpop.permute.xlu0 %1386  ;;  %v1427_v38 = vrot.slane %v1426_v27, 2 }
0x19ad   :  { %v1412_v22 = vmul.f32 %v1387_v60, %v1364_v48  ;;  %v1665_v42 = vunpack.c.l.b16 %v1645_v40 }
0x19ae   :  { %v1433_v11 = vadd.f32 %v1432_v36, %v1431_v35  ;;  %v1428_v3 = vadd.f32 %v1427_v38, %v1426_v27  ;;  %v1507_v36 = vadd.f32 %v1506_v16, %v1505_v50  ;;  %v1514_v27 = vadd.f32 %v1513_v30, %v1512_v62 }
0x19af   :  { %v1438_v39 = vsel %vm89_vm1, %v1412_v22, 0.0  ;;  %v1422_v22 = vrot.slane %v1421_v26, 1 }
0x19b0   :  { %v1439_v43 = vrot.slane %v1438_v39, 4  ;;  %v1392_v44 = vpop.permute.xlu0 %1391  ;;  %v1434_v52 = vrot.slane %v1433_v11, 2  ;;  %v1429_v35 = vrot.slane %v1428_v3, 1  ;;  %v1535_v51 = vmul.f32 0.125, %v1514_v27 }
0x19b1   :  { %v1413_v47 = vmul.f32 %v1392_v44, %v1365_v53  ;;  %v1518_v53 = vrot.slane %v1517_v49, 2 }
0x19b2   :  { %v1440_v48 = vadd.f32 %v1439_v43, %v1438_v39  ;;  %v1435_v19 = vadd.f32 %v1434_v52, %v1433_v11  ;;  %v1430_v8 = vadd.f32 %v1429_v35, %v1428_v3  ;;  %v1534_v43 = vmul.f32 0.125, %v1507_v36 }
0x19b3   :  { %v1445_v55 = vsel %vm89_vm1, %v1413_v47, 0.0  ;;  %v1519_v41 = vadd.f32 %v1518_v53, %v1517_v49  ;;  %v1423_v49 = vadd.f32 %v1422_v22, %v1421_v26  ;;  %v1647_v16 = vpack.c.bf16 %v1535_v51, %v1535_v51  ;;  %v2185_v51 = vld [vmem:[%s2790_s4 + $0x58] sm:$0xff]  }
0x19b4   :  { %v1441_v20 = vrot.slane %v1440_v48, 2  ;;  %v1446_v54 = vrot.slane %v1445_v55, 4  ;;  %v1397_v63 = vpop.permute.xlu0 %1396  ;;  %v1436_v13 = vrot.slane %v1435_v19, 1  ;;  %v1551_v56 = vpack.c.bf16 %v1430_v8, %v1430_v8  ;;  %2134 = vmatpush3.bf16.msra.mxu1 %v2185_v51 }
0x19b5   :  { %v1414_v0 = vmul.f32 %v1397_v63, %v1366_v58  ;;  %v1520_v39 = vrot.slane %v1519_v41, 1  ;;  %v1528_v63 = vadd.f32 %v1527_v46, %v1526_v17  ;;  %v1550_v2 = vpack.c.bf16 %v1423_v49, %v1423_v49  ;;  %v1542_v49 = vld [vmem:[%s2790_s4 + $0x38] sm:$0x1]  ;;  %2135 = vmatprep.subr.bf16.mxu1 %v2285_v1 }
0x19b6   :  { %v1447_v18 = vadd.f32 %v1446_v54, %v1445_v55  ;;  %v1442_v28 = vadd.f32 %v1441_v20, %v1440_v48  ;;  %v1437_v4 = vadd.f32 %v1436_v13, %v1435_v19  ;;  %v1646_v54 = vpack.c.bf16 %v1534_v43, %v1534_v43  ;;  %v2183_v43 = vld [vmem:[%s2790_s4 + $0x40] sm:$0xff]  }
0x19b7   :  { %v1452_v21 = vsel %vm89_vm1, %v1414_v0, 0.0  ;;  %v1521_v55 = vadd.f32 %v1520_v39, %v1519_v41  ;;  %v1571_v7 = vunpack.c.l.b16 %v1551_v56  ;;  %v1537_v30 = vmul.f32 0.125, %v1528_v63 }
0x19b8   :  { %v1448_v33 = vrot.slane %v1447_v18, 2  ;;  %v1402_v31 = vpop.permute.xlu0 %1401  ;;  %v1453_v34 = vrot.slane %v1452_v21, 4  ;;  %v1443_v9 = vrot.slane %v1442_v28, 1  ;;  %v1552_v20 = vpack.c.bf16 %v1437_v4, %v1437_v4 }
0x19b9   :  { %v1415_v58 = vmul.f32 %v1402_v31, %v1367_v23  ;;  %v1570_v31 = vunpack.c.l.b16 %v1550_v2 }
0x19ba   :  { %v1449_v60 = vadd.f32 %v1448_v33, %v1447_v18  ;;  %v1454_v61 = vadd.f32 %v1453_v34, %v1452_v21  ;;  %v1444_v38 = vadd.f32 %v1443_v9, %v1442_v28  ;;  %v1536_v18 = vmul.f32 0.125, %v1521_v55 }
0x19bb   :  { %v1459_v15 = vsel %vm89_vm1, %v1415_v58, 0.0  ;;  %v1572_v26 = vunpack.c.l.b16 %v1552_v20  ;;  %v1672_v28 = vsel %vm1156_vm4, %v1665_v42, %v1671_v59  ;;  %v1666_v33 = vunpack.c.l.b16 %v1646_v54 }
0x19bc   :  { %v1460_v10 = vrot.slane %v1459_v15, 4  ;;  %v1407_v37 = vpop.permute.xlu0 %1406  ;;  %v1450_v25 = vrot.slane %v1449_v60, 1  ;;  %v1455_v11 = vrot.slane %v1454_v61, 2  ;;  %v1553_v0 = vpack.c.bf16 %v1444_v38, %v1444_v38 }
0x19bd   :  { %v1416_v23 = vmul.f32 %v1407_v37, %v1368_v29  ;;  %v1648_v35 = vpack.c.bf16 %v1536_v18, %v1536_v18  ;;  %v1578_v36 = vsel %vm1152_vm2, %v1571_v7, %v1570_v31  ;;  %v1673_v17 = vsel %vm1158_vm5, %v1666_v33, %v1672_v28  ;;  %v2189_v18 = vld [vmem:[%s2791_s5] sm:$0xff]   ;;  %v2190_v31 = vld [vmem:[%s2791_s5 + $0x8] sm:$0xff]  }
0x19be   :  { %v1461_v44 = vadd.f32 %v1460_v10, %v1459_v15  ;;  %v1456_v45 = vadd.f32 %v1455_v11, %v1454_v61  ;;  %v1451_v50 = vadd.f32 %v1450_v25, %v1449_v60  ;;  %v1573_v32 = vunpack.c.l.b16 %v1553_v0 }
0x19bf   :  { %v1466_v47 = vsel %vm89_vm1, %v1416_v23, 0.0  ;;  %v1667_v60 = vunpack.c.l.b16 %v1647_v16  ;;  %v1579_v15 = vsel %vm1154_vm3, %v1572_v26, %v1578_v36  ;;  %v1649_v9 = vpack.c.bf16 %v1537_v30, %v1537_v30 }
0x19c0   :  { %v1462_v14 = vrot.slane %v1461_v44, 2  ;;  %v1467_v48 = vrot.slane %v1466_v47, 4  ;;  %v1457_v52 = vrot.slane %v1456_v45, 1  ;;  %v1554_v5 = vpack.c.bf16 %v1451_v50, %v1451_v50 }
0x19c1   :  { %v1580_v59 = vsel %vm1156_vm4, %v1573_v32, %v1579_v15  ;;  %v1668_v37 = vunpack.c.l.b16 %v1648_v35  ;;  %v1674_v25 = vsel %vm1160_vm6, %v1667_v60, %v1673_v17  ;;  %v1669_v8 = vunpack.c.l.b16 %v1649_v9 }
0x19c2   :  { %v1463_v29 = vadd.f32 %v1462_v14, %v1461_v44  ;;  %v1468_v57 = vadd.f32 %v1467_v48, %v1466_v47  ;;  %v1458_v62 = vadd.f32 %v1457_v52, %v1456_v45  ;;  %v1574_v58 = vunpack.c.l.b16 %v1554_v5  ;;  %v2184_v45 = vld [vmem:[%s2790_s4 + $0x48] sm:$0xff]   ;;  %v1548_v48 = vld [vmem:[%s2790_s4 + $0x50] sm:$0x1] }
0x19c3   :  { %v1675_v4 = vsel %vm1162_vm7, %v1668_v37, %v1674_v25  ;;  %v1543_v38 = vunpack.c.l.bf16 %v1542_v49  ;;  %v1549_v56 = vunpack.c.l.bf16 %v1548_v48  ;;  %v832_v7 = vmax.f32 %v2561_v6, 0.0 }
0x19c4   :  { %v1464_v53 = vrot.slane %v1463_v29, 1  ;;  %v1469_v3 = vrot.slane %v1468_v57, 2  ;;  %v1555_v19 = vpack.c.bf16 %v1458_v62, %v1458_v62  ;;  %v1581_v10 = vsel %vm1158_vm5, %v1574_v58, %v1580_v59  ;;  %v2187_v62 = vld [vmem:[%s2790_s4 + $0x68] sm:$0xff]  }
0x19c5   :  { %v1676_v46 = vsel %vm1164_vm8, %v1669_v8, %v1675_v4  ;;  %v1561_v14 = vrot.slane %v1543_v38, %v2377_v12  ;;  %v1653_v54 = vrot.slane %v1549_v56, %v2377_v12 }
0x19c6   :  { %v1465_v21 = vadd.f32 %v1464_v53, %v1463_v29  ;;  %v1470_v24 = vadd.f32 %v1469_v3, %v1468_v57  ;;  %v1575_v13 = vunpack.c.l.b16 %v1555_v19  ;;  %v1677_v47 = vpack.c.b16 %v1676_v46, %v1676_v46  ;;  %v2186_v29 = vld [vmem:[%s2790_s4 + $0x60] sm:$0xff]   ;;  %v2188_v3 = vld [vmem:[%s2790_s4 + $0x70] sm:$0xff]  }
0x19c7   :  { %2136 = vmatpush3.bf16.msra.mxu1 %v2186_v29 }
0x19c8   :  { %v1556_v34 = vpack.c.bf16 %v1465_v21, %v1465_v21  ;;  %v1471_v41 = vrot.slane %v1470_v24, 1  ;;  %v1582_v11 = vsel %vm1160_vm6, %v1575_v13, %v1581_v10  ;;  %2137 = vmatprep.subr.bf16.mxu1 %v2285_v1 }
0x19ca   :  { %v1472_v61 = vadd.f32 %v1471_v41, %v1470_v24  ;;  %v1576_v22 = vunpack.c.l.b16 %v1556_v34 }
0x19cb   :  { %2138 = vmatpush3.bf16.msra.mxu1 %v2187_v62 }
0x19cc   :  { %v1557_v27 = vpack.c.bf16 %v1472_v61, %v1472_v61  ;;  %v1583_v23 = vsel %vm1162_vm7, %v1576_v22, %v1582_v11  ;;  %2139 = vmatprep.subr.bf16.mxu1 %v2285_v1  ;;  %v1837_v61 = vld [vmem:[%s2791_s5 + $0x10] sm:$0x1] }
0x19cd   :  { %v1838_v15 = vunpack.c.l.bf16 %v1837_v61 }
0x19ce   :  { %v1577_v39 = vunpack.c.l.b16 %v1557_v27 }
0x19cf   :  { %2140 = vmatpush3.bf16.msra.mxu1 %v2188_v3  ;;  %v1843_v17 = vrot.slane %v1838_v15, %v2377_v12 }
0x19d0   :  { %v1584_v40 = vsel %vm1164_vm8, %v1577_v39, %v1583_v23 }
0x19d1   :  { %v1585_v44 = vpack.c.b16 %v1584_v40, %v1584_v40 }
0x19d3   :  { %2122 = vmatmul.mubr.msk.bf16.vlgmr.msra.gmra.mrb[24].mxu0 %vm89_vm1, %v1585_v44 }
0x19d4   :  { %2126 = vmatpush3.bf16.msra.mxu0 %v2183_v43  ;;  %2129 = vmatprep.mubr.msk.bf16.mxu0 %vm2286_vm0, %v2285_v1 }
0x19d5   :  { %2127 = vmatprep.subr.bf16.mxu0 %v2285_v1 }
0x19d8   :  { %2128 = vmatpush3.bf16.msra.mxu0 %v2184_v45 }
0x19d9   :  { %2145 = vmatprep.subr.bf16.mxu0 %v2285_v1 }
0x19db   :  { %2130 = vmatmul.mubr.msk.bf16.vlgmr.msra.gmra.mrb[28].mxu0 %vm89_vm1, %v1677_v47 }
0x19dc   :  { %2149 = vmatprep.mubr.msk.bf16.mxu0 %vm2286_vm0, %v2285_v1  ;;  %2146 = vmatpush3.bf16.msra.mxu0 %v2189_v18 }
0x19dd   :  { %2147 = vmatprep.subr.bf16.mxu0 %v2285_v1  ;;  %v1752_v1 = vld [vmem:[%s2790_s4 + $0x78] sm:$0x1]  ;;  %s2292_s4 = smov [#allocation2]  }
0x19de   :  { %v1753_v6 = vunpack.c.l.bf16 %v1752_v1  ;;  %s1906_s17 = sshll.u32 %s2292_s4, 4  ;;  %s1907_s17 = int_to_ptr.vmem [resolvable:$true] %s1906_s17 }
0x19df   :  { %s2261_s1 = scalar_lea.vmem %s1907_s17, 128  ;;  %p2266_p1 = scmp.lt.s32.totalorder %s1907_s17, %s1907_s17 }
0x19e0   :  { %2148 = vmatpush3.bf16.msra.mxu0 %v2190_v31  ;;  %v1763_v32 = vrot.slane %v1753_v6, %v2377_v12  ;;  %p2262_p0 = scmp.ne.s32.totalorder %s1907_s17, %s2261_s1  ;;  %p2267_p2 = scmp.lt.s32.totalorder %s2261_s1, %s2261_s1 }
0x19e2   :  { %p2268_p3 = por %p2267_p2, %p2266_p1 }
0x19e4   :  { %p2269_p4 = pnand %p2268_p3, %p2262_p0 }
0x1aa6   :  { %v1635_v50 = vpop.f32.mrb[24].mxu0 }
0x1aa7   :  { %v1636_v52 = vadd.f32 %v1635_v50, %v1561_v14  ;;  %v2123_v55 = vpop.f32.mrb[25].mxu0 }
0x1aa8   :  { %v1638_v42 = vpop.f32.mrb[26].mxu0 }
0x1aa9   :  { %v1641_v57 = vmax.f32 %v1636_v52, 0.0  ;;  %v2124_v20 = vpop.f32.mrb[27].mxu0 }
0x1aab   :  { %1735 = vrot.lane.b32.xlu0 %v1641_v57, %s2291_s7 }
0x1aae   :  { %v1727_v63 = vpop.f32.mrb[28].mxu0 }
0x1aaf   :  { %v1728_v2 = vadd.f32 %v1727_v63, %v1653_v54  ;;  %v2131_v0 = vpop.f32.mrb[29].mxu0 }
0x1ab0   :  { %v1730_v53 = vpop.f32.mrb[30].mxu0 }
0x1ab1   :  { %v1733_v5 = vmax.f32 %v1728_v2, 0.0  ;;  %v2132_v16 = vpop.f32.mrb[31].mxu0 }
0x1ab3   :  { %1740 = vrot.lane.b32.xlu1 %v1733_v5, %s2291_s7 }
0x1b1d   :  { %v1736_v19 = vpop.permute.xlu0 %1735 }
0x1b1e   :  { %v1738_v21 = vmul.f32 %v1736_v19, %v832_v7 }
0x1b20   :  { %1755 = vrot.lane.b32.xlu0 %v1738_v21, %s2289_s2 }
0x1b25   :  { %v1741_v24 = vpop.permute.xlu1 %1740 }
0x1b26   :  { %v1743_v26 = vmul.f32 %v1741_v24, %v832_v7 }
0x1b92   :  { %v1756_v28 = vpop.permute.xlu0 %1755 }
0x1b93   :  { %v1758_v33 = vsel %vm89_vm1, %v1756_v28, %v1743_v26 }
0x1b94   :  { %v1759_v30 = vpack.c.bf16 %v1758_v33, %v1758_v33 }
0x1b96   :  { %2142 = vmatmul.mubr.msk.bf16.vlgmr.msra.gmra.mrb[28].mxu1 %vm1788_vm10, %v1759_v30 }
0x1c69   :  { %v1826_v34 = vpop.f32.mrb[28].mxu1 }
0x1c6a   :  { %v1827_v41 = vadd.f32 %v1826_v34, %v1763_v32  ;;  %v2143_v58 = vpop.f32.mrb[29].mxu1 }
0x1c6b   :  { %v1829_v35 = vpop.f32.mrb[30].mxu1 }
0x1c6c   :  { %v1832_v36 = vmax.f32 %v1827_v41, 0.0  ;;  %v2144_v60 = vpop.f32.mrb[31].mxu1 }
0x1c6e   :  { %v1839_v13 = vpack.c.bf16 %v1832_v36, %v1832_v36 }
0x1c70   :  { %2150 = vmatmul.mubr.msk.bf16.vlgmr.msra.gmra.mrb[32].mxu0 %vm89_vm1, %v1839_v13 }
0x1d43   :  { %v1893_v22 = vpop.f32.mrb[32].mxu0 }
0x1d44   :  { %v1894_v59 = vadd.f32 %v1893_v22, %v1843_v17  ;;  %v2151_v9 = vpop.f32.mrb[33].mxu0 }
0x1d45   :  { %v1896_v27 = vpop.f32.mrb[34].mxu0 }
0x1d46   :  { %1899 = vst [vmem:[#allocation2] sm:$0xff] %v1894_v59  ;;  %v2152_v10 = vpop.f32.mrb[35].mxu0 }
0x1d47   :  { %2272 = shalt.err (!%p2269_p4)
}
0x1d48   :  { %s2273_s19 = scalar_lea.hbm %s2792_s6, 128 }
0x1d49   :  { %p2274_p5 = scmp.ne.s32.totalorder %s2792_s6, %s2273_s19  ;;  %p2277_p6 = scmp.lt.u32.totalorder %s2273_s19, %s2792_s6 }
0x1d4b   :  { %p2279_p7 = pnand %p2277_p6, %p2274_p5 }
0x1d4d   :  { %2282 = shalt.err (!%p2279_p7)
}
0x1d4e   :  { %1909 = dma.vmem_to_hbm [thread:$0]  %s1907_s17, 128, %s2792_s6, [#allocation3]  }
0x1d4f   :  { %2283 = dma.done.wait [#allocation3], 128  }
0x1d50   :  { %2284 = vsyncadd [#allocation3], 4294967168 }
0x1d51   :  { %1913 = vsyncpa [#allocation3], 1 }

</bundles_post_ra>
